<compile_context>
chip_gen: v7x
topology: tpu7x:2x2x1
jax: 0.10.0
libtpu: 0.0.40
codegen_flags: <defaults>
</compile_context>

<pallas_src>
import functools

import jax
import jax.numpy as jnp
from jax.experimental import pallas as pl
from jax.experimental.pallas import tpu as pltpu

LANE = 128


def _round_up(x, m):
    return ((x + m - 1) // m) * m


# ------------------------------ fused kernel --------------------------------

def _bottleneck_kernel(x_ref, w1_ref, w2_ref, w3_ref,
                       s1_ref, b1_ref, s2_ref, b2_ref, s3_ref, b3_ref,
                       o_ref, out1p_ref, *, H, W, dilation):
    """Fused Bottleneck forward for one image (one grid step).

    x_ref     : [1, H*W, Cin_p]  bf16   (channels-last, flattened spatial)
    w1_ref    : [Cin_p, P_p]     bf16
    w2_ref    : [9, P_p, P_p]    bf16   (3x3 taps, row-major (ky, kx))
    w3_ref    : [P_p, Co_p]      bf16
    s*/b*_ref : [1, C]           f32    (folded eval-mode BatchNorm)
    o_ref     : [1, H*W, Co_p]   f32
    out1p_ref : VMEM scratch [H+2d, W+2d, P_p] bf16 (zero-padded conv1 output)
    """
    d = dilation
    HW = H * W
    P_p = w1_ref.shape[1]

    x2d = x_ref[0]                                         # [HW, Cin_p] bf16

    # ---- conv1 (1x1) + bn1 + relu ------------------------------------------
    y1 = jnp.dot(x2d, w1_ref[...], preferred_element_type=jnp.float32)
    y1 = jnp.maximum(y1 * s1_ref[...] + b1_ref[...], 0.0)          # [HW, P_p]

    # Keep the zero-padded conv1 activation resident in VMEM: this *is* the
    # `padding=dilation` of conv2 (no HBM write, no jnp.pad).  Zero every step
    # (scratch is per-core; do not rely on program_id==0 init under "parallel").
    out1p_ref[...] = jnp.zeros_like(out1p_ref)
    out1p_ref[pl.ds(d, H), pl.ds(d, W), :] = (
        y1.astype(out1p_ref.dtype).reshape(H, W, P_p))

    # ---- conv2 (3x3, dilated) + bn2 + relu ----------------------------------
    # 9 accumulated [HW, P_p] x [P_p, P_p] matmuls, one per tap, over shifted
    # windows of the padded VMEM buffer (large-M MXU work, no per-row loops).
    acc = jnp.zeros((HW, P_p), jnp.float32)
    for ky in range(3):
        for kx in range(3):
            slab = out1p_ref[pl.ds(ky * d, H), pl.ds(kx * d, W), :]
            acc = acc + jnp.dot(slab.reshape(HW, P_p), w2_ref[3 * ky + kx],
                                preferred_element_type=jnp.float32)
    y2 = jnp.maximum(acc * s2_ref[...] + b2_ref[...], 0.0)
    y2 = y2.astype(x2d.dtype)                                       # [HW, P_p]

    # ---- conv3 (1x1) + bn3 + residual add + relu ----------------------------
    y3 = jnp.dot(y2, w3_ref[...], preferred_element_type=jnp.float32)
    y3 = y3 * s3_ref[...] + b3_ref[...] + x2d.astype(jnp.float32)
    o_ref[0] = jnp.maximum(y3, 0.0).astype(o_ref.dtype)


# ------------------------------ wrapper --------------------------------------

def bottleneck_forward(x_nchw, params, *, stride=1, dilation=1):
    """Pallas implementation of Bottleneck.forward (downsample=None)."""
    assert stride == 1, "downsample is None => stride must be 1 for the residual add"
    x = jnp.transpose(x_nchw, (0, 2, 3, 1))                        # NHWC
    N, H, W, Cin = x.shape
    w1, w2, w3 = params["w1"], params["w2"], params["w3"]
    P = w1.shape[1]
    Co = w3.shape[1]
    assert Co == Cin, "residual add requires inplanes == 4*planes"

    Cin_p = _round_up(Cin, LANE)
    P_p = _round_up(P, LANE)
    Co_p = _round_up(Co, LANE)
    d = dilation
    HW = H * W

    def padc(a, shape):
        return jnp.pad(a, [(0, s - o) for o, s in zip(a.shape, shape)])

    # bf16 activations/weights (f32 accumulate in-kernel); f32 BN scale/shift.
    xp = padc(x, (N, H, W, Cin_p)).astype(jnp.bfloat16).reshape(N, HW, Cin_p)
    w1p = padc(w1, (Cin_p, P_p)).astype(jnp.bfloat16)
    w2p = padc(w2, (9, P_p, P_p)).astype(jnp.bfloat16)
    w3p = padc(w3, (P_p, Co_p)).astype(jnp.bfloat16)
    s1 = padc(params["bn1_scale"].reshape(1, P), (1, P_p)).astype(jnp.float32)
    b1 = padc(params["bn1_shift"].reshape(1, P), (1, P_p)).astype(jnp.float32)
    s2 = padc(params["bn2_scale"].reshape(1, P), (1, P_p)).astype(jnp.float32)
    b2 = padc(params["bn2_shift"].reshape(1, P), (1, P_p)).astype(jnp.float32)
    s3 = padc(params["bn3_scale"].reshape(1, Co), (1, Co_p)).astype(jnp.float32)
    b3 = padc(params["bn3_shift"].reshape(1, Co), (1, Co_p)).astype(jnp.float32)

    kernel = functools.partial(_bottleneck_kernel, H=H, W=W, dilation=d)

    out = pl.pallas_call(
        kernel,
        out_shape=jax.ShapeDtypeStruct((N, HW, Co_p), jnp.float32),
        grid=(N,),
        in_specs=[
            pl.BlockSpec((1, HW, Cin_p), lambda n: (n, 0, 0)),   # x (conv1 + residual)
            pl.BlockSpec((Cin_p, P_p), lambda n: (0, 0)),        # w1
            pl.BlockSpec((9, P_p, P_p), lambda n: (0, 0, 0)),    # w2 (9 taps)
            pl.BlockSpec((P_p, Co_p), lambda n: (0, 0)),         # w3
            pl.BlockSpec((1, P_p), lambda n: (0, 0)),            # bn1 scale
            pl.BlockSpec((1, P_p), lambda n: (0, 0)),            # bn1 shift
            pl.BlockSpec((1, P_p), lambda n: (0, 0)),            # bn2 scale
            pl.BlockSpec((1, P_p), lambda n: (0, 0)),            # bn2 shift
            pl.BlockSpec((1, Co_p), lambda n: (0, 0)),           # bn3 scale
            pl.BlockSpec((1, Co_p), lambda n: (0, 0)),           # bn3 shift
        ],
        out_specs=pl.BlockSpec((1, HW, Co_p), lambda n: (n, 0, 0)),
        scratch_shapes=[pltpu.VMEM((H + 2 * d, W + 2 * d, P_p), jnp.bfloat16)],
        compiler_params=pltpu.CompilerParams(
            dimension_semantics=("parallel",),
            vmem_limit_bytes=64 * 1024 * 1024),
    )(xp, w1p, w2p, w3p, s1, b1, s2, b2, s3, b3)

    out = out.reshape(N, H, W, Co_p)[:, :, :, :Co]
    return jnp.transpose(out, (0, 3, 1, 2))                       # back to NCHW


# ----------------------------- pure-JAX reference ----------------------------

def bottleneck_ref(x, pt, *, stride=1, dilation=1, eps=1e-5):
    def conv(y, w, stride=1, dilation=1, padding=0):
        return jax.lax.conv_general_dilated(
            y, w, (stride, stride), [(padding, padding)] * 2,
            rhs_dilation=(dilation, dilation),
            dimension_numbers=("NCHW", "OIHW", "NCHW"))

    def bn(y, p):
        gamma, beta, mean, var = p
        inv = (gamma / jnp.sqrt(var + eps)).reshape(1, -1, 1, 1)
        return (y - mean.reshape(1, -1, 1, 1)) * inv + beta.reshape(1, -1, 1, 1)

    out = jax.nn.relu(bn(conv(x, pt["w1"], stride=stride), pt["bn1"]))
    out = jax.nn.relu(bn(conv(out, pt["w2"], dilation=dilation, padding=dilation),
                         pt["bn2"]))
    out = bn(conv(out, pt["w3"]), pt["bn3"])
    return jax.nn.relu(out + x)


# --------------------------------- main ---------------------------------------

def _fold_bn(gamma, beta, mean, var, eps=1e-5):
    scale = gamma / jnp.sqrt(var + eps)
    shift = beta - mean * scale
    return scale, shift


if __name__ == "__main__":
    key = jax.random.PRNGKey(0)
    inplanes, planes = 16, 4           # expansion = 4  =>  out channels = 16
    N, H, W = 2, 16, 16
    stride, dilation = 1, 2

    ks = jax.random.split(key, 16)
    x = jax.random.normal(ks[0], (N, inplanes, H, W), jnp.float32)

    # PyTorch-layout (OIHW) weights, deterministic init.
    w1_pt = 0.1 * jax.random.normal(ks[1], (planes, inplanes, 1, 1), jnp.float32)
    w2_pt = 0.1 * jax.random.normal(ks[2], (planes, planes, 3, 3), jnp.float32)
    w3_pt = 0.1 * jax.random.normal(ks[3], (planes * 4, planes, 1, 1), jnp.float32)

    def bn_init(kg, kb, km, kv, c):
        gamma = 1.0 + 0.1 * jax.random.normal(kg, (c,), jnp.float32)
        beta = 0.1 * jax.random.normal(kb, (c,), jnp.float32)
        mean = 0.1 * jax.random.normal(km, (c,), jnp.float32)
        var = jnp.abs(jax.random.normal(kv, (c,), jnp.float32)) + 0.5
        return gamma, beta, mean, var

    bn1 = bn_init(ks[4], ks[5], ks[6], ks[7], planes)
    bn2 = bn_init(ks[8], ks[9], ks[10], ks[11], planes)
    bn3 = bn_init(ks[12], ks[13], ks[14], ks[15], planes * 4)

    # Kernel-layout parameters (channels-last matmul weights, folded BN).
    s1, b1 = _fold_bn(*bn1)
    s2, b2 = _fold_bn(*bn2)
    s3, b3 = _fold_bn(*bn3)
    params = {
        "w1": w1_pt[:, :, 0, 0].T,                                   # [Cin, P]
        "w2": jnp.transpose(w2_pt, (2, 3, 1, 0)).reshape(9, planes, planes),
        "w3": w3_pt[:, :, 0, 0].T,                                   # [P, 4P]
        "bn1_scale": s1, "bn1_shift": b1,
        "bn2_scale": s2, "bn2_shift": b2,
        "bn3_scale": s3, "bn3_shift": b3,
    }
    pt_params = {"w1": w1_pt, "w2": w2_pt, "w3": w3_pt,
                 "bn1": bn1, "bn2": bn2, "bn3": bn3}

    out = bottleneck_forward(x, params, stride=stride, dilation=dilation)
    out = jax.block_until_ready(out)

    ref = bottleneck_ref(x, pt_params, stride=stride, dilation=dilation)
    ref = jax.block_until_ready(ref)

    assert out.shape == (N, planes * 4, H, W), out.shape
    # bf16 activations/weights in the kernel vs f32 reference -> tolerant check.
    if not bool(jnp.allclose(out, ref, rtol=2e-2, atol=3e-2)):
        raise AssertionError(
            f"mismatch vs reference: max abs err = {float(jnp.max(jnp.abs(out - ref)))}")
    print("KERNEL_OK")
</pallas_src>

<mosaic_0001>
module attributes {stable_mosaic.version = 11 : i64} {
  func.func @_bottleneck_kernel(%arg0: i32, %arg1: memref<1x256x128xbf16, #tpu.memory_space<vmem>>, %arg2: memref<128x128xbf16, #tpu.memory_space<vmem>>, %arg3: memref<9x128x128xbf16, #tpu.memory_space<vmem>>, %arg4: memref<128x128xbf16, #tpu.memory_space<vmem>>, %arg5: memref<1x128xf32, #tpu.memory_space<vmem>>, %arg6: memref<1x128xf32, #tpu.memory_space<vmem>>, %arg7: memref<1x128xf32, #tpu.memory_space<vmem>>, %arg8: memref<1x128xf32, #tpu.memory_space<vmem>>, %arg9: memref<1x128xf32, #tpu.memory_space<vmem>>, %arg10: memref<1x128xf32, #tpu.memory_space<vmem>>, %arg11: memref<1x256x128xf32, #tpu.memory_space<vmem>>, %arg12: memref<20x20x128xbf16, #tpu.memory_space<vmem>>) attributes {dimension_semantics = [#tpu.dimension_semantics<parallel>], iteration_bounds = array<i64: 2>, scalar_prefetch = 0 : i64, scratch_operands = 1 : i64, tpu.core_type = #tpu.core_type<tc>, window_params = [{transform_indices = @transform_0, window_bounds = array<i64: 1, 256, 128>}, {pipeline_mode = #tpu.pipeline_mode<synchronous>, transform_indices = @transform_1, window_bounds = array<i64: 128, 128>}, {pipeline_mode = #tpu.pipeline_mode<synchronous>, transform_indices = @transform_2, window_bounds = array<i64: 9, 128, 128>}, {pipeline_mode = #tpu.pipeline_mode<synchronous>, transform_indices = @transform_3, window_bounds = array<i64: 128, 128>}, {pipeline_mode = #tpu.pipeline_mode<synchronous>, transform_indices = @transform_4, window_bounds = array<i64: 1, 128>}, {pipeline_mode = #tpu.pipeline_mode<synchronous>, transform_indices = @transform_5, window_bounds = array<i64: 1, 128>}, {pipeline_mode = #tpu.pipeline_mode<synchronous>, transform_indices = @transform_6, window_bounds = array<i64: 1, 128>}, {pipeline_mode = #tpu.pipeline_mode<synchronous>, transform_indices = @transform_7, window_bounds = array<i64: 1, 128>}, {pipeline_mode = #tpu.pipeline_mode<synchronous>, transform_indices = @transform_8, window_bounds = array<i64: 1, 128>}, {pipeline_mode = #tpu.pipeline_mode<synchronous>, transform_indices = @transform_9, window_bounds = array<i64: 1, 128>}, {transform_indices = @transform_10, window_bounds = array<i64: 1, 256, 128>}]} {
    %c0 = arith.constant 0 : index
    %c0_0 = arith.constant 0 : index
    %c0_1 = arith.constant 0 : index
    %0 = vector.load %arg1[%c0, %c0_0, %c0_1] : memref<1x256x128xbf16, #tpu.memory_space<vmem>>, vector<1x256x128xbf16>
    %1 = vector.shape_cast %0 : vector<1x256x128xbf16> to vector<256x128xbf16>
    %c0_2 = arith.constant 0 : index
    %c0_3 = arith.constant 0 : index
    %2 = vector.load %arg2[%c0_2, %c0_3] : memref<128x128xbf16, #tpu.memory_space<vmem>>, vector<128x128xbf16>
    %cst = arith.constant dense<0.000000e+00> : vector<256x128xf32>
    %3 = tpu.matmul %1, %2, %cst {dimension_numbers = #tpu.dot_dimension_numbers<[1], [0], [0], [1], [0, 0, 1, 1], [], []>} : vector<256x128xbf16>, vector<128x128xbf16>, vector<256x128xf32> -> vector<256x128xf32>
    %c0_4 = arith.constant 0 : index
    %c0_5 = arith.constant 0 : index
    %4 = vector.load %arg5[%c0_4, %c0_5] : memref<1x128xf32, #tpu.memory_space<vmem>>, vector<1x128xf32>
    %5 = vector.broadcast %4 : vector<1x128xf32> to vector<256x128xf32>
    %6 = arith.mulf %3, %5 : vector<256x128xf32>
    %c0_6 = arith.constant 0 : index
    %c0_7 = arith.constant 0 : index
    %7 = vector.load %arg6[%c0_6, %c0_7] : memref<1x128xf32, #tpu.memory_space<vmem>>, vector<1x128xf32>
    %8 = vector.broadcast %7 : vector<1x128xf32> to vector<256x128xf32>
    %9 = arith.addf %6, %8 : vector<256x128xf32>
    %cst_8 = arith.constant 0.000000e+00 : f32
    %10 = vector.broadcast %cst_8 : f32 to vector<256x128xf32>
    %11 = arith.maximumf %9, %10 : vector<256x128xf32>
    %cst_9 = arith.constant 0.000000e+00 : bf16
    %12 = vector.broadcast %cst_9 : bf16 to vector<20x20x128xbf16>
    %c0_10 = arith.constant 0 : index
    %c0_11 = arith.constant 0 : index
    %c0_12 = arith.constant 0 : index
    %13 = vector.load %arg12[%c0_10, %c0_11, %c0_12] : memref<20x20x128xbf16, #tpu.memory_space<vmem>>, vector<20x20x128xbf16>
    tpu.vector_store %arg12[%c0_10, %c0_11, %c0_12], %12 {strides = array<i32>} : memref<20x20x128xbf16, #tpu.memory_space<vmem>>, vector<20x20x128xbf16>,
    %14 = arith.truncf %11 : vector<256x128xf32> to vector<256x128xbf16>
    %15 = vector.shape_cast %14 : vector<256x128xbf16> to vector<16x16x128xbf16>
    %c2 = arith.constant 2 : index
    %c2_13 = arith.constant 2 : index
    %c0_14 = arith.constant 0 : index
    %16 = vector.load %arg12[%c2, %c2_13, %c0_14] : memref<20x20x128xbf16, #tpu.memory_space<vmem>>, vector<16x16x128xbf16>
    tpu.vector_store %arg12[%c2, %c2_13, %c0_14], %15 {strides = array<i32>} : memref<20x20x128xbf16, #tpu.memory_space<vmem>>, vector<16x16x128xbf16>,
    %cst_15 = arith.constant 0.000000e+00 : f32
    %17 = vector.broadcast %cst_15 : f32 to vector<256x128xf32>
    %c0_16 = arith.constant 0 : index
    %c0_17 = arith.constant 0 : index
    %c0_18 = arith.constant 0 : index
    %18 = vector.load %arg12[%c0_16, %c0_17, %c0_18] : memref<20x20x128xbf16, #tpu.memory_space<vmem>>, vector<16x16x128xbf16>
    %19 = vector.shape_cast %18 : vector<16x16x128xbf16> to vector<256x128xbf16>
    %c0_19 = arith.constant 0 : index
    %c0_20 = arith.constant 0 : index
    %c0_21 = arith.constant 0 : index
    %20 = vector.load %arg3[%c0_19, %c0_20, %c0_21] : memref<9x128x128xbf16, #tpu.memory_space<vmem>>, vector<1x128x128xbf16>
    %21 = vector.shape_cast %20 : vector<1x128x128xbf16> to vector<128x128xbf16>
    %cst_22 = arith.constant dense<0.000000e+00> : vector<256x128xf32>
    %22 = tpu.matmul %19, %21, %cst_22 {dimension_numbers = #tpu.dot_dimension_numbers<[1], [0], [0], [1], [0, 0, 1, 1], [], []>} : vector<256x128xbf16>, vector<128x128xbf16>, vector<256x128xf32> -> vector<256x128xf32>
    %23 = arith.addf %17, %22 : vector<256x128xf32>
    %c0_23 = arith.constant 0 : index
    %c2_24 = arith.constant 2 : index
    %c0_25 = arith.constant 0 : index
    %24 = vector.load %arg12[%c0_23, %c2_24, %c0_25] : memref<20x20x128xbf16, #tpu.memory_space<vmem>>, vector<16x16x128xbf16>
    %25 = vector.shape_cast %24 : vector<16x16x128xbf16> to vector<256x128xbf16>
    %c1 = arith.constant 1 : index
    %c0_26 = arith.constant 0 : index
    %c0_27 = arith.constant 0 : index
    %26 = vector.load %arg3[%c1, %c0_26, %c0_27] : memref<9x128x128xbf16, #tpu.memory_space<vmem>>, vector<1x128x128xbf16>
    %27 = vector.shape_cast %26 : vector<1x128x128xbf16> to vector<128x128xbf16>
    %cst_28 = arith.constant dense<0.000000e+00> : vector<256x128xf32>
    %28 = tpu.matmul %25, %27, %cst_28 {dimension_numbers = #tpu.dot_dimension_numbers<[1], [0], [0], [1], [0, 0, 1, 1], [], []>} : vector<256x128xbf16>, vector<128x128xbf16>, vector<256x128xf32> -> vector<256x128xf32>
    %29 = arith.addf %23, %28 : vector<256x128xf32>
    %c0_29 = arith.constant 0 : index
    %c4 = arith.constant 4 : index
    %c0_30 = arith.constant 0 : index
    %30 = vector.load %arg12[%c0_29, %c4, %c0_30] : memref<20x20x128xbf16, #tpu.memory_space<vmem>>, vector<16x16x128xbf16>
    %31 = vector.shape_cast %30 : vector<16x16x128xbf16> to vector<256x128xbf16>
    %c2_31 = arith.constant 2 : index
    %c0_32 = arith.constant 0 : index
    %c0_33 = arith.constant 0 : index
    %32 = vector.load %arg3[%c2_31, %c0_32, %c0_33] : memref<9x128x128xbf16, #tpu.memory_space<vmem>>, vector<1x128x128xbf16>
    %33 = vector.shape_cast %32 : vector<1x128x128xbf16> to vector<128x128xbf16>
    %cst_34 = arith.constant dense<0.000000e+00> : vector<256x128xf32>
    %34 = tpu.matmul %31, %33, %cst_34 {dimension_numbers = #tpu.dot_dimension_numbers<[1], [0], [0], [1], [0, 0, 1, 1], [], []>} : vector<256x128xbf16>, vector<128x128xbf16>, vector<256x128xf32> -> vector<256x128xf32>
    %35 = arith.addf %29, %34 : vector<256x128xf32>
    %c2_35 = arith.constant 2 : index
    %c0_36 = arith.constant 0 : index
    %c0_37 = arith.constant 0 : index
    %36 = vector.load %arg12[%c2_35, %c0_36, %c0_37] : memref<20x20x128xbf16, #tpu.memory_space<vmem>>, vector<16x16x128xbf16>
    %37 = vector.shape_cast %36 : vector<16x16x128xbf16> to vector<256x128xbf16>
    %c3 = arith.constant 3 : index
    %c0_38 = arith.constant 0 : index
    %c0_39 = arith.constant 0 : index
    %38 = vector.load %arg3[%c3, %c0_38, %c0_39] : memref<9x128x128xbf16, #tpu.memory_space<vmem>>, vector<1x128x128xbf16>
    %39 = vector.shape_cast %38 : vector<1x128x128xbf16> to vector<128x128xbf16>
    %cst_40 = arith.constant dense<0.000000e+00> : vector<256x128xf32>
    %40 = tpu.matmul %37, %39, %cst_40 {dimension_numbers = #tpu.dot_dimension_numbers<[1], [0], [0], [1], [0, 0, 1, 1], [], []>} : vector<256x128xbf16>, vector<128x128xbf16>, vector<256x128xf32> -> vector<256x128xf32>
    %41 = arith.addf %35, %40 : vector<256x128xf32>
    %c2_41 = arith.constant 2 : index
    %c2_42 = arith.constant 2 : index
    %c0_43 = arith.constant 0 : index
    %42 = vector.load %arg12[%c2_41, %c2_42, %c0_43] : memref<20x20x128xbf16, #tpu.memory_space<vmem>>, vector<16x16x128xbf16>
    %43 = vector.shape_cast %42 : vector<16x16x128xbf16> to vector<256x128xbf16>
    %c4_44 = arith.constant 4 : index
    %c0_45 = arith.constant 0 : index
    %c0_46 = arith.constant 0 : index
    %44 = vector.load %arg3[%c4_44, %c0_45, %c0_46] : memref<9x128x128xbf16, #tpu.memory_space<vmem>>, vector<1x128x128xbf16>
    %45 = vector.shape_cast %44 : vector<1x128x128xbf16> to vector<128x128xbf16>
    %cst_47 = arith.constant dense<0.000000e+00> : vector<256x128xf32>
    %46 = tpu.matmul %43, %45, %cst_47 {dimension_numbers = #tpu.dot_dimension_numbers<[1], [0], [0], [1], [0, 0, 1, 1], [], []>} : vector<256x128xbf16>, vector<128x128xbf16>, vector<256x128xf32> -> vector<256x128xf32>
    %47 = arith.addf %41, %46 : vector<256x128xf32>
    %c2_48 = arith.constant 2 : index
    %c4_49 = arith.constant 4 : index
    %c0_50 = arith.constant 0 : index
    %48 = vector.load %arg12[%c2_48, %c4_49, %c0_50] : memref<20x20x128xbf16, #tpu.memory_space<vmem>>, vector<16x16x128xbf16>
    %49 = vector.shape_cast %48 : vector<16x16x128xbf16> to vector<256x128xbf16>
    %c5 = arith.constant 5 : index
    %c0_51 = arith.constant 0 : index
    %c0_52 = arith.constant 0 : index
    %50 = vector.load %arg3[%c5, %c0_51, %c0_52] : memref<9x128x128xbf16, #tpu.memory_space<vmem>>, vector<1x128x128xbf16>
    %51 = vector.shape_cast %50 : vector<1x128x128xbf16> to vector<128x128xbf16>
    %cst_53 = arith.constant dense<0.000000e+00> : vector<256x128xf32>
    %52 = tpu.matmul %49, %51, %cst_53 {dimension_numbers = #tpu.dot_dimension_numbers<[1], [0], [0], [1], [0, 0, 1, 1], [], []>} : vector<256x128xbf16>, vector<128x128xbf16>, vector<256x128xf32> -> vector<256x128xf32>
    %53 = arith.addf %47, %52 : vector<256x128xf32>
    %c4_54 = arith.constant 4 : index
    %c0_55 = arith.constant 0 : index
    %c0_56 = arith.constant 0 : index
    %54 = vector.load %arg12[%c4_54, %c0_55, %c0_56] : memref<20x20x128xbf16, #tpu.memory_space<vmem>>, vector<16x16x128xbf16>
    %55 = vector.shape_cast %54 : vector<16x16x128xbf16> to vector<256x128xbf16>
    %c6 = arith.constant 6 : index
    %c0_57 = arith.constant 0 : index
    %c0_58 = arith.constant 0 : index
    %56 = vector.load %arg3[%c6, %c0_57, %c0_58] : memref<9x128x128xbf16, #tpu.memory_space<vmem>>, vector<1x128x128xbf16>
    %57 = vector.shape_cast %56 : vector<1x128x128xbf16> to vector<128x128xbf16>
    %cst_59 = arith.constant dense<0.000000e+00> : vector<256x128xf32>
    %58 = tpu.matmul %55, %57, %cst_59 {dimension_numbers = #tpu.dot_dimension_numbers<[1], [0], [0], [1], [0, 0, 1, 1], [], []>} : vector<256x128xbf16>, vector<128x128xbf16>, vector<256x128xf32> -> vector<256x128xf32>
    %59 = arith.addf %53, %58 : vector<256x128xf32>
    %c4_60 = arith.constant 4 : index
    %c2_61 = arith.constant 2 : index
    %c0_62 = arith.constant 0 : index
    %60 = vector.load %arg12[%c4_60, %c2_61, %c0_62] : memref<20x20x128xbf16, #tpu.memory_space<vmem>>, vector<16x16x128xbf16>
    %61 = vector.shape_cast %60 : vector<16x16x128xbf16> to vector<256x128xbf16>
    %c7 = arith.constant 7 : index
    %c0_63 = arith.constant 0 : index
    %c0_64 = arith.constant 0 : index
    %62 = vector.load %arg3[%c7, %c0_63, %c0_64] : memref<9x128x128xbf16, #tpu.memory_space<vmem>>, vector<1x128x128xbf16>
    %63 = vector.shape_cast %62 : vector<1x128x128xbf16> to vector<128x128xbf16>
    %cst_65 = arith.constant dense<0.000000e+00> : vector<256x128xf32>
    %64 = tpu.matmul %61, %63, %cst_65 {dimension_numbers = #tpu.dot_dimension_numbers<[1], [0], [0], [1], [0, 0, 1, 1], [], []>} : vector<256x128xbf16>, vector<128x128xbf16>, vector<256x128xf32> -> vector<256x128xf32>
    %65 = arith.addf %59, %64 : vector<256x128xf32>
    %c4_66 = arith.constant 4 : index
    %c4_67 = arith.constant 4 : index
    %c0_68 = arith.constant 0 : index
    %66 = vector.load %arg12[%c4_66, %c4_67, %c0_68] : memref<20x20x128xbf16, #tpu.memory_space<vmem>>, vector<16x16x128xbf16>
    %67 = vector.shape_cast %66 : vector<16x16x128xbf16> to vector<256x128xbf16>
    %c8 = arith.constant 8 : index
    %c0_69 = arith.constant 0 : index
    %c0_70 = arith.constant 0 : index
    %68 = vector.load %arg3[%c8, %c0_69, %c0_70] : memref<9x128x128xbf16, #tpu.memory_space<vmem>>, vector<1x128x128xbf16>
    %69 = vector.shape_cast %68 : vector<1x128x128xbf16> to vector<128x128xbf16>
    %cst_71 = arith.constant dense<0.000000e+00> : vector<256x128xf32>
    %70 = tpu.matmul %67, %69, %cst_71 {dimension_numbers = #tpu.dot_dimension_numbers<[1], [0], [0], [1], [0, 0, 1, 1], [], []>} : vector<256x128xbf16>, vector<128x128xbf16>, vector<256x128xf32> -> vector<256x128xf32>
    %71 = arith.addf %65, %70 : vector<256x128xf32>
    %c0_72 = arith.constant 0 : index
    %c0_73 = arith.constant 0 : index
    %72 = vector.load %arg7[%c0_72, %c0_73] : memref<1x128xf32, #tpu.memory_space<vmem>>, vector<1x128xf32>
    %73 = vector.broadcast %72 : vector<1x128xf32> to vector<256x128xf32>
    %74 = arith.mulf %71, %73 : vector<256x128xf32>
    %c0_74 = arith.constant 0 : index
    %c0_75 = arith.constant 0 : index
    %75 = vector.load %arg8[%c0_74, %c0_75] : memref<1x128xf32, #tpu.memory_space<vmem>>, vector<1x128xf32>
    %76 = vector.broadcast %75 : vector<1x128xf32> to vector<256x128xf32>
    %77 = arith.addf %74, %76 : vector<256x128xf32>
    %cst_76 = arith.constant 0.000000e+00 : f32
    %78 = vector.broadcast %cst_76 : f32 to vector<256x128xf32>
    %79 = arith.maximumf %77, %78 : vector<256x128xf32>
    %80 = arith.truncf %79 : vector<256x128xf32> to vector<256x128xbf16>
    %c0_77 = arith.constant 0 : index
    %c0_78 = arith.constant 0 : index
    %81 = vector.load %arg4[%c0_77, %c0_78] : memref<128x128xbf16, #tpu.memory_space<vmem>>, vector<128x128xbf16>
    %cst_79 = arith.constant dense<0.000000e+00> : vector<256x128xf32>
    %82 = tpu.matmul %80, %81, %cst_79 {dimension_numbers = #tpu.dot_dimension_numbers<[1], [0], [0], [1], [0, 0, 1, 1], [], []>} : vector<256x128xbf16>, vector<128x128xbf16>, vector<256x128xf32> -> vector<256x128xf32>
    %c0_80 = arith.constant 0 : index
    %c0_81 = arith.constant 0 : index
    %83 = vector.load %arg9[%c0_80, %c0_81] : memref<1x128xf32, #tpu.memory_space<vmem>>, vector<1x128xf32>
    %84 = vector.broadcast %83 : vector<1x128xf32> to vector<256x128xf32>
    %85 = arith.mulf %82, %84 : vector<256x128xf32>
    %c0_82 = arith.constant 0 : index
    %c0_83 = arith.constant 0 : index
    %86 = vector.load %arg10[%c0_82, %c0_83] : memref<1x128xf32, #tpu.memory_space<vmem>>, vector<1x128xf32>
    %87 = vector.broadcast %86 : vector<1x128xf32> to vector<256x128xf32>
    %88 = arith.addf %85, %87 : vector<256x128xf32>
    %89 = arith.extf %1 : vector<256x128xbf16> to vector<256x128xf32>
    %90 = arith.addf %88, %89 : vector<256x128xf32>
    %cst_84 = arith.constant 0.000000e+00 : f32
    %91 = vector.broadcast %cst_84 : f32 to vector<256x128xf32>
    %92 = arith.maximumf %90, %91 : vector<256x128xf32>
    %c0_85 = arith.constant 0 : index
    %c0_86 = arith.constant 0 : index
    %c0_87 = arith.constant 0 : index
    %93 = vector.load %arg11[%c0_85, %c0_86, %c0_87] : memref<1x256x128xf32, #tpu.memory_space<vmem>>, vector<1x256x128xf32>
    %94 = vector.shape_cast %93 : vector<1x256x128xf32> to vector<256x128xf32>
    %95 = vector.shape_cast %92 : vector<256x128xf32> to vector<1x256x128xf32>
    tpu.vector_store %arg11[%c0_85, %c0_86, %c0_87], %95 {strides = array<i32>} : memref<1x256x128xf32, #tpu.memory_space<vmem>>, vector<1x256x128xf32>,
    return
  }
  func.func @transform_0(%arg0: i32) -> (i32, i32, i32) {
    %c0_i32 = arith.constant 0 : i32
    %c0_i32_0 = arith.constant 0 : i32
    %c0_i32_1 = arith.constant 0 : i32
    return %arg0, %c0_i32, %c0_i32_0 : i32, i32, i32
  }
  func.func @transform_1(%arg0: i32) -> (i32, i32) {
    %c0_i32 = arith.constant 0 : i32
    %c0_i32_0 = arith.constant 0 : i32
    %c0_i32_1 = arith.constant 0 : i32
    return %c0_i32, %c0_i32_0 : i32, i32
  }
  func.func @transform_2(%arg0: i32) -> (i32, i32, i32) {
    %c0_i32 = arith.constant 0 : i32
    %c0_i32_0 = arith.constant 0 : i32
    %c0_i32_1 = arith.constant 0 : i32
    %c0_i32_2 = arith.constant 0 : i32
    return %c0_i32, %c0_i32_0, %c0_i32_1 : i32, i32, i32
  }
  func.func @transform_3(%arg0: i32) -> (i32, i32) {
    %c0_i32 = arith.constant 0 : i32
    %c0_i32_0 = arith.constant 0 : i32
    %c0_i32_1 = arith.constant 0 : i32
    return %c0_i32, %c0_i32_0 : i32, i32
  }
  func.func @transform_4(%arg0: i32) -> (i32, i32) {
    %c0_i32 = arith.constant 0 : i32
    %c0_i32_0 = arith.constant 0 : i32
    %c0_i32_1 = arith.constant 0 : i32
    return %c0_i32, %c0_i32_0 : i32, i32
  }
  func.func @transform_5(%arg0: i32) -> (i32, i32) {
    %c0_i32 = arith.constant 0 : i32
    %c0_i32_0 = arith.constant 0 : i32
    %c0_i32_1 = arith.constant 0 : i32
    return %c0_i32, %c0_i32_0 : i32, i32
  }
  func.func @transform_6(%arg0: i32) -> (i32, i32) {
    %c0_i32 = arith.constant 0 : i32
    %c0_i32_0 = arith.constant 0 : i32
    %c0_i32_1 = arith.constant 0 : i32
    return %c0_i32, %c0_i32_0 : i32, i32
  }
  func.func @transform_7(%arg0: i32) -> (i32, i32) {
    %c0_i32 = arith.constant 0 : i32
    %c0_i32_0 = arith.constant 0 : i32
    %c0_i32_1 = arith.constant 0 : i32
    return %c0_i32, %c0_i32_0 : i32, i32
  }
  func.func @transform_8(%arg0: i32) -> (i32, i32) {
    %c0_i32 = arith.constant 0 : i32
    %c0_i32_0 = arith.constant 0 : i32
    %c0_i32_1 = arith.constant 0 : i32
    return %c0_i32, %c0_i32_0 : i32, i32
  }
  func.func @transform_9(%arg0: i32) -> (i32, i32) {
    %c0_i32 = arith.constant 0 : i32
    %c0_i32_0 = arith.constant 0 : i32
    %c0_i32_1 = arith.constant 0 : i32
    return %c0_i32, %c0_i32_0 : i32, i32
  }
  func.func @transform_10(%arg0: i32) -> (i32, i32, i32) {
    %c0_i32 = arith.constant 0 : i32
    %c0_i32_0 = arith.constant 0 : i32
    %c0_i32_1 = arith.constant 0 : i32
    return %arg0, %c0_i32, %c0_i32_0 : i32, i32, i32
  }
}

</mosaic_0001>

<bundles_post_ra>
// kernel: tpu_custom_call.1
= control target key start
LH: loop header
LB: loop body
LE: loop exit
PB: predicated region body
PF: predicated region fallthrough
CT: control target
= control target key end

     0   :  { %s9896_s0 = inlined_call_operand.hbm [shape: bf16[2,256,128], index: 0, kind: input, shape index: {}]   ;;  %s9897_s1 = inlined_call_operand.hbm [shape: bf16[128,128], index: 1, kind: input, shape index: {}]   ;;  %s9898_s2 = inlined_call_operand.hbm [shape: bf16[9,128,128], index: 2, kind: input, shape index: {}]   ;;  %s9899_s3 = inlined_call_operand.hbm [shape: bf16[128,128], index: 3, kind: input, shape index: {}]   ;;  %s9900_s4 = inlined_call_operand.hbm [shape: f32[1,128], index: 4, kind: input, shape index: {}]   ;;  %s9901_s5 = inlined_call_operand.hbm [shape: f32[1,128], index: 5, kind: input, shape index: {}]   ;;  %s9902_s6 = inlined_call_operand.hbm [shape: f32[1,128], index: 6, kind: input, shape index: {}]   ;;  %s9903_s7 = inlined_call_operand.hbm [shape: f32[1,128], index: 7, kind: input, shape index: {}]   ;;  %s9904_s8 = inlined_call_operand.hbm [shape: f32[1,128], index: 8, kind: input, shape index: {}]   ;;  %s9905_s9 = inlined_call_operand.hbm [shape: f32[1,128], index: 9, kind: input, shape index: {}]   ;;  %s9906_s10 = inlined_call_operand.hbm [shape: f32[2,256,128], index: 10, kind: output, shape index: {}]  }
   0x1   :  { %9915 = sst [smem:[#allocation29_spill]] %s9897_s1 }
   0x2   :  { %9916 = sst [smem:[#allocation30_spill]] %s9906_s10 }
   0x3   :  { %15 = vsyncpa [#allocation4], 0 }
   0x4   :  { %17 = vsyncpa [#allocation4 + $0x1], 0 }
   0x5   :  { %18 = vsyncpa [#allocation7], 0 }
   0x6   :  { %19 = vsyncpa [#allocation10], 0 }
   0x7   :  { %20 = vsyncpa [#allocation13], 0 }
   0x8   :  { %21 = vsyncpa [#allocation16], 0 }
   0x9   :  { %22 = vsyncpa [#allocation19], 0 }
   0xa   :  { %23 = vsyncpa [#allocation5], 0 }
   0xb   :  { %25 = vsyncpa [#allocation5 + $0x1], 0  ;;  %s8483_s13 = smov 0   ;;  %s8485_s14 = smov 0  }
   0xc   :  { %s8487_s15 = smov 0   ;;  %s8489_s16 = smov 0  }
   0xd LB: > { %s8412_s17 = smov [#allocation6]   ;;  %s8504_s19 = sadd.s32 4294967295, %s8410_s16   ;;  %s8410_s16 = sphi %s8489_s16, %s9954_s16   ;;  %s8406_s15 = sphi %s8487_s15, %s9953_s15   ;;  %s8402_s14 = sphi %s8485_s14, %s9952_s14   ;;  %s8398_s13 = sphi %s8483_s13, %s9951_s13  }
   0xe   : > { %s289_s18 = sshll.u32 %s8412_s17, 4  ;;  %p6180_p0 = scmp.ge.s32.totalorder %s8410_s16, 1  ;;  %s8509_s18 = int_to_ptr.vmem [resolvable:$true] %s289_s18 }
   0xf   : > { %p9911_p1 = scmp.eq.s32.totalorder %s8504_s19, 0  ;;  %p277_p2 = scmp.lt.s32.totalorder %s8410_s16, 3 }
  0x10   : > { %s8413_s21 = smov [#allocation9]   ;;  %s8414_s24 = smov [#allocation12]  }
  0x11   : > { %p8511_p3 = pnand %p6180_p0, %p277_p2  ;;  %s315_s22 = sshll.u32 %s8413_s21, 4  ;;  %s8524_s22 = int_to_ptr.vmem [resolvable:$true] %s315_s22 }
  0x12   : > { %s340_s25 = sshll.u32 %s8414_s24, 4  ;;  %s9920_s1 = sld [smem:[#allocation29_spill]]  ;;  %s8526_s25 = int_to_ptr.vmem [resolvable:$true] %s340_s25 }
  0x13   : > { %s9917_s20 = scalar_select %p8511_p3, 1, 0 }
  0x14   : > { %p7731_p5 = pneg %p8511_p3 }
  0x15   : > { %9918 = sst [smem:[#allocation28_spill]] %s9917_s20 }
  0x16   : > { %p8520_p6 = pnand %p7731_p5, %p9911_p1 }
  0x18   : > { %s8042_s28 = scalar_lea.hbm %s9920_s1, 1024  ;;  %p8536_p8 = pneg %p8520_p6 }
  0x19   : > { %p8043_p7 = scmp.ne.s32.totalorder %s9920_s1, %s8042_s28  ;;  %p8049_p11 = scmp.lt.u32.totalorder %s8042_s28, %s9920_s1 }
  0x1b   : > { %p8045_p9 = pnand %p8536_p8, %p8043_p7 }
  0x1d   : > { %p8046_p10 = pneg %p8045_p9 }
  0x1f   : > { %p8051_p12 = pnand %p8049_p11, %p8046_p10 }
  0x21   : > { %8054 = shalt.err (!%p8051_p12)
}
  0x22   : > { %s8055_s21 = scalar_lea.vmem %s8509_s18, 1024  ;;  %p8063_p5 = scmp.lt.s32.totalorder %s8509_s18, %s8509_s18 }
  0x23   : > { %p8056_p13 = scmp.ne.s32.totalorder %s8509_s18, %s8055_s21  ;;  %p8064_p4 = scmp.lt.s32.totalorder %s8055_s21, %s8055_s21 }
  0x25   : > { %p8058_p0 = pnand %p8056_p13, %p8536_p8  ;;  %p8065_p7 = por %p8064_p4, %p8063_p5 }
  0x27   : > { %p8059_p2 = pneg %p8058_p0 }
  0x29   : > { %p8066_p9 = pnand %p8065_p7, %p8059_p2 }
  0x2b   : > { %8069 = shalt.err (!%p8066_p9)
}
  0x2c   : > { %s9909_s24 = smov 64   ;;  %s9913_s26 = smov 4  }
  0x2d   : > { %7734 = dma.hbm_to_vmem [thread:$0]  (!%p8520_p6), %s9920_s1, 1024, %s8509_s18, [#allocation7], %s9909_s24, %s9909_s24, %s9913_s26  }
  0x2e   : > { %s8070_s12 = scalar_lea.hbm %s9899_s3, 1024 }
  0x2f   : > { %p8071_p4 = scmp.ne.s32.totalorder %s9899_s3, %s8070_s12  ;;  %p8077_p12 = scmp.lt.u32.totalorder %s8070_s12, %s9899_s3 }
  0x31   : > { %p8073_p10 = pnand %p8071_p4, %p8536_p8 }
  0x33   : > { %p8074_p11 = pneg %p8073_p10 }
  0x35   : > { %p8079_p13 = pnand %p8077_p12, %p8074_p11 }
  0x37   : > { %8082 = shalt.err (!%p8079_p13)
}
  0x38   : > { %s8083_s18 = scalar_lea.vmem %s8524_s22, 1024  ;;  %p8091_p7 = scmp.lt.s32.totalorder %s8524_s22, %s8524_s22 }
  0x39   : > { %p8084_p0 = scmp.ne.s32.totalorder %s8524_s22, %s8083_s18  ;;  %p8092_p9 = scmp.lt.s32.totalorder %s8083_s18, %s8083_s18 }
  0x3b   : > { %p8086_p2 = pnand %p8084_p0, %p8536_p8  ;;  %p8093_p4 = por %p8092_p9, %p8091_p7 }
  0x3d   : > { %p8087_p5 = pneg %p8086_p2 }
  0x3f   : > { %p8094_p10 = pnand %p8093_p4, %p8087_p5 }
  0x41   : > { %8097 = shalt.err (!%p8094_p10)
}
  0x42   : > { %7740 = dma.hbm_to_vmem [thread:$0]  (!%p8520_p6), %s9899_s3, 1024, %s8524_s22, [#allocation10], %s9909_s24, %s9909_s24, %s9913_s26  }
  0x43   : > { %s8098_s29 = scalar_lea.hbm %s9901_s5, 16 }
  0x44   : > { %p8099_p11 = scmp.ne.s32.totalorder %s9901_s5, %s8098_s29  ;;  %p8105_p0 = scmp.lt.u32.totalorder %s8098_s29, %s9901_s5 }
  0x46   : > { %p8101_p12 = pnand %p8099_p11, %p8536_p8 }
  0x48   : > { %p8102_p13 = pneg %p8101_p12 }
  0x4a   : > { %p8107_p2 = pnand %p8105_p0, %p8102_p13 }
  0x4c   : > { %8110 = shalt.err (!%p8107_p2)
}
  0x4d   : > { %s8111_s22 = scalar_lea.vmem %s8526_s25, 16  ;;  %s8118_s18 = scalar_lea.vmem %s8526_s25, 32 }
  0x4e   : > { %p8112_p5 = scmp.ne.s32.totalorder %s8526_s25, %s8111_s22  ;;  %p8119_p4 = scmp.lt.s32.totalorder %s8526_s25, %s8526_s25 }
  0x4f   : > { %p8120_p10 = scmp.lt.s32.totalorder %s8118_s18, %s8111_s22 }
  0x50   : > { %p8114_p7 = pnand %p8112_p5, %p8536_p8 }
  0x51   : > { %p8121_p11 = por %p8120_p10, %p8119_p4 }
  0x52   : > { %p8115_p9 = pneg %p8114_p7 }
  0x54   : > { %p8122_p12 = pnand %p8121_p11, %p8115_p9 }
  0x56   : > { %8125 = shalt.err (!%p8122_p12)
}
  0x57   : > { %7746 = dma.hbm_to_vmem [thread:$0]  (!%p8520_p6), %s9901_s5, 16, %s8526_s25, [#allocation13]  }
  0x58   : > { %s8417_s27 = smov [#allocation15]   ;;  %s8418_s29 = smov [#allocation8]  }
  0x59   : > { %s362_s28 = sshll.u32 %s8417_s27, 4  ;;  %s302_s30 = sshll.u32 %s8418_s29, 4  ;;  %s363_s28 = int_to_ptr.vmem [resolvable:$true] %s362_s28  ;;  %s303_s30 = int_to_ptr.vmem [resolvable:$true] %s302_s30 }
  0x5a   : > { %s8126_s21 = scalar_lea.hbm %s9903_s7, 16 }
  0x5b   : > { %p8127_p13 = scmp.ne.s32.totalorder %s9903_s7, %s8126_s21  ;;  %p8133_p5 = scmp.lt.u32.totalorder %s8126_s21, %s9903_s7 }
  0x5d   : > { %p8129_p0 = pnand %p8127_p13, %p8536_p8 }
  0x5f   : > { %p8130_p2 = pneg %p8129_p0 }
  0x61   : > { %p8135_p7 = pnand %p8133_p5, %p8130_p2 }
  0x63   : > { %8138 = shalt.err (!%p8135_p7)
}
  0x64   : > { %s8139_s25 = scalar_lea.vmem %s363_s28, 16  ;;  %s8146_s20 = scalar_lea.vmem %s363_s28, 32 }
  0x65   : > { %p8140_p9 = scmp.ne.s32.totalorder %s363_s28, %s8139_s25  ;;  %p8147_p11 = scmp.lt.s32.totalorder %s363_s28, %s363_s28 }
  0x66   : > { %p8148_p12 = scmp.lt.s32.totalorder %s8146_s20, %s8139_s25 }
  0x67   : > { %p8142_p4 = pnand %p8140_p9, %p8536_p8 }
  0x68   : > { %p8149_p1 = por %p8148_p12, %p8147_p11 }
  0x69   : > { %p8143_p10 = pneg %p8142_p4 }
  0x6b   : > { %p8150_p3 = pnand %p8149_p1, %p8143_p10 }
  0x6d   : > { %8153 = shalt.err (!%p8150_p3)
}
  0x6e   : > { %7752 = dma.hbm_to_vmem [thread:$0]  (!%p8520_p6), %s9903_s7, 16, %s363_s28, [#allocation16]  }
  0x6f   : > { %s8154_s17 = scalar_lea.hbm %s9898_s2, 9216 }
  0x70   : > { %p8155_p13 = scmp.ne.s32.totalorder %s9898_s2, %s8154_s17  ;;  %p8161_p3 = scmp.lt.u32.totalorder %s8154_s17, %s9898_s2 }
  0x72   : > { %p8157_p0 = pnand %p8155_p13, %p8536_p8 }
  0x74   : > { %p8158_p1 = pneg %p8157_p0 }
  0x76   : > { %p8163_p2 = pnand %p8161_p3, %p8158_p1 }
  0x78   : > { %8166 = shalt.err (!%p8163_p2)
}
  0x79   : > { %s8167_s25 = scalar_lea.vmem %s303_s30, 9216  ;;  %p8175_p4 = scmp.lt.s32.totalorder %s303_s30, %s303_s30 }
  0x7a   : > { %p8168_p5 = scmp.ne.s32.totalorder %s303_s30, %s8167_s25  ;;  %p8176_p10 = scmp.lt.s32.totalorder %s8167_s25, %s8167_s25 }
  0x7c   : > { %p8170_p7 = pnand %p8168_p5, %p8536_p8  ;;  %p8177_p11 = por %p8176_p10, %p8175_p4 }
  0x7e   : > { %p8171_p9 = pneg %p8170_p7 }
  0x80   : > { %p8178_p12 = pnand %p8177_p11, %p8171_p9 }
  0x82   : > { %8181 = shalt.err (!%p8178_p12)
}
  0x83   : > { %s9922_s28 = smov 64   ;;  %s8419_s29 = smov [#allocation11]  }
  0x84   : > { %7737 = dma.hbm_to_vmem [thread:$0]  (!%p8520_p6), %s9898_s2, 9216, %s303_s30, [#allocation7], %s9922_s28, %s9922_s28, %s9913_s26  }
  0x85   : > { %s329_s24 = sshll.u32 %s8419_s29, 4  ;;  %s8420_s12 = smov [#allocation14]   ;;  %s330_s24 = int_to_ptr.vmem [resolvable:$true] %s329_s24 }
  0x86   : > { %s351_s17 = sshll.u32 %s8420_s12, 4  ;;  %s8182_s18 = scalar_lea.hbm %s9900_s4, 16  ;;  %s352_s17 = int_to_ptr.vmem [resolvable:$true] %s351_s17 }
  0x87   : > { %p8183_p13 = scmp.ne.s32.totalorder %s9900_s4, %s8182_s18  ;;  %p8189_p3 = scmp.lt.u32.totalorder %s8182_s18, %s9900_s4 }
  0x89   : > { %p8185_p0 = pnand %p8183_p13, %p8536_p8 }
  0x8b   : > { %p8186_p1 = pneg %p8185_p0 }
  0x8d   : > { %p8191_p2 = pnand %p8189_p3, %p8186_p1 }
  0x8f   : > { %8194 = shalt.err (!%p8191_p2)
}
  0x90   : > { %s8195_s30 = scalar_lea.vmem %s330_s24, 16  ;;  %s8202_s27 = scalar_lea.vmem %s330_s24, 32 }
  0x91   : > { %p8196_p5 = scmp.ne.s32.totalorder %s330_s24, %s8195_s30  ;;  %p8203_p4 = scmp.lt.s32.totalorder %s330_s24, %s330_s24 }
  0x92   : > { %p8204_p10 = scmp.lt.s32.totalorder %s8202_s27, %s8195_s30 }
  0x93   : > { %p8198_p7 = pnand %p8196_p5, %p8536_p8 }
  0x94   : > { %p8205_p11 = por %p8204_p10, %p8203_p4 }
  0x95   : > { %p8199_p9 = pneg %p8198_p7 }
  0x97   : > { %p8206_p12 = pnand %p8205_p11, %p8199_p9 }
  0x99   : > { %8209 = shalt.err (!%p8206_p12)
}
  0x9a   : > { %7743 = dma.hbm_to_vmem [thread:$0]  (!%p8520_p6), %s9900_s4, 16, %s330_s24, [#allocation10]  }
  0x9b   : > { %s8210_s22 = scalar_lea.hbm %s9902_s6, 16 }
  0x9c   : > { %p8211_p13 = scmp.ne.s32.totalorder %s9902_s6, %s8210_s22  ;;  %p8217_p3 = scmp.lt.u32.totalorder %s8210_s22, %s9902_s6 }
  0x9e   : > { %p8213_p0 = pnand %p8211_p13, %p8536_p8 }
  0xa0   : > { %p8214_p1 = pneg %p8213_p0 }
  0xa2   : > { %p8219_p2 = pnand %p8217_p3, %p8214_p1 }
  0xa4   : > { %8222 = shalt.err (!%p8219_p2)
}
  0xa5   : > { %s8223_s30 = scalar_lea.vmem %s352_s17, 16  ;;  %s8230_s24 = scalar_lea.vmem %s352_s17, 32 }
  0xa6   : > { %p8224_p5 = scmp.ne.s32.totalorder %s352_s17, %s8223_s30  ;;  %p8231_p4 = scmp.lt.s32.totalorder %s352_s17, %s352_s17 }
  0xa7   : > { %p8232_p10 = scmp.lt.s32.totalorder %s8230_s24, %s8223_s30 }
  0xa8   : > { %p8226_p7 = pnand %p8224_p5, %p8536_p8 }
  0xa9   : > { %p8233_p11 = por %p8232_p10, %p8231_p4 }
  0xaa   : > { %p8227_p9 = pneg %p8226_p7 }
  0xac   : > { %p8234_p12 = pnand %p8233_p11, %p8227_p9 }
  0xae   : > { %8237 = shalt.err (!%p8234_p12)
}
  0xaf   : > { %7749 = dma.hbm_to_vmem [thread:$0]  (!%p8520_p6), %s9902_s6, 16, %s352_s17, [#allocation13]  }
  0xb0   : > { %s8421_s12 = smov [#allocation17]   ;;  %s8422_s21 = smov [#allocation18]  }
  0xb1   : > { %s373_s1 = sshll.u32 %s8421_s12, 4  ;;  %s384_s22 = sshll.u32 %s8422_s21, 4  ;;  %s374_s1 = int_to_ptr.vmem [resolvable:$true] %s373_s1  ;;  %s385_s22 = int_to_ptr.vmem [resolvable:$true] %s384_s22 }
  0xb2   : > { %s8238_s25 = scalar_lea.hbm %s9904_s8, 16 }
  0xb3   : > { %p8239_p13 = scmp.ne.s32.totalorder %s9904_s8, %s8238_s25  ;;  %p8245_p3 = scmp.lt.u32.totalorder %s8238_s25, %s9904_s8 }
  0xb5   : > { %p8241_p0 = pnand %p8239_p13, %p8536_p8 }
  0xb7   : > { %p8242_p1 = pneg %p8241_p0 }
  0xb9   : > { %p8247_p2 = pnand %p8245_p3, %p8242_p1 }
  0xbb   : > { %8250 = shalt.err (!%p8247_p2)
}
  0xbc   : > { %s8251_s17 = scalar_lea.vmem %s374_s1, 16  ;;  %s8258_s29 = scalar_lea.vmem %s374_s1, 32 }
  0xbd   : > { %p8252_p5 = scmp.ne.s32.totalorder %s374_s1, %s8251_s17  ;;  %p8259_p4 = scmp.lt.s32.totalorder %s374_s1, %s374_s1 }
  0xbe   : > { %p8260_p10 = scmp.lt.s32.totalorder %s8258_s29, %s8251_s17 }
  0xbf   : > { %p8254_p7 = pnand %p8252_p5, %p8536_p8 }
  0xc0   : > { %p8261_p11 = por %p8260_p10, %p8259_p4 }
  0xc1   : > { %p8255_p9 = pneg %p8254_p7 }
  0xc3   : > { %p8262_p12 = pnand %p8261_p11, %p8255_p9 }
  0xc5   : > { %8265 = shalt.err (!%p8262_p12)
}
  0xc6   : > { %7755 = dma.hbm_to_vmem [thread:$0]  (!%p8520_p6), %s9904_s8, 16, %s374_s1, [#allocation16]  }
  0xc7   : > { %s8266_s25 = scalar_lea.hbm %s9905_s9, 16 }
  0xc8   : > { %p8267_p13 = scmp.ne.s32.totalorder %s9905_s9, %s8266_s25  ;;  %p8273_p3 = scmp.lt.u32.totalorder %s8266_s25, %s9905_s9 }
  0xca   : > { %p8269_p0 = pnand %p8267_p13, %p8536_p8 }
  0xcc   : > { %p8270_p1 = pneg %p8269_p0 }
  0xce   : > { %p8275_p2 = pnand %p8273_p3, %p8270_p1 }
  0xd0   : > { %8278 = shalt.err (!%p8275_p2)
}
  0xd1   : > { %s8279_s17 = scalar_lea.vmem %s385_s22, 16  ;;  %s8286_s1 = scalar_lea.vmem %s385_s22, 32 }
  0xd2   : > { %p8280_p5 = scmp.ne.s32.totalorder %s385_s22, %s8279_s17  ;;  %p8287_p4 = scmp.lt.s32.totalorder %s385_s22, %s385_s22 }
  0xd3   : > { %p8288_p10 = scmp.lt.s32.totalorder %s8286_s1, %s8279_s17 }
  0xd4   : > { %p8282_p7 = pnand %p8280_p5, %p8536_p8 }
  0xd5   : > { %p8289_p11 = por %p8288_p10, %p8287_p4 }
  0xd6   : > { %p8283_p9 = pneg %p8282_p7 }
  0xd8   : > { %p8290_p12 = pnand %p8289_p11, %p8283_p9 }
  0xda   : > { %8293 = shalt.err (!%p8290_p12)
}
  0xdb   : > { %7758 = dma.hbm_to_vmem [thread:$0]  (!%p8520_p6), %s9905_s9, 16, %s385_s22, [#allocation19]  }
  0xdc   : > { %s6179_s11 = sadd.s32 4294967294, %s8410_s16   ;;  %s8723_s23 = sadd.s32 1, %s8410_s16  }
  0xdd   : > { %s38_s21 = sadd.s32 1, %s8406_s15  ;;  %s35_s18 = ssub.s32 %s8410_s16, %s8723_s23 }
  0xde   : > { %p45_p8 = scmp.ne.s32.totalorder %s8406_s15, %s8402_s14  ;;  %p36_p13 = scmp.eq.s32.totalorder %s35_s18, 0 }
  0xdf   : > { %p46_p0 = scmp.eq.s32.totalorder %s8410_s16, 0  ;;  %p51_p1 = scmp.ne.s32.totalorder %s8402_s14, %s8398_s13 }
  0xe0   : > { %p264_p3 = scmp.eq.s32.totalorder %s8504_s19, 1  ;;  %p9923_p5 = scmp.eq.s32.totalorder %s8504_s19, 0 }
  0xe1   : > { %s8735_s10 = scalar_select %p36_p13, %s8406_s15, %s38_s21  }
  0xe2   : > { %p47_p2 = por %p46_p0, %p45_p8  ;;  %p8739_p7 = por %p9923_p5, %p51_p1 }
  0xe3   : > { %p8743_p6 = por %p264_p3, %p45_p8  ;;  %p270_p9 = scmp.eq.s32.totalorder %s6179_s11, 1 }
  0xe4   : > { %p7776_p4 = scmp.lt.s32.totalorder %s8410_s16, 2  ;;  %s395_s20 = sand.u32 1, %s8406_s15  }
  0xe5   : > { %s9925_s22 = scalar_select %p8743_p6, 1, 0 }
  0xe6   : > { %p8749_p10 = por %p270_p9, %p51_p1  ;;  %s6191_s24 = sshll.u32 %s395_s20, 7 }
  0xe7   : > { %s6593_s27 = sshll.u32 %s8410_s16, 11  ;;  %s399_s12 = scalar_lea.vmem [#allocation3], %s6191_s24 }
  0xe8   : > { %s9926_s30 = scalar_select %p8749_p10, 1, 0 }
  0xe9   : > { %s8757_s29 = scalar_lea.hbm %s9896_s0, %s6593_s27  ;;  %s406_s21 = sshll.u32 %s399_s12, 4  ;;  %s8763_s21 = int_to_ptr.vmem [resolvable:$true] %s406_s21 }
  0xea   : > { %p8759_p11 = pnand %p7776_p4, %p47_p2  ;;  %s8765_s18 = scalar_lea.sflag [#allocation4], %s395_s20 }
  0xeb   : > { %s8294_s26 = scalar_lea.hbm %s8757_s29, 2048  ;;  %s8299_s17 = scalar_lea.hbm %s9896_s0, 4096 }
  0xec   : > { %p8295_p12 = scmp.ne.s32.totalorder %s8757_s29, %s8294_s26  ;;  %p8296_p8 = pneg %p8759_p11 }
  0xed   : > { %p8300_p1 = scmp.lt.u32.totalorder %s8757_s29, %s9896_s0  ;;  %p8301_p3 = scmp.lt.u32.totalorder %s8299_s17, %s8294_s26 }
  0xee   : > { %p8297_p13 = pnand %p8296_p8, %p8295_p12  ;;  %p8303_p5 = scmp.lt.u32.totalorder %s8294_s26, %s8757_s29 }
  0xef   : > { %p8302_p2 = por %p8301_p3, %p8300_p1 }
  0xf0   : > { %p8298_p0 = pneg %p8297_p13 }
  0xf1   : > { %p8304_p9 = por %p8303_p5, %p8302_p2 }
  0xf3   : > { %p8305_p4 = pnand %p8304_p9, %p8298_p0 }
  0xf5   : > { %8308 = shalt.err (!%p8305_p4)
}
  0xf6   : > { %s8309_s20 = scalar_lea.vmem %s8763_s21, 2048  ;;  %s8423_s24 = smov [#allocation3]  }
  0xf7   : > { %p8310_p12 = scmp.ne.s32.totalorder %s8763_s21, %s8309_s20  ;;  %s8314_s27 = sshll.u32 %s8423_s24, 4  ;;  %s8315_s27 = int_to_ptr.vmem [resolvable:$false] %s8314_s27 }
  0xf8   : > { %s8316_s1 = scalar_lea.vmem %s8315_s27, 4096  ;;  %p8317_p6 = scmp.lt.s32.totalorder %s8763_s21, %s8315_s27 }
  0xf9   : > { %p8312_p13 = pnand %p8310_p12, %p8296_p8  ;;  %p8318_p1 = scmp.lt.s32.totalorder %s8316_s1, %s8309_s20 }
  0xfb   : > { %p8313_p10 = pneg %p8312_p13  ;;  %p8319_p3 = por %p8318_p1, %p8317_p6 }
  0xfd   : > { %p8320_p2 = pnand %p8319_p3, %p8313_p10 }
  0xff   : > { %8323 = shalt.err (!%p8320_p2)
}
 0x100   : > { %s9928_s26 = smov 4   ;;  %s9929_s17 = sld [smem:[#allocation28_spill]] }
 0x101   : > { %7762 = dma.hbm_to_vmem [thread:$0]  (!%p8759_p11), %s8757_s29, 2048, %s8763_s21, %s8765_s18, %s9922_s28, %s9922_s28, %s9928_s26  }
 0x106   : > { %p9930_p8 = scmp.ne.s32.totalorder %s9929_s17, 0 }
 0x107   : > { %s8799_s12 = sand.u32 (!%p9930_p8), 1, %s8402_s14  }
 0x108   : > { %418 = sbr.rel (%p9930_p8) target bundleno = 1405 (0x57d), region = 60  ;;  %s6195_s20 = sshll.u32 (!%p9930_p8), %s8799_s12, 7 }
 0x109   : > { %s421_s24 = scalar_lea.sflag (!%p9930_p8), [#allocation4], %s8799_s12  ;;  %s8803_s27 = scalar_lea.vmem (!%p9930_p8), [#allocation3], %s6195_s20 }
 0x10f   : > { %8369 = dma.done.wait (%p8739_p7), %s421_s24, 2048  }
 0x110   : > { %8371 = vsyncadd (%p8739_p7), %s421_s24, 4294965248  ;;  %p9931_p6 = scmp.eq.s32.totalorder %s8504_s19, 0 }
 0x112   : > { %8373 = dma.done.wait (%p9931_p6), [#allocation7], 10240   ;;  %p9932_p10 = pmov %p9931_p6 }
 0x113   : > { %p9933_p11 = pmov %p9931_p6 }
 0x114   : > { %8375 = vsyncadd (%p9932_p10), [#allocation7], 4294957056 }
 0x115   : > { %8377 = dma.done.wait (%p9933_p11), [#allocation10], 1040   ;;  %p9934_p0 = pmov %p9931_p6 }
 0x117   : > { %8379 = vsyncadd (%p9934_p0), [#allocation10], 4294966256  ;;  %p9935_p5 = pmov %p9934_p0 }
 0x118   : > { %p9936_p9 = pmov %p9934_p0 }
 0x119   : > { %8381 = dma.done.wait (%p9935_p5), [#allocation13], 32  }
 0x11a   : > { %8383 = vsyncadd (%p9936_p9), [#allocation13], 4294967264  ;;  %p9937_p7 = pmov %p9934_p0 }
 0x11b   : > { %p9938_p4 = pmov %p9934_p0 }
 0x11c   : > { %8385 = dma.done.wait (%p9937_p7), [#allocation16], 32  }
 0x11d   : > { %8387 = vsyncadd (%p9938_p4), [#allocation16], 4294967264  ;;  %p9939_p12 = pmov %p9934_p0 }
 0x11e   : > { %p9940_p13 = pmov %p9934_p0 }
 0x11f   : > { %8389 = dma.done.wait (%p9939_p12), [#allocation19], 16  }
 0x120   : > { %8391 = vsyncadd (%p9940_p13), [#allocation19], 4294967280  ;;  %v7833_v0 = vld [vmem:[#allocation6] sm:$0xff]   ;;  %v7834_v1 = vld [vmem:[#allocation6 + $0x8] sm:$0xff]   ;;  %v8424_v29 = vmov 0   ;;  %vm1425_vm0 = vcmask 1042432  }
 0x121   : > { %6891 = vmatprep.subr.bf16.mxu0 %v7833_v0  ;;  %v7835_v2 = vld [vmem:[#allocation6 + $0x10] sm:$0xff]   ;;  %v7836_v3 = vld [vmem:[#allocation6 + $0x18] sm:$0xff]   ;;  %v498_v4 = vld [vmem:[%s8803_s27] sm:$0xff]   ;;  %970 = vst [vmem:[#allocation2 + $0x24] sm:$0xf] %v8424_v29  ;;  %vm1426_vm1 = vcmask 1046532  }
 0x122   : > { %6892 = vmatpush3.bf16.msra.mxu0 %v7833_v0  ;;  %6907 = vmatprep.mubr.bf16.mxu0 %v498_v4  ;;  %v7837_v5 = vld [vmem:[#allocation6 + $0x20] sm:$0xff]   ;;  %v7838_v6 = vld [vmem:[#allocation6 + $0x28] sm:$0xff]   ;;  %v7839_v7 = vld [vmem:[#allocation6 + $0x30] sm:$0xff]   ;;  %961 = vst [vmem:[#allocation2] sm:$0xf] %v8424_v29  ;;  %vm1117_vm3 = vcmask 1040384  }
 0x123   : > { %6893 = vmatprep.subr.bf16.mxu0 %v7834_v1  ;;  %v7840_v8 = vld [vmem:[#allocation6 + $0x38] sm:$0xff]   ;;  %v500_v9 = vld [vmem:[%s8803_s27 + $0x8] sm:$0xff]   ;;  %v502_v10 = vld [vmem:[%s8803_s27 + $0x10] sm:$0xff]   ;;  %962 = vst [vmem:[#allocation2 + $0x4] sm:$0xf] %v8424_v29  ;;  %vm1118_vm4 = vcmask 1044484  }
 0x124   : > { %v7857_v11 = vld [vmem:[#allocation8 + $0x40] sm:$0xff]   ;;  %v7858_v12 = vld [vmem:[#allocation8 + $0x48] sm:$0xff]   ;;  %v504_v13 = vld [vmem:[%s8803_s27 + $0x18] sm:$0xff]   ;;  %963 = vst [vmem:[#allocation2 + $0x8] sm:$0x3] %v8424_v29  ;;  %vm2183_vm6 = vcmask 1041408  }
 0x125   : > { %v506_v14 = vld [vmem:[%s8803_s27 + $0x20] sm:$0xff]   ;;  %v7859_v15 = vld [vmem:[#allocation8 + $0x50] sm:$0xff]   ;;  %v508_v16 = vld [vmem:[%s8803_s27 + $0x28] sm:$0xff]   ;;  %964 = vst [vmem:[#allocation2 + $0xc] sm:$0xf] %v8424_v29  ;;  %vm2184_vm7 = vcmask 1045508  }
 0x126   : > { %6894 = vmatpush3.bf16.msra.mxu0 %v7834_v1  ;;  %v510_v17 = vld [vmem:[%s8803_s27 + $0x30] sm:$0xff]   ;;  %v512_v18 = vld [vmem:[%s8803_s27 + $0x38] sm:$0xff]   ;;  %v514_v19 = vld [vmem:[%s8803_s27 + $0x40] sm:$0xff]   ;;  %965 = vst [vmem:[#allocation2 + $0x10] sm:$0xf] %v8424_v29  ;;  %s6205_s28 = sshll.u32 %s8799_s12, 8 }
 0x127   : > { %6895 = vmatprep.subr.bf16.mxu0 %v7835_v2  ;;  %v516_v20 = vld [vmem:[%s8803_s27 + $0x48] sm:$0xff]   ;;  %v518_v21 = vld [vmem:[%s8803_s27 + $0x50] sm:$0xff]   ;;  %v520_v22 = vld [vmem:[%s8803_s27 + $0x58] sm:$0xff]   ;;  %966 = vst [vmem:[#allocation2 + $0x14] sm:$0x3] %v8424_v29  ;;  %s9742_s25 = scalar_lea.vmem [#allocation20], %s6205_s28 }
 0x128   : > { %v522_v23 = vld [vmem:[%s8803_s27 + $0x60] sm:$0xff]   ;;  %v524_v24 = vld [vmem:[%s8803_s27 + $0x68] sm:$0xff]   ;;  %v526_v25 = vld [vmem:[%s8803_s27 + $0x70] sm:$0xff]   ;;  %967 = vst [vmem:[#allocation2 + $0x18] sm:$0xf] %v8424_v29  ;;  %s6626_s29 = sshll.u32 %s8504_s19, 12 }
 0x129   : > { %v528_v26 = vld [vmem:[%s8803_s27 + $0x78] sm:$0xff]   ;;  %v7861_v28 = vld [vmem:[#allocation8 + $0x60] sm:$0xff]   ;;  %968 = vst [vmem:[#allocation2 + $0x1c] sm:$0xf] %v8424_v29  ;;  %969 = vst [vmem:[#allocation2 + $0x20] sm:$0x3] %v8424_v29 }
 0x12a   : > { %6896 = vmatpush3.bf16.msra.mxu0 %v7835_v2  ;;  %v7860_v27 = vld [vmem:[#allocation8 + $0x58] sm:$0xff]   ;;  %971 = vst [vmem:[#allocation2 + $0x28] sm:$0xf] %v8424_v29  ;;  %972 = vst [vmem:[#allocation2 + $0x2c] sm:$0x3] %v8424_v29  ;;  %v7862_v30 = vld [vmem:[#allocation8 + $0x68] sm:$0xff]  }
 0x12b   : > { %6897 = vmatprep.subr.bf16.mxu0 %v7836_v3  ;;  %973 = vst [vmem:[#allocation2 + $0x30] sm:$0xf] %v8424_v29  ;;  %974 = vst [vmem:[#allocation2 + $0x34] sm:$0xf] %v8424_v29  ;;  %v7863_v31 = vld [vmem:[#allocation8 + $0x70] sm:$0xff]   ;;  %v7864_v38 = vld [vmem:[#allocation8 + $0x78] sm:$0xff]  }
 0x12c   : > { %975 = vst [vmem:[#allocation2 + $0x38] sm:$0x3] %v8424_v29  ;;  %976 = vst [vmem:[#allocation2 + $0x3c] sm:$0xf] %v8424_v29  ;;  %v1298_v32 = vld [vmem:[#allocation2 + $0x4] sm:$0xf] }
 0x12d   : > { %977 = vst [vmem:[#allocation2 + $0x40] sm:$0xf] %v8424_v29  ;;  %978 = vst [vmem:[#allocation2 + $0x44] sm:$0x3] %v8424_v29  ;;  %v1430_v33 = vrot.slane %v1298_v32, 5  ;;  %v7865_v54 = vld [vmem:[#allocation8 + $0xc0] sm:$0xff]  }
 0x12e   : > { %6898 = vmatpush3.bf16.msra.mxu0 %v7836_v3  ;;  %979 = vst [vmem:[#allocation2 + $0x48] sm:$0xf] %v8424_v29  ;;  %980 = vst [vmem:[#allocation2 + $0x4c] sm:$0xf] %v8424_v29  ;;  %v1300_v34 = vld [vmem:[#allocation2 + $0x10] sm:$0xf]  ;;  %7419 = vmatprep.subr.bf16.mxu1 %v7865_v54 }
 0x12f   : > { %6899 = vmatprep.subr.bf16.mxu0 %v7837_v5  ;;  %981 = vst [vmem:[#allocation2 + $0x50] sm:$0x3] %v8424_v29  ;;  %982 = vst [vmem:[#allocation2 + $0x54] sm:$0xf] %v8424_v29  ;;  %v1345_v35 = vld [vmem:[#allocation2] sm:$0xe]  ;;  %7427 = vmatpush3.bf16.msra.mxu1 %v7865_v54 }
 0x130   : > { %983 = vst [vmem:[#allocation2 + $0x58] sm:$0xf] %v8424_v29  ;;  %984 = vst [vmem:[#allocation2 + $0x5c] sm:$0x3] %v8424_v29  ;;  %v1346_v36 = vld [vmem:[#allocation2 + $0x8] sm:$0x1] }
 0x131   : > { %985 = vst [vmem:[#allocation2 + $0x60] sm:$0xf] %v8424_v29  ;;  %986 = vst [vmem:[#allocation2 + $0x64] sm:$0xf] %v8424_v29  ;;  %v1437_v37 = vrot.slane %v1300_v34, 5  ;;  %v6264_v39 = vrot.slane %v1345_v35, 9 }
 0x132   : > { %6900 = vmatpush3.bf16.msra.mxu0 %v7837_v5  ;;  %987 = vst [vmem:[#allocation2 + $0x68] sm:$0x3] %v8424_v29  ;;  %988 = vst [vmem:[#allocation2 + $0x6c] sm:$0xf] %v8424_v29  ;;  %v1432_v40 = vrot.slane %v1430_v33, 4  ;;  %v1433_v42 = vrot.slane %v1346_v36, 5 }
 0x133   : > { %6901 = vmatprep.subr.bf16.mxu0 %v7838_v6  ;;  %989 = vst [vmem:[#allocation2 + $0x70] sm:$0xf] %v8424_v29  ;;  %990 = vst [vmem:[#allocation2 + $0x74] sm:$0x3] %v8424_v29  ;;  %v1347_v43 = vld [vmem:[#allocation2 + $0xc] sm:$0xe] }
 0x134   : > { %991 = vst [vmem:[#allocation2 + $0x78] sm:$0xf] %v8424_v29  ;;  %992 = vst [vmem:[#allocation2 + $0x7c] sm:$0xf] %v8424_v29  ;;  %v1348_v44 = vld [vmem:[#allocation2 + $0x14] sm:$0x1] }
 0x135   : > { %993 = vst [vmem:[#allocation2 + $0x80] sm:$0x3] %v8424_v29  ;;  %994 = vst [vmem:[#allocation2 + $0x84] sm:$0xf] %v8424_v29  ;;  %v1439_v45 = vrot.slane %v1437_v37, 4  ;;  %v6265_v47 = vrot.slane %v1347_v43, 9 }
 0x136   : > { %6902 = vmatpush3.bf16.msra.mxu0 %v7838_v6  ;;  %995 = vst [vmem:[#allocation2 + $0x88] sm:$0xf] %v8424_v29  ;;  %996 = vst [vmem:[#allocation2 + $0x8c] sm:$0x3] %v8424_v29  ;;  %v1440_v48 = vrot.slane %v1348_v44, 5  ;;  %v7866_v55 = vld [vmem:[#allocation8 + $0xc8] sm:$0xff]  }
 0x137   : > { %6903 = vmatprep.subr.bf16.mxu0 %v7839_v7  ;;  %997 = vst [vmem:[#allocation2 + $0x90] sm:$0xf] %v8424_v29  ;;  %998 = vst [vmem:[#allocation2 + $0x94] sm:$0xf] %v8424_v29  ;;  %7420 = vmatprep.subr.bf16.mxu1 %v7866_v55  ;;  %v7867_v56 = vld [vmem:[#allocation8 + $0xd0] sm:$0xff]   ;;  %v7868_v57 = vld [vmem:[#allocation8 + $0xd8] sm:$0xff]  }
 0x138   : > { %999 = vst [vmem:[#allocation2 + $0x98] sm:$0x3] %v8424_v29  ;;  %1000 = vst [vmem:[#allocation2 + $0x9c] sm:$0xf] %v8424_v29  ;;  %7428 = vmatpush3.bf16.msra.mxu1 %v7866_v55  ;;  %v7869_v58 = vld [vmem:[#allocation8 + $0xe0] sm:$0xff]   ;;  %v7870_v59 = vld [vmem:[#allocation8 + $0xe8] sm:$0xff]  }
 0x139   : > { %1001 = vst [vmem:[#allocation2 + $0xa0] sm:$0xf] %v8424_v29  ;;  %1002 = vst [vmem:[#allocation2 + $0xa4] sm:$0x3] %v8424_v29  ;;  %7421 = vmatprep.subr.bf16.mxu1 %v7867_v56  ;;  %v7871_v60 = vld [vmem:[#allocation8 + $0xf0] sm:$0xff]   ;;  %v7872_v61 = vld [vmem:[#allocation8 + $0xf8] sm:$0xff]  }
 0x13a   : > { %6904 = vmatpush3.bf16.msra.mxu0 %v7839_v7  ;;  %1003 = vst [vmem:[#allocation2 + $0xa8] sm:$0xf] %v8424_v29  ;;  %1004 = vst [vmem:[#allocation2 + $0xac] sm:$0xf] %v8424_v29  ;;  %v7873_v62 = vld [vmem:[#allocation8] sm:$0xff]   ;;  %v7877_v0 = vld [vmem:[#allocation8 + $0x8] sm:$0xff]  }
 0x13b   : > { %6905 = vmatprep.subr.bf16.mxu0 %v7840_v8  ;;  %1005 = vst [vmem:[#allocation2 + $0xb0] sm:$0x3] %v8424_v29  ;;  %1006 = vst [vmem:[#allocation2 + $0xb4] sm:$0xf] %v8424_v29  ;;  %v8857_v63 = vld [vmem:[#allocation8 + $0x100] sm:$0xff]   ;;  %v7879_v1 = vld [vmem:[#allocation8 + $0x10] sm:$0xff]  }
 0x13c   : > { %1007 = vst [vmem:[#allocation2 + $0xb8] sm:$0xf] %v8424_v29  ;;  %1008 = vst [vmem:[#allocation2 + $0xbc] sm:$0x3] %v8424_v29  ;;  %7429 = vmatpush3.bf16.msra.mxu1 %v7867_v56  ;;  %v7883_v2 = vld [vmem:[#allocation8 + $0x18] sm:$0xff]   ;;  %v7885_v3 = vld [vmem:[#allocation8 + $0x20] sm:$0xff]  }
 0x13d   : > { %1009 = vst [vmem:[#allocation2 + $0xc0] sm:$0xf] %v8424_v29  ;;  %1010 = vst [vmem:[#allocation2 + $0xc4] sm:$0xf] %v8424_v29  ;;  %7422 = vmatprep.subr.bf16.mxu1 %v7868_v57  ;;  %v7889_v4 = vld [vmem:[#allocation8 + $0x28] sm:$0xff]   ;;  %v7891_v5 = vld [vmem:[#allocation8 + $0x30] sm:$0xff]  }
 0x13e   : > { %6906 = vmatpush3.bf16.msra.mxu0 %v7840_v8  ;;  %1011 = vst [vmem:[#allocation2 + $0xc8] sm:$0x3] %v8424_v29  ;;  %1012 = vst [vmem:[#allocation2 + $0xcc] sm:$0xf] %v8424_v29  ;;  %v7895_v6 = vld [vmem:[#allocation8 + $0x38] sm:$0xff]   ;;  %s6020_s21 = sshll.u32 %s9742_s25, 4  ;;  %s9849_s21 = int_to_ptr.vmem [resolvable:$true] %s6020_s21 }
 0x13f   : > { %6939 = vmatprep.subr.bf16.mxu0 %v7857_v11  ;;  %1013 = vst [vmem:[#allocation2 + $0xd0] sm:$0xf] %v8424_v29  ;;  %1014 = vst [vmem:[#allocation2 + $0xd4] sm:$0x3] %v8424_v29  ;;  %v8860_v7 = vld [vmem:[#allocation11] ss:$0 sm:$0xff] }
 0x140   : > { %1015 = vst [vmem:[#allocation2 + $0xd8] sm:$0xf] %v8424_v29  ;;  %1016 = vst [vmem:[#allocation2 + $0xdc] sm:$0xf] %v8424_v29  ;;  %7430 = vmatpush3.bf16.msra.mxu1 %v7868_v57  ;;  %s9947_s1 = sld [smem:[#allocation30_spill]]  ;;  %s6007_s19 = scalar_lea.sflag [#allocation5], %s8799_s12 }
 0x141   : > { %6908 = vmatmul.mubr.bf16.vlgmr.msra.gmra.mrb[0].mxu0 %v500_v9  ;;  %1017 = vst [vmem:[#allocation2 + $0xe0] sm:$0x3] %v8424_v29  ;;  %1018 = vst [vmem:[#allocation2 + $0xe4] sm:$0xf] %v8424_v29  ;;  %7423 = vmatprep.subr.bf16.mxu1 %v7869_v58  ;;  %v8862_v9 = vld [vmem:[#allocation12] ss:$0 sm:$0xff] }
 0x142   : > { %6911 = vmatprep.mubr.bf16.mxu0 %v502_v10  ;;  %6940 = vmatpush3.bf16.msra.mxu0 %v7857_v11  ;;  %1019 = vst [vmem:[#allocation2 + $0xe8] sm:$0xf] %v8424_v29  ;;  %1020 = vst [vmem:[#allocation2 + $0xec] sm:$0x3] %v8424_v29  ;;  %s8324_s17 = scalar_lea.vmem %s9849_s21, 4096  ;;  %p9948_p3 = scmp.ne.s32.totalorder %s9925_s22, 0 }
 0x143   : > { %6941 = vmatprep.subr.bf16.mxu0 %v7858_v12  ;;  %vm8845_vm2 = vmor %vm1425_vm0, %vm1426_vm1  ;;  %p8325_p1 = scmp.ne.s32.totalorder %s9849_s21, %s8324_s17  ;;  %s8425_s20 = smov [#allocation20]  }
 0x144   : > { %v1431_v46 = vsel %vm8845_vm2, %v6264_v39, %v1430_v33  ;;  %v1434_v49 = vsel %vm8845_vm2, %v1432_v40, %v1433_v42  ;;  %v1438_v51 = vsel %vm8845_vm2, %v6265_v47, %v1437_v37  ;;  %v1441_v52 = vsel %vm8845_vm2, %v1439_v45, %v1440_v48  ;;  %7431 = vmatpush3.bf16.msra.mxu1 %v7869_v58  ;;  %vm8873_vm5 = vmor %vm1117_vm3, %vm1118_vm4  ;;  %s8328_s24 = sshll.u32 %s8425_s20, 4  ;;  %s8329_s24 = int_to_ptr.vmem [resolvable:$false] %s8328_s24 }
 0x145   : > { %v6280_v50 = vcombine.low %v1431_v46, %v1434_v49  ;;  %v6281_v53 = vcombine.low %v1438_v51, %v1441_v52  ;;  %7424 = vmatprep.subr.bf16.mxu1 %v7870_v59  ;;  %vm9203_vm8 = vmor %vm2183_vm6, %vm2184_vm7  ;;  %p8326_p2 = pnand %p8325_p1, %p9948_p3  ;;  %p8331_p6 = scmp.lt.s32.totalorder %s9849_s21, %s8329_s24 }
 0x146   : > { %6942 = vmatpush3.bf16.msra.mxu0 %v7858_v12  ;;  %s9847_s26 = scalar_lea.hbm %s9947_s1, %s6626_s29 }
 0x147   : > { %6943 = vmatprep.subr.bf16.mxu0 %v7859_v15  ;;  %p8327_p8 = pneg %p8326_p2 }
 0x148   : > { %7432 = vmatpush3.bf16.msra.mxu1 %v7870_v59 }
 0x149   : > { %6912 = vmatmul.mubr.bf16.gmra.mrb[4].mxu0 %v504_v13  ;;  %7425 = vmatprep.subr.bf16.mxu1 %v7871_v60 }
 0x14a   : > { %6915 = vmatprep.mubr.bf16.mxu0 %v506_v14  ;;  %6944 = vmatpush3.bf16.msra.mxu0 %v7859_v15 }
 0x14b   : > { %6945 = vmatprep.subr.bf16.mxu0 %v7860_v27 }
 0x14c   : > { %7433 = vmatpush3.bf16.msra.mxu1 %v7871_v60 }
 0x14d   : > { %7426 = vmatprep.subr.bf16.mxu1 %v7872_v61 }
 0x14e   : > { %6946 = vmatpush3.bf16.msra.mxu0 %v7860_v27 }
 0x14f   : > { %6947 = vmatprep.subr.bf16.mxu0 %v7861_v28 }
 0x150   : > { %7434 = vmatpush3.bf16.msra.mxu1 %v7872_v61 }
 0x151   : > { %6916 = vmatmul.mubr.bf16.gmra.mrb[8].mxu0 %v508_v16  ;;  %7131 = vmatprep.subr.bf16.mxu1 %v8857_v63 }
 0x152   : > { %6919 = vmatprep.mubr.bf16.mxu0 %v510_v17  ;;  %6948 = vmatpush3.bf16.msra.mxu0 %v7861_v28  ;;  %v7911_v28 = vld [vmem:[#allocation8 + $0x80] sm:$0xff]  }
 0x153   : > { %6949 = vmatprep.subr.bf16.mxu0 %v7862_v30 }
 0x156   : > { %6950 = vmatpush3.bf16.msra.mxu0 %v7862_v30 }
 0x157   : > { %6951 = vmatprep.subr.bf16.mxu0 %v7863_v31 }
 0x159   : > { %6920 = vmatmul.mubr.bf16.gmra.mrb[12].mxu0 %v512_v18 }
 0x15a   : > { %6923 = vmatprep.mubr.bf16.mxu0 %v514_v19  ;;  %6952 = vmatpush3.bf16.msra.mxu0 %v7863_v31 }
 0x15b   : > { %6953 = vmatprep.subr.bf16.mxu0 %v7864_v38 }
 0x15e   : > { %6954 = vmatpush3.bf16.msra.mxu0 %v7864_v38 }
 0x15f   : > { %6987 = vmatprep.subr.bf16.mxu0 %v7873_v62 }
 0x161   : > { %6924 = vmatmul.mubr.bf16.gmra.mrb[16].mxu0 %v516_v20 }
 0x162   : > { %6927 = vmatprep.mubr.bf16.mxu0 %v518_v21 }
 0x169   : > { %6928 = vmatmul.mubr.bf16.gmra.mrb[20].mxu0 %v520_v22 }
 0x16a   : > { %6931 = vmatprep.mubr.bf16.mxu0 %v522_v23 }
 0x171   : > { %6932 = vmatmul.mubr.bf16.gmra.mrb[24].mxu0 %v524_v24 }
 0x172   : > { %6935 = vmatprep.mubr.bf16.mxu0 %v526_v25 }
 0x179   : > { %6936 = vmatmul.mubr.bf16.gmra.mrb[28].mxu0 %v528_v26 }
 0x17a   : > { %6955 = vmatprep.mubr.bf16.mxu0 %v6280_v50 }
 0x181   : > { %6956 = vmatmul.mubr.bf16.vlgmr.msra.gmra.mrb[32].mxu0 %v6281_v53 }
 0x182   : > { %6988 = vmatpush3.bf16.msra.mxu0 %v7873_v62 }
 0x183   : > { %6989 = vmatprep.subr.bf16.mxu0 %v7877_v0 }
 0x186   : > { %6990 = vmatpush3.bf16.msra.mxu0 %v7877_v0 }
 0x187   : > { %6991 = vmatprep.subr.bf16.mxu0 %v7879_v1 }
 0x18a   : > { %6992 = vmatpush3.bf16.msra.mxu0 %v7879_v1 }
 0x18b   : > { %6993 = vmatprep.subr.bf16.mxu0 %v7883_v2 }
 0x18e   : > { %6994 = vmatpush3.bf16.msra.mxu0 %v7883_v2 }
 0x18f   : > { %6995 = vmatprep.subr.bf16.mxu0 %v7885_v3 }
 0x192   : > { %6996 = vmatpush3.bf16.msra.mxu0 %v7885_v3 }
 0x193   : > { %6997 = vmatprep.subr.bf16.mxu0 %v7889_v4 }
 0x196   : > { %6998 = vmatpush3.bf16.msra.mxu0 %v7889_v4 }
 0x197   : > { %6999 = vmatprep.subr.bf16.mxu0 %v7891_v5 }
 0x19a   : > { %7000 = vmatpush3.bf16.msra.mxu0 %v7891_v5 }
 0x19b   : > { %7001 = vmatprep.subr.bf16.mxu0 %v7895_v6 }
 0x19e   : > { %7002 = vmatpush3.bf16.msra.mxu0 %v7895_v6 }
 0x19f   : > { %7035 = vmatprep.subr.bf16.mxu0 %v7911_v28 }
 0x214   : > { %v6909_v8 = vpop.f32.mrb[0].mxu0 }
 0x215   : > { %v860_v10 = vmul.f32 %v6909_v8, %v8860_v7  ;;  %v724_v11 = vpop.f32.mrb[1].mxu0 }
 0x216   : > { %v858_v12 = vmul.f32 %v8860_v7, %v724_v11  ;;  %v6910_v13 = vpop.f32.mrb[2].mxu0 }
 0x217   : > { %v899_v14 = vadd.f32 %v8862_v9, %v860_v10  ;;  %v861_v15 = vmul.f32 %v6910_v13, %v8860_v7  ;;  %v727_v16 = vpop.f32.mrb[3].mxu0 }
 0x218   : > { %v897_v17 = vadd.f32 %v8862_v9, %v858_v12  ;;  %v859_v18 = vmul.f32 %v8860_v7, %v727_v16 }
 0x219   : > { %v931_v19 = vmax.f32 %v899_v14, 0.0  ;;  %v900_v20 = vadd.f32 %v8862_v9, %v861_v15 }
 0x21a   : > { %v929_v21 = vmax.f32 %v897_v17, 0.0  ;;  %v898_v22 = vadd.f32 %v8862_v9, %v859_v18 }
 0x21b   : > { %v6596_v23 = vpack.c.bf16 %v931_v19, %v931_v19  ;;  %v932_v24 = vmax.f32 %v900_v20, 0.0 }
 0x21c   : > { %v6594_v25 = vpack.c.bf16 %v929_v21, %v929_v21  ;;  %v930_v26 = vmax.f32 %v898_v22, 0.0  ;;  %v6913_v27 = vpop.f32.mrb[4].mxu0 }
 0x21d   : > { %v1125_v29 = vrot.slane %v6596_v23, 7  ;;  %v6597_v30 = vpack.c.bf16 %v932_v24, %v932_v24  ;;  %v864_v31 = vmul.f32 %v6913_v27, %v8860_v7  ;;  %v740_v32 = vpop.f32.mrb[5].mxu0 }
 0x21e   : > { %v1120_v33 = vrot.slane %v6594_v25, 7  ;;  %v6595_v35 = vpack.c.bf16 %v930_v26, %v930_v26  ;;  %v862_v36 = vmul.f32 %v8860_v7, %v740_v32  ;;  %v6914_v37 = vpop.f32.mrb[6].mxu0 }
 0x21f   : > { %v1126_v38 = vrot.slane %v1125_v29, 4  ;;  %1252 = vst [vmem:[#allocation2 + $0x24] sm:$0xe] %v1125_v29  ;;  %v1127_v39 = vrot.slane %v6597_v30, 7  ;;  %v903_v40 = vadd.f32 %v8862_v9, %v864_v31  ;;  %v865_v42 = vmul.f32 %v6914_v37, %v8860_v7  ;;  %v743_v43 = vpop.f32.mrb[7].mxu0 }
 0x220   : > { %v1121_v44 = vrot.slane %v1120_v33, 4  ;;  %1249 = vst [vmem:[#allocation2 + $0x18] sm:$0xe] %v1120_v33  ;;  %v1122_v45 = vrot.slane %v6595_v35, 7  ;;  %v901_v46 = vadd.f32 %v8862_v9, %v862_v36  ;;  %v863_v47 = vmul.f32 %v8860_v7, %v743_v43 }
 0x221   : > { %v1128_v48 = vsel %vm8873_vm5, %v1126_v38, %v1127_v39  ;;  %v1129_v49 = vrot.slane %v1127_v39, 4  ;;  %v935_v50 = vmax.f32 %v903_v40, 0.0  ;;  %v904_v51 = vadd.f32 %v8862_v9, %v865_v42 }
 0x222   : > { %1253 = vst [vmem:[#allocation2 + $0x28] sm:$0xf] %v1128_v48  ;;  %v1123_v52 = vsel %vm8873_vm5, %v1121_v44, %v1122_v45  ;;  %v1124_v53 = vrot.slane %v1122_v45, 4  ;;  %v933_v54 = vmax.f32 %v901_v46, 0.0  ;;  %v902_v55 = vadd.f32 %v8862_v9, %v863_v47 }
 0x223   : > { %1254 = vst [vmem:[#allocation2 + $0x2c] sm:$0x1] %v1129_v49  ;;  %1250 = vst [vmem:[#allocation2 + $0x1c] sm:$0xf] %v1123_v52  ;;  %v6600_v56 = vpack.c.bf16 %v935_v50, %v935_v50  ;;  %v936_v57 = vmax.f32 %v904_v51, 0.0 }
 0x224   : > { %1251 = vst [vmem:[#allocation2 + $0x20] sm:$0x1] %v1124_v53  ;;  %v6598_v58 = vpack.c.bf16 %v933_v54, %v933_v54  ;;  %v934_v59 = vmax.f32 %v902_v55, 0.0  ;;  %v6917_v60 = vpop.f32.mrb[8].mxu0 }
 0x225   : > { %v1135_v61 = vrot.slane %v6600_v56, 7  ;;  %v6601_v62 = vpack.c.bf16 %v936_v57, %v936_v57  ;;  %v868_v0 = vmul.f32 %v6917_v60, %v8860_v7  ;;  %v756_v1 = vpop.f32.mrb[9].mxu0 }
 0x226   : > { %v1130_v2 = vrot.slane %v6598_v58, 7  ;;  %v6599_v3 = vpack.c.bf16 %v934_v59, %v934_v59  ;;  %v866_v4 = vmul.f32 %v8860_v7, %v756_v1  ;;  %v6918_v5 = vpop.f32.mrb[10].mxu0  ;;  %v8897_v22 = vld [vmem:[#allocation2 + $0x24] sm:$0xe] }
 0x227   : > { %v1136_v6 = vrot.slane %v1135_v61, 4  ;;  %1258 = vst [vmem:[#allocation2 + $0x3c] sm:$0xe] %v1135_v61  ;;  %v1137_v8 = vrot.slane %v6601_v62, 7  ;;  %v907_v10 = vadd.f32 %v8862_v9, %v868_v0  ;;  %v869_v11 = vmul.f32 %v6918_v5, %v8860_v7  ;;  %v759_v12 = vpop.f32.mrb[11].mxu0 }
 0x228   : > { %v1131_v13 = vrot.slane %v1130_v2, 4  ;;  %1255 = vst [vmem:[#allocation2 + $0x30] sm:$0xe] %v1130_v2  ;;  %v1132_v14 = vrot.slane %v6599_v3, 7  ;;  %v905_v15 = vadd.f32 %v8862_v9, %v866_v4  ;;  %v867_v16 = vmul.f32 %v8860_v7, %v759_v12  ;;  %v1349_v17 = vld [vmem:[#allocation2 + $0x18] sm:$0xe] }
 0x229   : > { %v1138_v18 = vsel %vm8873_vm5, %v1136_v6, %v1137_v8  ;;  %v1139_v19 = vrot.slane %v1137_v8, 4  ;;  %v939_v20 = vmax.f32 %v907_v10, 0.0  ;;  %v908_v21 = vadd.f32 %v8862_v9, %v869_v11  ;;  %v8914_v59 = vld [vmem:[#allocation2 + $0x28] sm:$0xf] }
 0x22a   : > { %1259 = vst [vmem:[#allocation2 + $0x40] sm:$0xf] %v1138_v18  ;;  %v1133_v23 = vsel %vm8873_vm5, %v1131_v13, %v1132_v14  ;;  %v1134_v24 = vrot.slane %v1132_v14, 4  ;;  %v937_v25 = vmax.f32 %v905_v15, 0.0  ;;  %v906_v26 = vadd.f32 %v8862_v9, %v867_v16  ;;  %v8902_v27 = vld [vmem:[#allocation2 + $0x1c] sm:$0xf] }
 0x22b   : > { %1260 = vst [vmem:[#allocation2 + $0x44] sm:$0x1] %v1139_v19  ;;  %1256 = vst [vmem:[#allocation2 + $0x34] sm:$0xf] %v1133_v23  ;;  %v6604_v28 = vpack.c.bf16 %v939_v20, %v939_v20  ;;  %v940_v29 = vmax.f32 %v908_v21, 0.0  ;;  %v6266_v31 = vrot.slane %v1349_v17, 9 }
 0x22c   : > { %v1350_v30 = vld [vmem:[#allocation2 + $0x20] sm:$0x1]  ;;  %v1444_v32 = vrot.slane %v8902_v27, 5  ;;  %1257 = vst [vmem:[#allocation2 + $0x38] sm:$0x1] %v1134_v24  ;;  %v6602_v33 = vpack.c.bf16 %v937_v25, %v937_v25  ;;  %v938_v35 = vmax.f32 %v906_v26, 0.0 }
 0x22d   : > { %v6921_v36 = vpop.f32.mrb[12].mxu0  ;;  %v1447_v37 = vrot.slane %v1350_v30, 5  ;;  %v6267_v38 = vrot.slane %v8897_v22, 9  ;;  %v1145_v39 = vrot.slane %v6604_v28, 7  ;;  %v6605_v40 = vpack.c.bf16 %v940_v29, %v940_v29  ;;  %v1352_v1 = vld [vmem:[#allocation2 + $0x2c] sm:$0x1] }
 0x22e   : > { %v872_v42 = vmul.f32 %v6921_v36, %v8860_v7  ;;  %v772_v43 = vpop.f32.mrb[13].mxu0  ;;  %v1445_v44 = vsel %vm8845_vm2, %v6266_v31, %v1444_v32  ;;  %v1140_v45 = vrot.slane %v6602_v33, 7  ;;  %v6603_v46 = vpack.c.bf16 %v938_v35, %v938_v35 }
 0x22f   : > { %v870_v47 = vmul.f32 %v8860_v7, %v772_v43  ;;  %v6922_v48 = vpop.f32.mrb[14].mxu0  ;;  %v1446_v49 = vrot.slane %v1444_v32, 4  ;;  %v1146_v50 = vrot.slane %v1145_v39, 4  ;;  %1264 = vst [vmem:[#allocation2 + $0x54] sm:$0xe] %v1145_v39  ;;  %v1147_v51 = vrot.slane %v6605_v40, 7 }
 0x230   : > { %v911_v52 = vadd.f32 %v8862_v9, %v872_v42  ;;  %v873_v53 = vmul.f32 %v6922_v48, %v8860_v7  ;;  %v775_v54 = vpop.f32.mrb[15].mxu0  ;;  %v1141_v55 = vrot.slane %v1140_v45, 4  ;;  %1261 = vst [vmem:[#allocation2 + $0x48] sm:$0xe] %v1140_v45  ;;  %v1142_v56 = vrot.slane %v6603_v46, 7 }
 0x231   : > { %v909_v57 = vadd.f32 %v8862_v9, %v870_v47  ;;  %v871_v58 = vmul.f32 %v8860_v7, %v775_v54  ;;  %v1148_v60 = vsel %vm8873_vm5, %v1146_v50, %v1147_v51  ;;  %v1149_v61 = vrot.slane %v1147_v51, 4  ;;  %v1353_v39 = vld [vmem:[#allocation2 + $0x30] sm:$0xe]  ;;  %v1355_v46 = vld [vmem:[#allocation2 + $0x3c] sm:$0xe] }
 0x232   : > { %v943_v62 = vmax.f32 %v911_v52, 0.0  ;;  %v912_v0 = vadd.f32 %v8862_v9, %v873_v53  ;;  %1265 = vst [vmem:[#allocation2 + $0x58] sm:$0xf] %v1148_v60  ;;  %v1143_v2 = vsel %vm8873_vm5, %v1141_v55, %v1142_v56  ;;  %v1144_v3 = vrot.slane %v1142_v56, 4  ;;  %v8942_v51 = vld [vmem:[#allocation2 + $0x40] sm:$0xf] }
 0x233   : > { %v941_v4 = vmax.f32 %v909_v57, 0.0  ;;  %v910_v5 = vadd.f32 %v8862_v9, %v871_v58  ;;  %1266 = vst [vmem:[#allocation2 + $0x5c] sm:$0x1] %v1149_v61  ;;  %1262 = vst [vmem:[#allocation2 + $0x4c] sm:$0xf] %v1143_v2  ;;  %v1448_v10 = vsel %vm8845_vm2, %v1446_v49, %v1447_v37  ;;  %v1451_v11 = vrot.slane %v8914_v59, 5 }
 0x234   : > { %v6608_v6 = vpack.c.bf16 %v943_v62, %v943_v62  ;;  %v944_v8 = vmax.f32 %v912_v0, 0.0  ;;  %1263 = vst [vmem:[#allocation2 + $0x50] sm:$0x1] %v1144_v3  ;;  %v6282_v14 = vcombine.low %v1445_v44, %v1448_v10  ;;  %v1454_v15 = vrot.slane %v1352_v1, 5  ;;  %v6925_v16 = vpop.f32.mrb[16].mxu0 }
 0x235   : > { %v6606_v12 = vpack.c.bf16 %v941_v4, %v941_v4  ;;  %v942_v13 = vmax.f32 %v910_v5, 0.0  ;;  %v1452_v19 = vsel %vm8845_vm2, %v6267_v38, %v1451_v11  ;;  %v1453_v20 = vrot.slane %v1451_v11, 4  ;;  %v788_v21 = vpop.f32.mrb[17].mxu0  ;;  %v8933_v38 = vld [vmem:[#allocation2 + $0x34] sm:$0xf] }
 0x236   : > { %v1155_v17 = vrot.slane %v6608_v6, 7  ;;  %v6609_v18 = vpack.c.bf16 %v944_v8, %v944_v8  ;;  %6959 = vmatprep.mubr.bf16.mxu0 %v6282_v14  ;;  %v876_v24 = vmul.f32 %v6925_v16, %v8860_v7  ;;  %v874_v25 = vmul.f32 %v8860_v7, %v788_v21  ;;  %v6926_v26 = vpop.f32.mrb[18].mxu0  ;;  %v1354_v45 = vld [vmem:[#allocation2 + $0x38] sm:$0x1]  ;;  %v1356_v56 = vld [vmem:[#allocation2 + $0x44] sm:$0x1] }
 0x237   : > { %v1150_v22 = vrot.slane %v6606_v12, 7  ;;  %v6607_v23 = vpack.c.bf16 %v942_v13, %v942_v13  ;;  %v1455_v30 = vsel %vm8845_vm2, %v1453_v20, %v1454_v15  ;;  %v877_v31 = vmul.f32 %v6926_v26, %v8860_v7  ;;  %v791_v32 = vpop.f32.mrb[19].mxu0  ;;  %v1357_v21 = vld [vmem:[#allocation2 + $0x48] sm:$0xe] }
 0x238   : > { %v1156_v28 = vrot.slane %v1155_v17, 4  ;;  %1270 = vst [vmem:[#allocation2 + $0x6c] sm:$0xe] %v1155_v17  ;;  %v1157_v29 = vrot.slane %v6609_v18, 7  ;;  %v6283_v36 = vcombine.low %v1452_v19, %v1455_v30  ;;  %v915_v37 = vadd.f32 %v8862_v9, %v876_v24 }
 0x239   : > { %v1151_v33 = vrot.slane %v1150_v22, 4  ;;  %1267 = vst [vmem:[#allocation2 + $0x60] sm:$0xe] %v1150_v22  ;;  %v1152_v35 = vrot.slane %v6607_v23, 7  ;;  %v913_v43 = vadd.f32 %v8862_v9, %v874_v25  ;;  %v916_v44 = vadd.f32 %v8862_v9, %v877_v31 }
 0x23a   : > { %v1158_v40 = vsel %vm8873_vm5, %v1156_v28, %v1157_v29  ;;  %v1159_v42 = vrot.slane %v1157_v29, 4  ;;  %6960 = vmatmul.mubr.bf16.gmra.mrb[36].mxu0 %v6283_v36  ;;  %v947_v49 = vmax.f32 %v915_v37, 0.0  ;;  %v875_v50 = vmul.f32 %v8860_v7, %v791_v32  ;;  %v8959_v31 = vld [vmem:[#allocation2 + $0x4c] sm:$0xf]  ;;  %v1359_v32 = vld [vmem:[#allocation2 + $0x54] sm:$0xe] }
 0x23b   : > { %1271 = vst [vmem:[#allocation2 + $0x70] sm:$0xf] %v1158_v40  ;;  %v1153_v47 = vsel %vm8873_vm5, %v1151_v33, %v1152_v35  ;;  %v1154_v48 = vrot.slane %v1152_v35, 4  ;;  %v945_v52 = vmax.f32 %v913_v43, 0.0  ;;  %v948_v53 = vmax.f32 %v916_v44, 0.0 }
 0x23c   : > { %1272 = vst [vmem:[#allocation2 + $0x74] sm:$0x1] %v1159_v42  ;;  %1268 = vst [vmem:[#allocation2 + $0x64] sm:$0xf] %v1153_v47  ;;  %v6268_v54 = vrot.slane %v1353_v39, 9  ;;  %v1458_v55 = vrot.slane %v8933_v38, 5  ;;  %v6612_v57 = vpack.c.bf16 %v947_v49, %v947_v49  ;;  %v914_v58 = vadd.f32 %v8862_v9, %v875_v50 }
 0x23d   : > { %1269 = vst [vmem:[#allocation2 + $0x68] sm:$0x1] %v1154_v48  ;;  %v1461_v60 = vrot.slane %v1354_v45, 5  ;;  %v6269_v61 = vrot.slane %v1355_v46, 9  ;;  %v6929_v62 = vpop.f32.mrb[20].mxu0  ;;  %v6610_v0 = vpack.c.bf16 %v945_v52, %v945_v52  ;;  %v6613_v1 = vpack.c.bf16 %v948_v53, %v948_v53 }
 0x23e   : > { %v1459_v2 = vsel %vm8845_vm2, %v6268_v54, %v1458_v55  ;;  %v1460_v3 = vrot.slane %v1458_v55, 4  ;;  %v804_v4 = vpop.f32.mrb[21].mxu0  ;;  %v1165_v5 = vrot.slane %v6612_v57, 7  ;;  %v946_v6 = vmax.f32 %v914_v58, 0.0  ;;  %v1358_v37 = vld [vmem:[#allocation2 + $0x50] sm:$0x1] }
 0x23f   : > { %v1465_v8 = vrot.slane %v8942_v51, 5  ;;  %v1468_v10 = vrot.slane %v1356_v56, 5  ;;  %v6930_v11 = vpop.f32.mrb[22].mxu0  ;;  %v1160_v12 = vrot.slane %v6610_v0, 7  ;;  %v1167_v13 = vrot.slane %v6613_v1, 7 }
 0x240   : > { %v1462_v14 = vsel %vm8845_vm2, %v1460_v3, %v1461_v60  ;;  %v880_v15 = vmul.f32 %v6929_v62, %v8860_v7  ;;  %v807_v16 = vpop.f32.mrb[23].mxu0  ;;  %v1166_v17 = vrot.slane %v1165_v5, 4  ;;  %1276 = vst [vmem:[#allocation2 + $0x84] sm:$0xe] %v1165_v5  ;;  %v6611_v18 = vpack.c.bf16 %v946_v6, %v946_v6  ;;  %v8964_v40 = vld [vmem:[#allocation2 + $0x58] sm:$0xf] }
 0x241   : > { %v6284_v19 = vcombine.low %v1459_v2, %v1462_v14  ;;  %v1466_v20 = vsel %vm8845_vm2, %v6269_v61, %v1465_v8  ;;  %v1161_v22 = vrot.slane %v1160_v12, 4  ;;  %1273 = vst [vmem:[#allocation2 + $0x78] sm:$0xe] %v1160_v12  ;;  %v1169_v23 = vrot.slane %v1167_v13, 4  ;;  %v1360_v52 = vld [vmem:[#allocation2 + $0x5c] sm:$0x1] }
 0x242   : > { %v1467_v24 = vrot.slane %v1465_v8, 4  ;;  %v919_v25 = vadd.f32 %v8862_v9, %v880_v15  ;;  %v1168_v26 = vsel %vm8873_vm5, %v1166_v17, %v1167_v13  ;;  %v1162_v28 = vrot.slane %v6611_v18, 7 }
 0x243   : > { %6963 = vmatprep.mubr.bf16.mxu0 %v6284_v19  ;;  %v878_v29 = vmul.f32 %v8860_v7, %v804_v4  ;;  %v881_v30 = vmul.f32 %v6930_v11, %v8860_v7  ;;  %1277 = vst [vmem:[#allocation2 + $0x88] sm:$0xf] %v1168_v26  ;;  %1278 = vst [vmem:[#allocation2 + $0x8c] sm:$0x1] %v1169_v23  ;;  %v879_v36 = vmul.f32 %v8860_v7, %v807_v16  ;;  %v1361_v16 = vld [vmem:[#allocation2 + $0x60] sm:$0xe] }
 0x244   : > { %v1469_v33 = vsel %vm8845_vm2, %v1467_v24, %v1468_v10  ;;  %v951_v35 = vmax.f32 %v919_v25, 0.0  ;;  %v6270_v39 = vrot.slane %v1357_v21, 9  ;;  %v1163_v42 = vsel %vm8873_vm5, %v1161_v22, %v1162_v28  ;;  %v6933_v46 = vpop.f32.mrb[24].mxu0  ;;  %v8983_v21 = vld [vmem:[#allocation2 + $0x64] sm:$0xf] }
 0x245   : > { %v1164_v43 = vrot.slane %v1162_v28, 4  ;;  %v6285_v44 = vcombine.low %v1466_v20, %v1469_v33  ;;  %v917_v45 = vadd.f32 %v8862_v9, %v878_v29  ;;  %1274 = vst [vmem:[#allocation2 + $0x7c] sm:$0xf] %v1163_v42  ;;  %v920_v48 = vadd.f32 %v8862_v9, %v881_v30  ;;  %v820_v53 = vpop.f32.mrb[25].mxu0  ;;  %v1362_v22 = vld [vmem:[#allocation2 + $0x68] sm:$0x1] }
 0x246   : > { %v6616_v47 = vpack.c.bf16 %v951_v35, %v951_v35  ;;  %v918_v49 = vadd.f32 %v8862_v9, %v879_v36  ;;  %v1472_v50 = vrot.slane %v8959_v31, 5  ;;  %v1475_v55 = vrot.slane %v1358_v37, 5  ;;  %v6934_v58 = vpop.f32.mrb[26].mxu0  ;;  %v7878_v30 = vld [vmem:[#allocation8 + $0x108] sm:$0xff]   ;;  %v1363_v37 = vld [vmem:[#allocation2 + $0x6c] sm:$0xe] }
 0x247   : > { %1275 = vst [vmem:[#allocation2 + $0x80] sm:$0x1] %v1164_v43  ;;  %6964 = vmatmul.mubr.bf16.gmra.mrb[40].mxu0 %v6285_v44  ;;  %v949_v54 = vmax.f32 %v917_v45, 0.0  ;;  %v6271_v56 = vrot.slane %v1359_v32, 9  ;;  %v1479_v57 = vrot.slane %v8964_v40, 5  ;;  %v952_v61 = vmax.f32 %v920_v48, 0.0 }
 0x248   : > { %v1175_v60 = vrot.slane %v6616_v47, 7  ;;  %v950_v62 = vmax.f32 %v918_v49, 0.0  ;;  %v1473_v0 = vsel %vm8845_vm2, %v6270_v39, %v1472_v50  ;;  %v823_v1 = vpop.f32.mrb[27].mxu0  ;;  %v1474_v3 = vrot.slane %v1472_v50, 4  ;;  %v8993_v47 = vld [vmem:[#allocation2 + $0x70] sm:$0xf] }
 0x249   : > { %v6614_v2 = vpack.c.bf16 %v949_v54, %v949_v54  ;;  %v1480_v4 = vsel %vm8845_vm2, %v6271_v56, %v1479_v57  ;;  %v1481_v5 = vrot.slane %v1479_v57, 4  ;;  %v6617_v8 = vpack.c.bf16 %v952_v61, %v952_v61  ;;  %v1364_v54 = vld [vmem:[#allocation2 + $0x74] sm:$0x1] }
 0x24a   : > { %v1176_v6 = vrot.slane %v1175_v60, 4  ;;  %1282 = vst [vmem:[#allocation2 + $0x9c] sm:$0xe] %v1175_v60  ;;  %v6615_v10 = vpack.c.bf16 %v950_v62, %v950_v62  ;;  %v1482_v11 = vrot.slane %v1360_v52, 5  ;;  %v1476_v13 = vsel %vm8845_vm2, %v1474_v3, %v1475_v55  ;;  %v7876_v42 = vld [vmem:[#allocation2 + $0x84] sm:$0xff]  }
 0x24b   : > { %v1170_v12 = vrot.slane %v6614_v2, 7  ;;  %v884_v14 = vmul.f32 %v6933_v46, %v8860_v7  ;;  %v882_v15 = vmul.f32 %v8860_v7, %v820_v53  ;;  %v1177_v17 = vrot.slane %v6617_v8, 7  ;;  %v7881_v2 = vld [vmem:[#allocation8 + $0x110] sm:$0xff]  }
 0x24c   : > { %v1172_v18 = vrot.slane %v6615_v10, 7  ;;  %v6286_v19 = vcombine.low %v1473_v0, %v1476_v13  ;;  %v1483_v20 = vsel %vm8845_vm2, %v1481_v5, %v1482_v11  ;;  %v6937_v28 = vpop.f32.mrb[28].mxu0  ;;  %v7874_v29 = vld [vmem:[#allocation2 + $0x78] sm:$0xff]   ;;  %v885_v36 = vmul.f32 %v6934_v58, %v8860_v7 }
 0x24d   : > { %v1171_v23 = vrot.slane %v1170_v12, 4  ;;  %1279 = vst [vmem:[#allocation2 + $0x90] sm:$0xe] %v1170_v12  ;;  %v6287_v24 = vcombine.low %v1480_v4, %v1483_v20  ;;  %v923_v25 = vadd.f32 %v8862_v9, %v884_v14  ;;  %v921_v26 = vadd.f32 %v8862_v9, %v882_v15  ;;  %v836_v39 = vpop.f32.mrb[29].mxu0  ;;  %7115 = vmatprep.mubr.bf16.mxu1 %v7874_v29  ;;  %v7884_v20 = vld [vmem:[#allocation8 + $0x118] sm:$0xff]  }
 0x24e   : > { %v1178_v32 = vsel %vm8873_vm5, %v1176_v6, %v1177_v17  ;;  %v1179_v33 = vrot.slane %v1177_v17, 4  ;;  %v1174_v35 = vrot.slane %v1172_v18, 4  ;;  %6967 = vmatprep.mubr.bf16.mxu0 %v6286_v19  ;;  %v883_v46 = vmul.f32 %v8860_v7, %v823_v1  ;;  %v6938_v48 = vpop.f32.mrb[30].mxu0  ;;  %7116 = vmatmul.mubr.bf16.vlgmr.msra.gmra.mrb[0].mxu1 %v7876_v42 }
 0x24f   : > { %1283 = vst [vmem:[#allocation2 + $0xa0] sm:$0xf] %v1178_v32  ;;  %v1173_v43 = vsel %vm8873_vm5, %v1171_v23, %v1172_v18  ;;  %6968 = vmatmul.mubr.bf16.gmra.mrb[44].mxu0 %v6287_v24  ;;  %v955_v44 = vmax.f32 %v923_v25, 0.0  ;;  %v953_v45 = vmax.f32 %v921_v26, 0.0  ;;  %v924_v49 = vadd.f32 %v8862_v9, %v885_v36  ;;  %v839_v55 = vpop.f32.mrb[31].mxu0  ;;  %7132 = vmatpush3.bf16.msra.mxu1 %v8857_v63 }
 0x250   : > { %1284 = vst [vmem:[#allocation2 + $0xa4] sm:$0x1] %v1179_v33  ;;  %1280 = vst [vmem:[#allocation2 + $0x94] sm:$0xf] %v1173_v43  ;;  %v6272_v50 = vrot.slane %v1361_v16, 9  ;;  %v1486_v52 = vrot.slane %v8983_v21, 5  ;;  %v922_v58 = vadd.f32 %v8862_v9, %v883_v46  ;;  %7133 = vmatprep.subr.bf16.mxu1 %v7878_v30  ;;  %v888_v18 = vmul.f32 %v6937_v28, %v8860_v7 }
 0x251   : > { %1281 = vst [vmem:[#allocation2 + $0x98] sm:$0x1] %v1174_v35  ;;  %v1489_v53 = vrot.slane %v1362_v22, 5  ;;  %v6620_v56 = vpack.c.bf16 %v955_v44, %v955_v44  ;;  %v6618_v57 = vpack.c.bf16 %v953_v45, %v953_v45  ;;  %v6273_v60 = vrot.slane %v1363_v37, 9  ;;  %v9012_v26 = vld [vmem:[#allocation2 + $0x7c] sm:$0xf] }
 0x252   : > { %v956_v61 = vmax.f32 %v924_v49, 0.0  ;;  %v1487_v62 = vsel %vm8845_vm2, %v6272_v50, %v1486_v52  ;;  %v1488_v0 = vrot.slane %v1486_v52, 4  ;;  %v1493_v1 = vrot.slane %v8993_v47, 5  ;;  %v1365_v35 = vld [vmem:[#allocation2 + $0x78] sm:$0xe] }
 0x253   : > { %v1185_v3 = vrot.slane %v6620_v56, 7  ;;  %v1180_v4 = vrot.slane %v6618_v57, 7  ;;  %v954_v5 = vmax.f32 %v922_v58, 0.0  ;;  %v1496_v6 = vrot.slane %v1364_v54, 5  ;;  %7134 = vmatpush3.bf16.msra.mxu1 %v7878_v30  ;;  %v1366_v36 = vld [vmem:[#allocation2 + $0x80] sm:$0x1] }
 0x254   : > { %v6621_v8 = vpack.c.bf16 %v956_v61, %v956_v61  ;;  %v1490_v10 = vsel %vm8845_vm2, %v1488_v0, %v1489_v53  ;;  %v1494_v63 = vsel %vm8845_vm2, %v6273_v60, %v1493_v1  ;;  %v1495_v11 = vrot.slane %v1493_v1, 4  ;;  %7135 = vmatprep.subr.bf16.mxu1 %v7881_v2  ;;  %v1367_v49 = vld [vmem:[#allocation2 + $0x84] sm:$0xe]  ;;  %v7887_v58 = vld [vmem:[#allocation8 + $0x120] sm:$0xff]  }
 0x255   : > { %v1186_v12 = vrot.slane %v1185_v3, 4  ;;  %1288 = vst [vmem:[#allocation2 + $0xb4] sm:$0xe] %v1185_v3  ;;  %v1181_v13 = vrot.slane %v1180_v4, 4  ;;  %1285 = vst [vmem:[#allocation2 + $0xa8] sm:$0xe] %v1180_v4  ;;  %v6619_v14 = vpack.c.bf16 %v954_v5, %v954_v5  ;;  %v6288_v15 = vcombine.low %v1487_v62, %v1490_v10 }
 0x256   : > { %v1187_v16 = vrot.slane %v6621_v8, 7  ;;  %v1497_v17 = vsel %vm8845_vm2, %v1495_v11, %v1496_v6  ;;  %v886_v19 = vmul.f32 %v8860_v7, %v836_v39  ;;  %v889_v24 = vmul.f32 %v6938_v48, %v8860_v7  ;;  %v7882_v37 = vld [vmem:[#allocation2 + $0x9c] sm:$0xff]   ;;  %v9023_v48 = vld [vmem:[#allocation2 + $0x88] sm:$0xf]  ;;  %v1369_v6 = vld [vmem:[#allocation2 + $0x90] sm:$0xe] }
 0x257   : > { %v1182_v22 = vrot.slane %v6619_v14, 7  ;;  %6971 = vmatprep.mubr.bf16.mxu0 %v6288_v15  ;;  %v6289_v23 = vcombine.low %v1494_v63, %v1497_v17  ;;  %v887_v25 = vmul.f32 %v8860_v7, %v839_v55  ;;  %v7880_v29 = vld [vmem:[#allocation2 + $0x90] sm:$0xff]   ;;  %v927_v28 = vadd.f32 %v8862_v9, %v888_v18  ;;  %v1368_v55 = vld [vmem:[#allocation2 + $0x8c] sm:$0x1]  ;;  %7136 = vmatpush3.bf16.msra.mxu1 %v7881_v2  ;;  %v9032_v10 = vld [vmem:[#allocation2 + $0xa0] sm:$0xf] }
 0x258   : > { %v1188_v30 = vsel %vm8873_vm5, %v1186_v12, %v1187_v16  ;;  %v1189_v32 = vrot.slane %v1187_v16, 4  ;;  %v925_v33 = vadd.f32 %v8862_v9, %v886_v19  ;;  %v928_v7 = vadd.f32 %v8862_v9, %v889_v24  ;;  %7119 = vmatprep.mubr.bf16.mxu1 %v7880_v29  ;;  %7137 = vmatprep.subr.bf16.mxu1 %v7884_v20  ;;  %v9028_v1 = vld [vmem:[#allocation2 + $0x94] sm:$0xf]  ;;  %v1370_v8 = vld [vmem:[#allocation2 + $0x98] sm:$0x1] }
 0x259   : > { %1289 = vst [vmem:[#allocation2 + $0xb8] sm:$0xf] %v1188_v30  ;;  %v1183_v39 = vsel %vm8873_vm5, %v1181_v13, %v1182_v22  ;;  %v1184_v42 = vrot.slane %v1182_v22, 4  ;;  %6972 = vmatmul.mubr.bf16.gmra.mrb[48].mxu0 %v6289_v23  ;;  %v926_v43 = vadd.f32 %v8862_v9, %v887_v25  ;;  %v959_v44 = vmax.f32 %v927_v28, 0.0  ;;  %7120 = vmatmul.mubr.bf16.gmra.mrb[4].mxu1 %v7882_v37  ;;  %v1372_v14 = vld [vmem:[#allocation2 + $0xa4] sm:$0x1] }
 0x25a   : > { %1290 = vst [vmem:[#allocation2 + $0xbc] sm:$0x1] %v1189_v32  ;;  %1286 = vst [vmem:[#allocation2 + $0xac] sm:$0xf] %v1183_v39  ;;  %v957_v45 = vmax.f32 %v925_v33, 0.0  ;;  %v1500_v46 = vrot.slane %v9012_v26, 5 }
 0x25b   : > { %1287 = vst [vmem:[#allocation2 + $0xb0] sm:$0x1] %v1184_v42  ;;  %v960_v50 = vmax.f32 %v928_v7, 0.0  ;;  %v958_v52 = vmax.f32 %v926_v43, 0.0  ;;  %v6274_v53 = vrot.slane %v1365_v35, 9  ;;  %v1503_v54 = vrot.slane %v1366_v36, 5  ;;  %7138 = vmatpush3.bf16.msra.mxu1 %v7884_v20 }
 0x25c   : > { %v6624_v56 = vpack.c.bf16 %v959_v44, %v959_v44  ;;  %v6622_v9 = vpack.c.bf16 %v957_v45, %v957_v45  ;;  %v1502_v57 = vrot.slane %v1500_v46, 4  ;;  %v1507_v0 = vrot.slane %v9023_v48, 5  ;;  %v7890_v15 = vld [vmem:[#allocation8 + $0x128] sm:$0xff]   ;;  %7139 = vmatprep.subr.bf16.mxu1 %v7887_v58  ;;  %v1373_v35 = vld [vmem:[#allocation2 + $0xa8] sm:$0xe] }
 0x25d   : > { %v6625_v60 = vpack.c.bf16 %v960_v50, %v960_v50  ;;  %v6623_v61 = vpack.c.bf16 %v958_v52, %v958_v52  ;;  %v1501_v62 = vsel %vm8845_vm2, %v6274_v53, %v1500_v46  ;;  %v1510_v2 = vrot.slane %v1368_v55, 5  ;;  %v1371_v25 = vld [vmem:[#allocation2 + $0x9c] sm:$0xe]  ;;  %v3008_v55 = vld [vmem:[#allocation2 + $0x20] sm:$0x1] }
 0x25e   : > { %v1195_v3 = vrot.slane %v6624_v56, 7  ;;  %v1190_v4 = vrot.slane %v6622_v9, 7  ;;  %v1504_v5 = vsel %vm8845_vm2, %v1502_v57, %v1503_v54  ;;  %v6275_v13 = vrot.slane %v1367_v49, 9  ;;  %v7893_v49 = vld [vmem:[#allocation8 + $0x130] sm:$0xff]   ;;  %v9053_v54 = vld [vmem:[#allocation2 + $0x1c] sm:$0xf] }
 0x25f   : > { %v1197_v63 = vrot.slane %v6625_v60, 7  ;;  %v1192_v11 = vrot.slane %v6623_v61, 7  ;;  %v6290_v12 = vcombine.low %v1501_v62, %v1504_v5  ;;  %v1509_v18 = vrot.slane %v1507_v0, 4  ;;  %7140 = vmatpush3.bf16.msra.mxu1 %v7887_v58  ;;  %v3006_v58 = vld [vmem:[#allocation2 + $0x18] sm:$0xe]  ;;  %v7896_v60 = vld [vmem:[#allocation8 + $0x138] sm:$0xff]  }
 0x260   : > { %v1196_v16 = vrot.slane %v1195_v3, 4  ;;  %1294 = vst [vmem:[#allocation2 + $0xcc] sm:$0xe] %v1195_v3  ;;  %v1191_v17 = vrot.slane %v1190_v4, 4  ;;  %1291 = vst [vmem:[#allocation2 + $0xc0] sm:$0xe] %v1190_v4  ;;  %v1508_v30 = vsel %vm8845_vm2, %v6275_v13, %v1507_v0  ;;  %7141 = vmatprep.subr.bf16.mxu1 %v7890_v15 }
 0x261   : > { %v1514_v19 = vrot.slane %v9028_v1, 5  ;;  %v1199_v22 = vrot.slane %v1197_v63, 4  ;;  %v1194_v23 = vrot.slane %v1192_v11, 4  ;;  %6975 = vmatprep.mubr.bf16.mxu0 %v6290_v12  ;;  %v1517_v24 = vrot.slane %v1370_v8, 5  ;;  %v7886_v28 = vld [vmem:[#allocation2 + $0xa8] sm:$0xff]   ;;  %v7888_v42 = vld [vmem:[#allocation2 + $0xb4] sm:$0xff]  }
 0x262   : > { %v1198_v29 = vsel %vm8873_vm5, %v1196_v16, %v1197_v63  ;;  %v1193_v20 = vsel %vm8873_vm5, %v1191_v17, %v1192_v11  ;;  %v1511_v32 = vsel %vm8845_vm2, %v1509_v18, %v1510_v2  ;;  %v9043_v33 = vld [vmem:[#allocation2 + $0xac] sm:$0xf]  ;;  %v6276_v37 = vrot.slane %v1369_v6, 9  ;;  %v1374_v7 = vld [vmem:[#allocation2 + $0xb0] sm:$0x1]  ;;  %7123 = vmatprep.mubr.bf16.mxu1 %v7886_v28 }
 0x263   : > { %1295 = vst [vmem:[#allocation2 + $0xd0] sm:$0xf] %v1198_v29  ;;  %1296 = vst [vmem:[#allocation2 + $0xd4] sm:$0x1] %v1199_v22  ;;  %v6291_v36 = vcombine.low %v1508_v30, %v1511_v32  ;;  %v1516_v39 = vrot.slane %v1514_v19, 4  ;;  %v1521_v34 = vrot.slane %v9032_v10, 5  ;;  %7124 = vmatmul.mubr.bf16.gmra.mrb[8].mxu1 %v7888_v42 }
 0x264   : > { %1292 = vst [vmem:[#allocation2 + $0xc4] sm:$0xf] %v1193_v20  ;;  %1293 = vst [vmem:[#allocation2 + $0xc8] sm:$0x1] %v1194_v23  ;;  %v1524_v43 = vrot.slane %v1372_v14, 5  ;;  %v1528_v44 = vrot.slane %v9043_v33, 5  ;;  %v1515_v50 = vsel %vm8845_vm2, %v6276_v37, %v1514_v19  ;;  %7142 = vmatpush3.bf16.msra.mxu1 %v7890_v15 }
 0x265   : > { %v1531_v45 = vrot.slane %v1374_v7, 5  ;;  %v9047_v46 = vld [vmem:[#allocation2 + $0xb8] sm:$0xf]  ;;  %6976 = vmatmul.mubr.bf16.gmra.mrb[52].mxu0 %v6291_v36  ;;  %v1518_v52 = vsel %vm8845_vm2, %v1516_v39, %v1517_v24  ;;  %v1523_v53 = vrot.slane %v1521_v34, 4  ;;  %v6277_v9 = vrot.slane %v1371_v25, 9  ;;  %7143 = vmatprep.subr.bf16.mxu1 %v7893_v49  ;;  %v7900_v32 = vld [vmem:[#allocation8 + $0x140] sm:$0xff]  }
 0x266   : > { %v6292_v56 = vcombine.low %v1515_v50, %v1518_v52  ;;  %v1530_v57 = vrot.slane %v1528_v44, 4  ;;  %v9055_v61 = vld [vmem:[#allocation2 + $0x28] sm:$0xf]  ;;  %v6278_v62 = vrot.slane %v1373_v35, 9  ;;  %v1535_v0 = vrot.slane %v9047_v46, 5 }
 0x267   : > { %v1525_v3 = vsel %vm8845_vm2, %v1523_v53, %v1524_v43  ;;  %v1376_v5 = vld [vmem:[#allocation2 + $0xbc] sm:$0x1]  ;;  %v3104_v2 = vrot.slane %v9053_v54, 5  ;;  %v3107_v6 = vrot.slane %v3008_v55, 5  ;;  %v9063_v8 = vld [vmem:[#allocation2 + $0x34] sm:$0xf]  ;;  %v1522_v13 = vsel %vm8845_vm2, %v6277_v9, %v1521_v34 }
 0x268   : > { %6979 = vmatprep.mubr.bf16.mxu0 %v6292_v56  ;;  %v1532_v4 = vsel %vm8845_vm2, %v1530_v57, %v1531_v45  ;;  %v1529_v63 = vsel %vm8845_vm2, %v6278_v62, %v1528_v44  ;;  %v6392_v11 = vrot.slane %v3006_v58, 9  ;;  %v3011_v12 = vld [vmem:[#allocation2 + $0x2c] sm:$0x1]  ;;  %v6293_v17 = vcombine.low %v1522_v13, %v1525_v3  ;;  %7144 = vmatpush3.bf16.msra.mxu1 %v7893_v49  ;;  %v3014_v23 = vld [vmem:[#allocation2 + $0x38] sm:$0x1] }
 0x269   : > { %v6294_v14 = vcombine.low %v1529_v63, %v1532_v4  ;;  %v3106_v16 = vrot.slane %v3104_v2, 4  ;;  %v1538_v18 = vrot.slane %v1376_v5, 5  ;;  %v3111_v22 = vrot.slane %v9055_v61, 5  ;;  %v1375_v25 = vld [vmem:[#allocation2 + $0xb4] sm:$0xe]  ;;  %7145 = vmatprep.subr.bf16.mxu1 %v7896_v60 }
 0x26a   : > { %v7894_v19 = vld [vmem:[#allocation2 + $0xcc] sm:$0xff]   ;;  %v3118_v24 = vrot.slane %v9063_v8, 5  ;;  %v1537_v29 = vrot.slane %v1535_v0, 4  ;;  %v3105_v20 = vsel %vm8845_vm2, %v6392_v11, %v3104_v2  ;;  %v3114_v28 = vrot.slane %v3011_v12, 5  ;;  %v3009_v36 = vld [vmem:[#allocation2 + $0x24] sm:$0xe] }
 0x26b   : > { %v7892_v15 = vld [vmem:[#allocation2 + $0xc0] sm:$0xff]   ;;  %v3108_v30 = vsel %vm8845_vm2, %v3106_v16, %v3107_v6  ;;  %v3113_v37 = vrot.slane %v3111_v22, 4  ;;  %v3121_v7 = vrot.slane %v3014_v23, 5  ;;  %v9077_v43 = vld [vmem:[#allocation2 + $0x4c] sm:$0xf]  ;;  %v6279_v44 = vrot.slane %v1375_v25, 9 }
 0x26c   : > { %7127 = vmatprep.mubr.bf16.mxu1 %v7892_v15  ;;  %v6408_v35 = vcombine.low %v3105_v20, %v3108_v30  ;;  %v9075_v39 = vld [vmem:[#allocation2 + $0x40] sm:$0xf]  ;;  %v3120_v42 = vrot.slane %v3118_v24, 4  ;;  %7146 = vmatpush3.bf16.msra.mxu1 %v7896_v60  ;;  %v3012_v45 = vld [vmem:[#allocation2 + $0x30] sm:$0xe]  ;;  %v1539_v49 = vsel %vm8845_vm2, %v1537_v29, %v1538_v18  ;;  %v6393_v50 = vrot.slane %v3009_v36, 9 }
 0x26d   : > { %6980 = vmatmul.mubr.bf16.gmra.mrb[56].mxu0 %v6293_v17  ;;  %7128 = vmatmul.mubr.bf16.gmra.mrb[12].mxu1 %v7894_v19  ;;  %v1297_v34 = vld [vmem:[#allocation2] sm:$0xf]  ;;  %v3115_v52 = vsel %vm8845_vm2, %v3113_v37, %v3114_v28  ;;  %v3125_v53 = vrot.slane %v9075_v39, 5  ;;  %v9084_v55 = vld [vmem:[#allocation2 + $0x4] sm:$0xf]  ;;  %v3132_v57 = vrot.slane %v9077_v43, 5  ;;  %v1536_v58 = vsel %vm8845_vm2, %v6279_v44, %v1535_v0 }
 0x26e   : > { %6983 = vmatprep.mubr.bf16.mxu0 %v6294_v14  ;;  %7147 = vmatprep.mubr.bf16.mxu1 %v6408_v35  ;;  %v6304_v56 = vcombine.low %v1297_v34, %v9084_v55  ;;  %v3017_v9 = vld [vmem:[#allocation2 + $0x44] sm:$0x1]  ;;  %v3112_v60 = vsel %vm8845_vm2, %v6393_v50, %v3111_v22  ;;  %v6394_v62 = vrot.slane %v3012_v45, 9  ;;  %v3122_v3 = vsel %vm8845_vm2, %v3120_v42, %v3121_v7  ;;  %v3020_v4 = vld [vmem:[#allocation2 + $0x50] sm:$0x1]  ;;  %v7903_v6 = vld [vmem:[#allocation8 + $0x148] sm:$0xff]  }
 0x26f   : > { %7179 = vmatprep.subr.bf16.mxu1 %v7900_v32  ;;  %v6295_v5 = vcombine.low %v1536_v58, %v1539_v49  ;;  %v6409_v2 = vcombine.low %v3112_v60, %v3115_v52  ;;  %v3127_v11 = vrot.slane %v3125_v53, 4  ;;  %v3128_v12 = vrot.slane %v3017_v9, 5  ;;  %v3015_v0 = vld [vmem:[#allocation2 + $0x3c] sm:$0xe]  ;;  %v9096_v16 = vld [vmem:[#allocation2 + $0x58] sm:$0xf] }
 0x270   : > { %v3119_v63 = vsel %vm8845_vm2, %v6394_v62, %v3118_v24  ;;  %v3134_v14 = vrot.slane %v3132_v57, 4  ;;  %v3135_v15 = vrot.slane %v3020_v4, 5  ;;  %v1299_v17 = vld [vmem:[#allocation2 + $0xc] sm:$0xf]  ;;  %v3018_v18 = vld [vmem:[#allocation2 + $0x48] sm:$0xe] }
 0x271   : > { %v6410_v13 = vcombine.low %v3119_v63, %v3122_v3  ;;  %v9098_v19 = vld [vmem:[#allocation2 + $0x64] sm:$0xf]  ;;  %v6395_v23 = vrot.slane %v3015_v0, 9  ;;  %v3129_v24 = vsel %vm8845_vm2, %v3127_v11, %v3128_v12  ;;  %v3139_v25 = vrot.slane %v9096_v16, 5  ;;  %v9103_v29 = vld [vmem:[#allocation2 + $0x10] sm:$0xf] }
 0x272   : > { %v7906_v22 = vld [vmem:[#allocation8 + $0x150] sm:$0xff]   ;;  %v6305_v20 = vcombine.low %v1299_v17, %v9103_v29  ;;  %v6396_v30 = vrot.slane %v3018_v18, 9  ;;  %v3023_v28 = vld [vmem:[#allocation2 + $0x5c] sm:$0x1]  ;;  %v3146_v35 = vrot.slane %v9098_v19, 5  ;;  %v7909_v52 = vld [vmem:[#allocation8 + $0x158] sm:$0xff]  }
 0x273   : > { %v3126_v36 = vsel %vm8845_vm2, %v6395_v23, %v3125_v53  ;;  %v3026_v37 = vld [vmem:[#allocation2 + $0x68] sm:$0x1]  ;;  %v1301_v34 = vld [vmem:[#allocation2 + $0x18] sm:$0xf]  ;;  %v3141_v49 = vrot.slane %v3139_v25, 4  ;;  %v3142_v50 = vrot.slane %v3023_v28, 5 }
 0x274   : > { %v6411_v42 = vcombine.low %v3126_v36, %v3129_v24  ;;  %v3133_v7 = vsel %vm8845_vm2, %v6396_v30, %v3132_v57  ;;  %v6306_v44 = vcombine.low %v1301_v34, %v8902_v27  ;;  %v3021_v9 = vld [vmem:[#allocation2 + $0x54] sm:$0xe]  ;;  %v3148_v58 = vrot.slane %v3146_v35, 4  ;;  %v9114_v60 = vld [vmem:[#allocation2 + $0x70] sm:$0xf]  ;;  %v7918_v28 = vld [vmem:[#allocation8 + $0x168] sm:$0xff]  }
 0x275   : > { %6984 = vmatmul.mubr.bf16.gmra.mrb[60].mxu0 %v6295_v5  ;;  %7148 = vmatmul.mubr.bf16.vlgmr.msra.gmra.mrb[16].mxu1 %v6409_v2  ;;  %v3149_v53 = vrot.slane %v3026_v37, 5  ;;  %v3024_v62 = vld [vmem:[#allocation2 + $0x60] sm:$0xe]  ;;  %v9116_v3 = vld [vmem:[#allocation2 + $0x7c] sm:$0xf]  ;;  %v8003_v57 = vld [vmem:[#allocation8 + $0x80] sm:$0xff]   ;;  %v3143_v4 = vsel %vm8845_vm2, %v3141_v49, %v3142_v50 }
 0x276   : > { %7003 = vmatprep.mubr.bf16.mxu0 %v6304_v56  ;;  %7180 = vmatpush3.bf16.msra.mxu1 %v7900_v32  ;;  %v3136_v32 = vsel %vm8845_vm2, %v3134_v14, %v3135_v15  ;;  %v7914_v56 = vld [vmem:[#allocation8 + $0x88] sm:$0xff]   ;;  %v6397_v27 = vrot.slane %v3021_v9, 9  ;;  %v3153_v5 = vrot.slane %v9114_v60, 5  ;;  %v7913_v2 = vld [vmem:[#allocation8 + $0x160] sm:$0xff]   ;;  %v6398_v63 = vrot.slane %v3024_v62, 9  ;;  %v7919_v36 = vld [vmem:[#allocation8 + $0x98] sm:$0xff]  }
 0x277   : > { %7151 = vmatprep.mubr.bf16.mxu1 %v6410_v13  ;;  %7181 = vmatprep.subr.bf16.mxu1 %v7903_v6  ;;  %v6412_v45 = vcombine.low %v3133_v7, %v3136_v32  ;;  %v3150_v11 = vsel %vm8845_vm2, %v3148_v58, %v3149_v53  ;;  %v3029_v12 = vld [vmem:[#allocation2 + $0x74] sm:$0x1]  ;;  %v3160_v13 = vrot.slane %v9116_v3, 5  ;;  %v1303_v0 = vld [vmem:[#allocation2 + $0x24] sm:$0xf] }
 0x278   : > { %v3140_v14 = vsel %vm8845_vm2, %v6397_v27, %v3139_v25  ;;  %v3032_v15 = vld [vmem:[#allocation2 + $0x80] sm:$0x1]  ;;  %v6307_v17 = vcombine.low %v1303_v0, %v8914_v59  ;;  %v1305_v18 = vld [vmem:[#allocation2 + $0x30] sm:$0xf]  ;;  %v3147_v23 = vsel %vm8845_vm2, %v6398_v63, %v3146_v35  ;;  %v3155_v30 = vrot.slane %v3153_v5, 4  ;;  %v7924_v0 = vld [vmem:[#allocation8 + $0xa8] sm:$0xff]  }
 0x279   : > { %v6308_v24 = vcombine.low %v1305_v18, %v8933_v38  ;;  %v3156_v32 = vrot.slane %v3029_v12, 5  ;;  %v3027_v25 = vld [vmem:[#allocation2 + $0x6c] sm:$0xe]  ;;  %v3162_v59 = vrot.slane %v3160_v13, 4  ;;  %v3163_v37 = vrot.slane %v3032_v15, 5  ;;  %v7923_v49 = vld [vmem:[#allocation8 + $0x170] sm:$0xff]  }
 0x27a   : > { %7182 = vmatpush3.bf16.msra.mxu1 %v7903_v6  ;;  %v7916_v6 = vld [vmem:[#allocation8 + $0x90] sm:$0xff]   ;;  %v9130_v34 = vld [vmem:[#allocation2 + $0x88] sm:$0xf]  ;;  %v3030_v35 = vld [vmem:[#allocation2 + $0x78] sm:$0xe]  ;;  %v6399_v38 = vrot.slane %v3027_v25, 9 }
 0x27b   : > { %7183 = vmatprep.subr.bf16.mxu1 %v7906_v22  ;;  %v3157_v7 = vsel %vm8845_vm2, %v3155_v30, %v3156_v32  ;;  %v6400_v50 = vrot.slane %v3030_v35, 9  ;;  %v1307_v58 = vld [vmem:[#allocation2 + $0x3c] sm:$0xf]  ;;  %v3038_v62 = vld [vmem:[#allocation2 + $0x98] sm:$0x1] }
 0x27c   : > { %v3154_v53 = vsel %vm8845_vm2, %v6399_v38, %v3153_v5  ;;  %v1309_v27 = vld [vmem:[#allocation2 + $0x48] sm:$0xf]  ;;  %v3033_v5 = vld [vmem:[#allocation2 + $0x84] sm:$0xe]  ;;  %v3177_v15 = vrot.slane %v3038_v62, 5 }
 0x27d   : > { %7004 = vmatmul.mubr.bf16.vlgmr.msra.gmra.mrb[32].mxu0 %v6305_v20  ;;  %7152 = vmatmul.mubr.bf16.gmra.mrb[20].mxu1 %v6411_v42  ;;  %v6414_v20 = vcombine.low %v3147_v23, %v3150_v11  ;;  %v9132_v42 = vld [vmem:[#allocation2 + $0x94] sm:$0xf]  ;;  %v9148_v18 = vld [vmem:[#allocation2 + $0xac] sm:$0xf]  ;;  %v1313_v38 = vld [vmem:[#allocation2 + $0x60] sm:$0xf] }
 0x27e   : > { %7007 = vmatprep.mubr.bf16.mxu0 %v6306_v44  ;;  %7155 = vmatprep.mubr.bf16.mxu1 %v6412_v45  ;;  %v3167_v44 = vrot.slane %v9130_v34, 5  ;;  %v7921_v45 = vld [vmem:[#allocation8 + $0xa0] sm:$0xff]   ;;  %v3174_v9 = vrot.slane %v9132_v42, 5  ;;  %v9165_v62 = vld [vmem:[#allocation2 + $0xb8] sm:$0xf] }
 0x27f   : > { %7184 = vmatpush3.bf16.msra.mxu1 %v7906_v22  ;;  %7036 = vmatpush3.bf16.msra.mxu0 %v8003_v57  ;;  %v6413_v22 = vcombine.low %v3140_v14, %v3143_v4  ;;  %v6309_v57 = vcombine.low %v1307_v58, %v8942_v51  ;;  %v6415_v4 = vcombine.low %v3154_v53, %v3157_v7  ;;  %v7927_v14 = vld [vmem:[#allocation8 + $0x178] sm:$0xff]   ;;  %v1311_v25 = vld [vmem:[#allocation2 + $0x54] sm:$0xf] }
 0x280   : > { %7185 = vmatprep.subr.bf16.mxu1 %v7909_v52  ;;  %7037 = vmatprep.subr.bf16.mxu0 %v7914_v56  ;;  %v3169_v11 = vrot.slane %v3167_v44, 4  ;;  %v3176_v51 = vrot.slane %v3174_v9, 4  ;;  %v6311_v35 = vcombine.low %v1311_v25, %v8964_v40  ;;  %v7928_v58 = vld [vmem:[#allocation8 + $0xb8] sm:$0xff]   ;;  %v9183_v25 = vld [vmem:[#allocation8 + $0xc0] sm:$0xff]  }
 0x282   : > { %v3178_v32 = vsel %vm8845_vm2, %v3176_v51, %v3177_v15  ;;  %v1317_v51 = vld [vmem:[#allocation2 + $0x78] sm:$0xf] }
 0x283   : > { %7186 = vmatpush3.bf16.msra.mxu1 %v7909_v52  ;;  %7038 = vmatpush3.bf16.msra.mxu0 %v7914_v56  ;;  %v3164_v52 = vsel %vm8845_vm2, %v3162_v59, %v3163_v37  ;;  %v3035_v56 = vld [vmem:[#allocation2 + $0x8c] sm:$0x1]  ;;  %v3044_v37 = vld [vmem:[#allocation2 + $0xb0] sm:$0x1] }
 0x284   : > { %7187 = vmatprep.subr.bf16.mxu1 %v7913_v2  ;;  %7039 = vmatprep.subr.bf16.mxu0 %v7916_v6  ;;  %v3170_v12 = vrot.slane %v3035_v56, 5  ;;  %v3191_v53 = vrot.slane %v3044_v37, 5 }
 0x285   : > { %7008 = vmatmul.mubr.bf16.gmra.mrb[36].mxu0 %v6307_v17  ;;  %7156 = vmatmul.mubr.bf16.gmra.mrb[24].mxu1 %v6413_v22  ;;  %v9146_v17 = vld [vmem:[#allocation2 + $0xa0] sm:$0xf] }
 0x286   : > { %7011 = vmatprep.mubr.bf16.mxu0 %v6308_v24  ;;  %7159 = vmatprep.mubr.bf16.mxu1 %v6414_v20  ;;  %v3171_v22 = vsel %vm8845_vm2, %v3169_v11, %v3170_v12  ;;  %v3181_v23 = vrot.slane %v9146_v17, 5  ;;  %v7926_v24 = vld [vmem:[#allocation8 + $0xb0] sm:$0xff]   ;;  %v9153_v20 = vld [vmem:[#allocation8 + $0x180] sm:$0xff]   ;;  %v3047_v11 = vld [vmem:[#allocation2 + $0xbc] sm:$0x1] }
 0x287   : > { %7188 = vmatpush3.bf16.msra.mxu1 %v7913_v2  ;;  %7040 = vmatpush3.bf16.msra.mxu0 %v7916_v6  ;;  %v3161_v2 = vsel %vm8845_vm2, %v6400_v50, %v3160_v13  ;;  %v6310_v6 = vcombine.low %v1309_v27, %v8959_v31  ;;  %v3036_v13 = vld [vmem:[#allocation2 + $0x90] sm:$0xe]  ;;  %v6401_v31 = vrot.slane %v3033_v5, 9 }
 0x288   : > { %7189 = vmatprep.subr.bf16.mxu1 %v7918_v28  ;;  %7041 = vmatprep.subr.bf16.mxu0 %v7919_v36  ;;  %v6416_v63 = vcombine.low %v3161_v2, %v3164_v52  ;;  %v6402_v30 = vrot.slane %v3036_v13, 9  ;;  %v3183_v52 = vrot.slane %v3181_v23, 4  ;;  %v1315_v2 = vld [vmem:[#allocation2 + $0x6c] sm:$0xf] }
 0x289   : > { %v3168_v59 = vsel %vm8845_vm2, %v6401_v31, %v3167_v44  ;;  %v3039_v44 = vld [vmem:[#allocation2 + $0x9c] sm:$0xe]  ;;  %v6313_v5 = vcombine.low %v1315_v2, %v8993_v47  ;;  %v3045_v31 = vld [vmem:[#allocation2 + $0xb4] sm:$0xe] }
 0x28a   : > { %v6417_v7 = vcombine.low %v3168_v59, %v3171_v22  ;;  %v6314_v22 = vcombine.low %v1317_v51, %v9012_v26  ;;  %v3053_v59 = vld [vmem:[#allocation2 + $0xd4] sm:$0x1]  ;;  %v1319_v26 = vld [vmem:[#allocation2 + $0x84] sm:$0xf]  ;;  %v6405_v37 = vrot.slane %v3045_v31, 9 }
 0x28b   : > { %7190 = vmatpush3.bf16.msra.mxu1 %v7918_v28  ;;  %7042 = vmatpush3.bf16.msra.mxu0 %v7919_v36  ;;  %v3041_v28 = vld [vmem:[#allocation2 + $0xa4] sm:$0x1]  ;;  %v3188_v36 = vrot.slane %v9148_v18, 5  ;;  %v3212_v2 = vrot.slane %v3053_v59, 5 }
 0x28c   : > { %7043 = vmatprep.subr.bf16.mxu0 %v7921_v45  ;;  %7191 = vmatprep.subr.bf16.mxu1 %v7923_v49  ;;  %v3184_v56 = vrot.slane %v3041_v28, 5  ;;  %v9181_v28 = vld [vmem:[#allocation2 + $0xd0] sm:$0xf] }
 0x28d   : > { %7012 = vmatmul.mubr.bf16.gmra.mrb[40].mxu0 %v6309_v57  ;;  %7160 = vmatmul.mubr.bf16.gmra.mrb[28].mxu1 %v6415_v4  ;;  %v3190_v40 = vrot.slane %v3188_v36, 4  ;;  %v9167_v57 = vld [vmem:[#allocation2 + $0xc4] sm:$0xf]  ;;  %v3195_v4 = vrot.slane %v9165_v62, 5 }
 0x28e   : > { %7015 = vmatprep.mubr.bf16.mxu0 %v6310_v6  ;;  %7163 = vmatprep.mubr.bf16.mxu1 %v6416_v63  ;;  %v3185_v27 = vsel %vm8845_vm2, %v3183_v52, %v3184_v56  ;;  %v3202_v12 = vrot.slane %v9167_v57, 5  ;;  %v3537_v56 = vld [vmem:[#allocation2 + $0x20] sm:$0x3] }
 0x28f   : > { %7044 = vmatpush3.bf16.msra.mxu0 %v7921_v45  ;;  %7192 = vmatpush3.bf16.msra.mxu1 %v7923_v49  ;;  %v3175_v45 = vsel %vm8845_vm2, %v6402_v30, %v3174_v9  ;;  %v6312_v49 = vcombine.low %v1313_v38, %v8983_v21  ;;  %v3042_v9 = vld [vmem:[#allocation2 + $0xa8] sm:$0xe]  ;;  %v6403_v21 = vrot.slane %v3039_v44, 9  ;;  %v3192_v63 = vsel %vm8845_vm2, %v3190_v40, %v3191_v53  ;;  %v3051_v53 = vld [vmem:[#allocation2 + $0xcc] sm:$0xe] }
 0x290   : > { %7045 = vmatprep.subr.bf16.mxu0 %v7924_v0  ;;  %7193 = vmatprep.subr.bf16.mxu1 %v7927_v14  ;;  %v6418_v50 = vcombine.low %v3175_v45, %v3178_v32  ;;  %v6404_v6 = vrot.slane %v3042_v9, 9  ;;  %v3197_v30 = vrot.slane %v3195_v4, 4  ;;  %v3198_v32 = vrot.slane %v3047_v11, 5  ;;  %v2119_v11 = vld [vmem:[#allocation2] sm:$0xc] }
 0x291   : > { %v3204_v47 = vrot.slane %v3202_v12, 4  ;;  %v3209_v38 = vrot.slane %v9181_v28, 5  ;;  %v3196_v52 = vsel %vm8845_vm2, %v6405_v37, %v3195_v4  ;;  %v1323_v4 = vld [vmem:[#allocation2 + $0x9c] sm:$0xf]  ;;  %v3538_v37 = vld [vmem:[#allocation2 + $0x24] sm:$0xc] }
 0x292   : > { %v3189_v13 = vsel %vm8845_vm2, %v6404_v6, %v3188_v36  ;;  %v3048_v36 = vld [vmem:[#allocation2 + $0xc0] sm:$0xe]  ;;  %v6317_v31 = vcombine.low %v1323_v4, %v9032_v10  ;;  %v2123_v4 = vld [vmem:[#allocation2 + $0x18] sm:$0xc] }
 0x293   : > { %7046 = vmatpush3.bf16.msra.mxu0 %v7924_v0  ;;  %7194 = vmatpush3.bf16.msra.mxu1 %v7927_v14  ;;  %v3182_v0 = vsel %vm8845_vm2, %v6403_v21, %v3181_v23  ;;  %v3050_v14 = vld [vmem:[#allocation2 + $0xc8] sm:$0x1] }
 0x294   : > { %7047 = vmatprep.subr.bf16.mxu0 %v7926_v24  ;;  %7227 = vmatprep.subr.bf16.mxu1 %v9153_v20  ;;  %v6419_v15 = vcombine.low %v3182_v0, %v3185_v27  ;;  %v3205_v23 = vrot.slane %v3050_v14, 5  ;;  %v3211_v27 = vrot.slane %v3209_v38, 4  ;;  %v1325_v0 = vld [vmem:[#allocation2 + $0xa8] sm:$0xf]  ;;  %v2188_v14 = vrot.slane %v9084_v55, 6 }
 0x295   : > { %7016 = vmatmul.mubr.bf16.gmra.mrb[44].mxu0 %v6311_v35  ;;  %7164 = vmatmul.mubr.bf16.gmra.mrb[0].mxu1 %v6417_v7  ;;  %v3199_v35 = vsel %vm8845_vm2, %v3197_v30, %v3198_v32  ;;  %v6406_v7 = vrot.slane %v3048_v36, 9  ;;  %v6318_v30 = vcombine.low %v1325_v0, %v9043_v33  ;;  %v3616_v36 = vrot.slane %v9063_v8, 6  ;;  %v2124_v8 = vld [vmem:[#allocation2 + $0x20] sm:$0x3] }
 0x296   : > { %7019 = vmatprep.mubr.bf16.mxu0 %v6312_v49  ;;  %7167 = vmatprep.mubr.bf16.mxu1 %v6418_v50  ;;  %v3206_v45 = vsel %vm8845_vm2, %v3204_v47, %v3205_v23  ;;  %v3602_v49 = vrot.slane %v9053_v54, 6  ;;  %v1321_v50 = vld [vmem:[#allocation2 + $0x90] sm:$0xf]  ;;  %v6421_v44 = vcombine.low %v3196_v52, %v3199_v35  ;;  %v3536_v54 = vld [vmem:[#allocation2 + $0x18] sm:$0xc]  ;;  %v6328_v47 = vrot.slane %v2119_v11, 10 }
 0x297   : > { %7048 = vmatpush3.bf16.msra.mxu0 %v7926_v24  ;;  %v6420_v24 = vcombine.low %v3189_v13, %v3192_v63  ;;  %v3203_v40 = vsel %vm8845_vm2, %v6406_v7, %v3202_v12  ;;  %v6316_v9 = vcombine.low %v1321_v50, %v9028_v1  ;;  %v3605_v63 = vrot.slane %v3537_v56, 6  ;;  %v3539_v12 = vld [vmem:[#allocation2 + $0x2c] sm:$0x3]  ;;  %v2122_v23 = vld [vmem:[#allocation2 + $0x14] sm:$0x3] }
 0x298   : > { %7049 = vmatprep.subr.bf16.mxu0 %v7928_v58  ;;  %v6422_v21 = vcombine.low %v3203_v40, %v3206_v45  ;;  %v3604_v6 = vrot.slane %v3602_v49, 4  ;;  %v3213_v1 = vsel %vm8845_vm2, %v3211_v27, %v3212_v2  ;;  %v3609_v13 = vrot.slane %v9055_v61, 6  ;;  %v1327_v52 = vld [vmem:[#allocation2 + $0xb4] sm:$0xf] }
 0x299   : > { %v2195_v7 = vrot.slane %v9103_v29, 6  ;;  %v3612_v50 = vrot.slane %v3539_v12, 6  ;;  %v3618_v56 = vrot.slane %v3616_v36, 4  ;;  %v2198_v40 = vrot.slane %v2122_v23, 6  ;;  %v8005_v29 = vld [vmem:[#allocation2 + $0x1c] sm:$0xf] }
 0x29a   : > { %v3606_v55 = vsel %vm9203_vm8, %v3604_v6, %v3605_v63  ;;  %v3611_v45 = vrot.slane %v3609_v13, 4  ;;  %v6433_v27 = vrot.slane %v3538_v37, 10  ;;  %v3545_v6 = vld [vmem:[#allocation2 + $0x50] sm:$0x3]  ;;  %v6319_v63 = vcombine.low %v1327_v52, %v9047_v46 }
 0x29b   : > { %7050 = vmatpush3.bf16.msra.mxu0 %v7928_v58  ;;  %v6315_v58 = vcombine.low %v1319_v26, %v9023_v48  ;;  %v2120_v48 = vld [vmem:[#allocation2 + $0x8] sm:$0x3]  ;;  %v2190_v26 = vrot.slane %v2188_v14, 4  ;;  %v3630_v11 = vrot.slane %v9077_v43, 6  ;;  %v3633_v23 = vrot.slane %v3545_v6, 6 }
 0x29c   : > { %7083 = vmatprep.subr.bf16.mxu0 %v9183_v25  ;;  %v2191_v10 = vrot.slane %v2120_v48, 6  ;;  %v3613_v2 = vsel %vm9203_vm8, %v3611_v45, %v3612_v50  ;;  %v3610_v0 = vsel %vm9203_vm8, %v6433_v27, %v3609_v13  ;;  %v7931_v45 = vld [vmem:[#allocation8 + $0x190] sm:$0xff]   ;;  %v3637_v52 = vrot.slane %v9096_v16, 6  ;;  %v2127_v27 = vld [vmem:[#allocation2 + $0x30] sm:$0xc] }
 0x29d   : > { %7020 = vmatmul.mubr.bf16.gmra.mrb[48].mxu0 %v6313_v5  ;;  %7168 = vmatmul.mubr.bf16.gmra.mrb[4].mxu1 %v6419_v15  ;;  %v6407_v5 = vrot.slane %v3051_v53, 9  ;;  %v2121_v15 = vld [vmem:[#allocation2 + $0xc] sm:$0xc]  ;;  %v2202_v53 = vrot.slane %v8005_v29, 6 }
 0x29e   : > { %7023 = vmatprep.mubr.bf16.mxu0 %v6314_v22  ;;  %7171 = vmatprep.mubr.bf16.mxu1 %v6420_v24  ;;  %v6432_v22 = vrot.slane %v3536_v54, 10  ;;  %v3541_v24 = vld [vmem:[#allocation2 + $0x38] sm:$0x3]  ;;  %v6329_v33 = vrot.slane %v2121_v15, 10  ;;  %v3623_v54 = vrot.slane %v9075_v39, 6  ;;  %v2205_v39 = vrot.slane %v2124_v8, 6 }
 0x29f   : > { %v3210_v32 = vsel %vm8845_vm2, %v6407_v5, %v3209_v38  ;;  %v3540_v38 = vld [vmem:[#allocation2 + $0x30] sm:$0xc]  ;;  %v7930_v5 = vld [vmem:[#allocation8 + $0x188] sm:$0xff]   ;;  %v2204_v15 = vrot.slane %v2202_v53, 4 }
 0x2a0   : > { %v6423_v59 = vcombine.low %v3210_v32, %v3213_v1  ;;  %v3603_v61 = vsel %vm9203_vm8, %v6432_v22, %v3602_v49  ;;  %v2189_v49 = vsel %vm9203_vm8, %v6328_v47, %v2188_v14  ;;  %v6434_v14 = vrot.slane %v3540_v38, 10  ;;  %v3542_v22 = vld [vmem:[#allocation2 + $0x3c] sm:$0xc] }
 0x2a1   : > { %v6448_v35 = vcombine.low %v3603_v61, %v3606_v55  ;;  %v2196_v1 = vsel %vm9203_vm8, %v6329_v33, %v2195_v7  ;;  %v2125_v55 = vld [vmem:[#allocation2 + $0x24] sm:$0xc]  ;;  %v3625_v13 = vrot.slane %v3623_v54, 4  ;;  %v3632_v47 = vrot.slane %v3630_v11, 4  ;;  %v8006_v61 = vld [vmem:[#allocation2 + $0x28] sm:$0xf] }
 0x2a2   : > { %v3617_v43 = vsel %vm9203_vm8, %v6434_v14, %v3616_v36  ;;  %v2206_v37 = vsel %vm9203_vm8, %v2204_v15, %v2205_v39  ;;  %v2126_v36 = vld [vmem:[#allocation2 + $0x2c] sm:$0x3]  ;;  %v2128_v33 = vld [vmem:[#allocation2 + $0x38] sm:$0x3]  ;;  %v6435_v38 = vrot.slane %v3542_v22, 10  ;;  %v6331_v8 = vrot.slane %v2125_v55, 10 }
 0x2a3   : > { %v2219_v6 = vrot.slane %v2128_v33, 6  ;;  %v3639_v14 = vrot.slane %v3637_v52, 4 }
 0x2a5   : > { %7024 = vmatmul.mubr.bf16.gmra.mrb[52].mxu0 %v6315_v58  ;;  %7172 = vmatmul.mubr.bf16.gmra.mrb[8].mxu1 %v6421_v44  ;;  %v3619_v58 = vrot.slane %v3541_v24, 6  ;;  %v2192_v44 = vsel %vm9203_vm8, %v2190_v26, %v2191_v10  ;;  %v2209_v26 = vrot.slane %v8006_v61, 6  ;;  %v7933_v61 = vld [vmem:[#allocation8 + $0x1a0] sm:$0xff]  }
 0x2a6   : > { %7027 = vmatprep.mubr.bf16.mxu0 %v6316_v9  ;;  %7175 = vmatprep.mubr.bf16.mxu1 %v6422_v21  ;;  %v3543_v9 = vld [vmem:[#allocation2 + $0x44] sm:$0x3]  ;;  %v2197_v21 = vrot.slane %v2195_v7, 4  ;;  %v6344_v48 = vcombine.low %v2189_v49, %v2192_v44  ;;  %v3547_v49 = vld [vmem:[#allocation2 + $0x5c] sm:$0x3]  ;;  %v3644_v44 = vrot.slane %v9098_v19, 6 }
 0x2a7   : > { %v3620_v12 = vsel %vm9203_vm8, %v3618_v56, %v3619_v58  ;;  %v3626_v24 = vrot.slane %v3543_v9, 6  ;;  %v3634_v58 = vsel %vm9203_vm8, %v3632_v47, %v3633_v23  ;;  %v2211_v29 = vrot.slane %v2209_v26, 4 }
 0x2a8   : > { %v2199_v46 = vsel %vm9203_vm8, %v2197_v21, %v2198_v40  ;;  %v6450_v32 = vcombine.low %v3617_v43, %v3620_v12  ;;  %v2212_v9 = vrot.slane %v2126_v36, 6  ;;  %v3549_v21 = vld [vmem:[#allocation2 + $0x68] sm:$0x3]  ;;  %v3640_v12 = vrot.slane %v3547_v49, 6  ;;  %v2129_v43 = vld [vmem:[#allocation2 + $0x3c] sm:$0xc] }
 0x2a9   : > { %v6345_v10 = vcombine.low %v2196_v1, %v2199_v46  ;;  %v7932_v1 = vld [vmem:[#allocation8 + $0x198] sm:$0xff]   ;;  %v3647_v15 = vrot.slane %v3549_v21, 6  ;;  %v2210_v39 = vsel %vm9203_vm8, %v6331_v8, %v2209_v26  ;;  %v8010_v26 = vld [vmem:[#allocation8 + $0xc8] sm:$0xff]   ;;  %v3551_v36 = vld [vmem:[#allocation2 + $0x74] sm:$0x3]  ;;  %v6333_v33 = vrot.slane %v2129_v43, 10 }
 0x2aa   : > { %v2213_v22 = vsel %vm9203_vm8, %v2211_v29, %v2212_v9  ;;  %v3641_v23 = vsel %vm9203_vm8, %v3639_v14, %v3640_v12  ;;  %v2131_v8 = vld [vmem:[#allocation2 + $0x48] sm:$0xc]  ;;  %v7934_v21 = vld [vmem:[#allocation8 + $0x1a8] sm:$0xff]  }
 0x2ab   : > { %v3552_v14 = vld [vmem:[#allocation2 + $0x78] sm:$0xc] }
 0x2ad   : > { %7028 = vmatmul.mubr.bf16.gmra.mrb[56].mxu0 %v6317_v31  ;;  %7176 = vmatmul.mubr.bf16.gmra.mrb[12].mxu1 %v6423_v59  ;;  %v6449_v31 = vcombine.low %v3610_v0, %v3613_v2  ;;  %v6330_v59 = vrot.slane %v2123_v4, 10  ;;  %v9252_v0 = vld [vmem:[#allocation2 + $0x40] sm:$0xf] }
 0x2ae   : > { %7031 = vmatprep.mubr.bf16.mxu0 %v6318_v30  ;;  %7195 = vmatprep.mubr.bf16.mxu1 %v6448_v35  ;;  %v3544_v30 = vld [vmem:[#allocation2 + $0x48] sm:$0xc]  ;;  %v8007_v35 = vld [vmem:[#allocation2 + $0x34] sm:$0xf]  ;;  %v2223_v19 = vrot.slane %v9252_v0, 6 }
 0x2af   : > { %v2216_v7 = vrot.slane %v8007_v35, 6  ;;  %v2203_v50 = vsel %vm9203_vm8, %v6330_v59, %v2202_v53  ;;  %v6436_v56 = vrot.slane %v3544_v30, 10  ;;  %v3624_v53 = vsel %vm9203_vm8, %v6435_v38, %v3623_v54  ;;  %v3546_v54 = vld [vmem:[#allocation2 + $0x54] sm:$0xc] }
 0x2b0   : > { %v6346_v40 = vcombine.low %v2203_v50, %v2206_v37  ;;  %v2225_v30 = vrot.slane %v2223_v19, 4  ;;  %v6437_v47 = vrot.slane %v3546_v54, 10  ;;  %v3651_v59 = vrot.slane %v9114_v60, 6  ;;  %v2134_v54 = vld [vmem:[#allocation2 + $0x5c] sm:$0x3] }
 0x2b1   : > { %v2218_v2 = vrot.slane %v2216_v7, 4  ;;  %v3658_v35 = vrot.slane %v9116_v3, 6  ;;  %v9312_v60 = vld [vmem:[#allocation2 + $0x70] sm:$0xf]  ;;  %v3554_v3 = vld [vmem:[#allocation2 + $0x84] sm:$0xc] }
 0x2b2   : > { %v3638_v38 = vsel %vm9203_vm8, %v6437_v47, %v3637_v52  ;;  %v3653_v9 = vrot.slane %v3651_v59, 4  ;;  %v8011_v52 = vld [vmem:[#allocation8 + $0xd0] sm:$0xff]  }
 0x2b3   : > { %v2220_v46 = vsel %vm9203_vm8, %v2218_v2, %v2219_v6  ;;  %v6453_v49 = vcombine.low %v3638_v38, %v3641_v23  ;;  %v2224_v6 = vsel %vm9203_vm8, %v6333_v33, %v2223_v19  ;;  %v2136_v19 = vld [vmem:[#allocation2 + $0x68] sm:$0x3]  ;;  %v2240_v23 = vrot.slane %v2134_v54, 6 }
 0x2b5   : > { %7032 = vmatmul.mubr.bf16.gmra.mrb[60].mxu0 %v6319_v63  ;;  %7196 = vmatmul.mubr.bf16.vlgmr.msra.gmra.mrb[16].mxu1 %v6449_v31  ;;  %v3631_v63 = vsel %vm9203_vm8, %v6436_v56, %v3630_v11  ;;  %v6332_v11 = vrot.slane %v2127_v27, 10  ;;  %v3548_v31 = vld [vmem:[#allocation2 + $0x60] sm:$0xc]  ;;  %v3550_v27 = vld [vmem:[#allocation2 + $0x6c] sm:$0xc] }
 0x2b6   : > { %7051 = vmatprep.mubr.bf16.mxu0 %v6344_v48  ;;  %7228 = vmatpush3.bf16.msra.mxu1 %v9153_v20  ;;  %v3627_v20 = vsel %vm9203_vm8, %v3625_v13, %v3626_v24  ;;  %v6452_v4 = vcombine.low %v3631_v63, %v3634_v58  ;;  %v2130_v48 = vld [vmem:[#allocation2 + $0x44] sm:$0x3]  ;;  %v8009_v13 = vld [vmem:[#allocation2 + $0x4c] sm:$0xf]  ;;  %v6438_v37 = vrot.slane %v3548_v31, 10  ;;  %v3665_v31 = vrot.slane %v9130_v34, 6 }
 0x2b7   : > { %7199 = vmatprep.mubr.bf16.mxu1 %v6450_v32  ;;  %7229 = vmatprep.subr.bf16.mxu1 %v7930_v5  ;;  %v6451_v16 = vcombine.low %v3624_v53, %v3627_v20  ;;  %v2226_v55 = vrot.slane %v2130_v48, 6  ;;  %v2230_v24 = vrot.slane %v8009_v13, 6  ;;  %v2132_v32 = vld [vmem:[#allocation2 + $0x50] sm:$0x3]  ;;  %v3553_v20 = vld [vmem:[#allocation2 + $0x80] sm:$0x3] }
 0x2b8   : > { %v2233_v58 = vrot.slane %v2132_v32, 6  ;;  %v3654_v53 = vrot.slane %v3551_v36, 6  ;;  %v3661_v2 = vrot.slane %v3553_v20, 6  ;;  %v2133_v63 = vld [vmem:[#allocation2 + $0x54] sm:$0xc]  ;;  %v3672_v32 = vrot.slane %v9132_v42, 6 }
 0x2b9   : > { %v2232_v56 = vrot.slane %v2230_v24, 4  ;;  %v6335_v43 = vrot.slane %v2133_v63, 10  ;;  %v3667_v33 = vrot.slane %v3665_v31, 4  ;;  %v8016_v20 = vld [vmem:[#allocation8 + $0xe0] sm:$0xff]   ;;  %v8018_v63 = vld [vmem:[#allocation2 + $0x7c] sm:$0xf] }
 0x2ba   : > { %7230 = vmatpush3.bf16.msra.mxu1 %v7930_v5  ;;  %v3646_v5 = vrot.slane %v3644_v44, 4  ;;  %v8019_v34 = vld [vmem:[#allocation8 + $0xf0] sm:$0xff]  }
 0x2bb   : > { %7231 = vmatprep.subr.bf16.mxu1 %v7931_v45 }
 0x2bd   : > { %7052 = vmatmul.mubr.bf16.vlgmr.msra.gmra.mrb[32].mxu0 %v6345_v10  ;;  %7200 = vmatmul.mubr.bf16.gmra.mrb[20].mxu1 %v6451_v16  ;;  %v2217_v10 = vsel %vm9203_vm8, %v6332_v11, %v2216_v7  ;;  %v3645_v7 = vsel %vm9203_vm8, %v6438_v37, %v3644_v44  ;;  %v3660_v44 = vrot.slane %v3658_v35, 4  ;;  %v6334_v16 = vrot.slane %v2131_v8, 10  ;;  %v7937_v8 = vld [vmem:[#allocation8 + $0x1b8] sm:$0xff]  }
 0x2be   : > { %7055 = vmatprep.mubr.bf16.mxu0 %v6346_v40  ;;  %7203 = vmatprep.mubr.bf16.mxu1 %v6452_v4  ;;  %v6348_v50 = vcombine.low %v2217_v10, %v2220_v46  ;;  %v9278_v40 = vsel %vm9203_vm8, %v2225_v30, %v2226_v55  ;;  %v8012_v4 = vld [vmem:[#allocation2 + $0x58] sm:$0xf]  ;;  %v3655_v11 = vsel %vm9203_vm8, %v3653_v9, %v3654_v53  ;;  %v7935_v46 = vld [vmem:[#allocation8 + $0x1b0] sm:$0xff]   ;;  %v6440_v55 = vrot.slane %v3552_v14, 10  ;;  %v3555_v30 = vld [vmem:[#allocation2 + $0x8c] sm:$0x3] }
 0x2bf   : > { %7232 = vmatpush3.bf16.msra.mxu1 %v7931_v45  ;;  %7084 = vmatpush3.bf16.msra.mxu0 %v9183_v25  ;;  %v3648_v25 = vsel %vm9203_vm8, %v3646_v5, %v3647_v15  ;;  %v6347_v45 = vcombine.low %v2210_v39, %v2213_v22  ;;  %v2237_v48 = vrot.slane %v8012_v4, 6  ;;  %v6349_v12 = vcombine.low %v2224_v6, %v9278_v40  ;;  %v9291_v5 = vld [vmem:[#allocation2 + $0x64] sm:$0xf]  ;;  %v8014_v22 = vld [vmem:[#allocation8 + $0xd8] sm:$0xff]   ;;  %v2135_v10 = vld [vmem:[#allocation2 + $0x60] sm:$0xc] }
 0x2c0   : > { %7233 = vmatprep.subr.bf16.mxu1 %v7932_v1  ;;  %7085 = vmatprep.subr.bf16.mxu0 %v8010_v26  ;;  %v6454_v29 = vcombine.low %v3645_v7, %v3648_v25  ;;  %v2244_v15 = vrot.slane %v9291_v5, 6  ;;  %v2231_v0 = vsel %vm9203_vm8, %v6334_v16, %v2230_v24  ;;  %v6439_v39 = vrot.slane %v3550_v27, 10  ;;  %v2137_v9 = vld [vmem:[#allocation2 + $0x6c] sm:$0xc]  ;;  %v8017_v6 = vld [vmem:[#allocation8 + $0xe8] sm:$0xff]   ;;  %v9328_v16 = vld [vmem:[#allocation8 + $0x1c0] sm:$0xff]  }
 0x2c1   : > { %v3662_v13 = vsel %vm9203_vm8, %v3660_v44, %v3661_v2  ;;  %v2239_v47 = vrot.slane %v2237_v48, 4  ;;  %v2247_v25 = vrot.slane %v2136_v19, 6  ;;  %v3659_v42 = vsel %vm9203_vm8, %v6440_v55, %v3658_v35 }
 0x2c2   : > { %v2246_v37 = vrot.slane %v2244_v15, 4  ;;  %v3668_v38 = vrot.slane %v3555_v30, 6  ;;  %v3674_v35 = vrot.slane %v3672_v32, 4  ;;  %v6336_v40 = vrot.slane %v2135_v10, 10 }
 0x2c3   : > { %7234 = vmatpush3.bf16.msra.mxu1 %v7932_v1  ;;  %7086 = vmatpush3.bf16.msra.mxu0 %v8010_v26  ;;  %v2234_v1 = vsel %vm9203_vm8, %v2232_v56, %v2233_v58  ;;  %v3557_v26 = vld [vmem:[#allocation2 + $0x98] sm:$0x3]  ;;  %v2238_v58 = vsel %vm9203_vm8, %v6335_v43, %v2237_v48  ;;  %v2241_v7 = vsel %vm9203_vm8, %v2239_v47, %v2240_v23  ;;  %v6441_v27 = vrot.slane %v3554_v3, 10  ;;  %v8020_v23 = vld [vmem:[#allocation2 + $0x88] sm:$0xf] }
 0x2c4   : > { %7235 = vmatprep.subr.bf16.mxu1 %v7933_v61  ;;  %7087 = vmatprep.subr.bf16.mxu0 %v8011_v52  ;;  %v6350_v24 = vcombine.low %v2231_v0, %v2234_v1  ;;  %v3675_v56 = vrot.slane %v3557_v26, 6  ;;  %v3669_v44 = vsel %vm9203_vm8, %v3667_v33, %v3668_v38  ;;  %v3679_v2 = vrot.slane %v9146_v17, 6  ;;  %v3560_v26 = vld [vmem:[#allocation2 + $0xa8] sm:$0xc]  ;;  %v3562_v17 = vld [vmem:[#allocation2 + $0xb4] sm:$0xc] }
 0x2c5   : > { %7056 = vmatmul.mubr.bf16.gmra.mrb[36].mxu0 %v6347_v45  ;;  %7204 = vmatmul.mubr.bf16.gmra.mrb[24].mxu1 %v6453_v49  ;;  %v6456_v45 = vcombine.low %v3659_v42, %v3662_v13  ;;  %v3556_v49 = vld [vmem:[#allocation2 + $0x90] sm:$0xc]  ;;  %v2258_v4 = vrot.slane %v8018_v63, 6  ;;  %v3686_v1 = vrot.slane %v9148_v18, 6  ;;  %v6351_v54 = vcombine.low %v2238_v58, %v2241_v7  ;;  %v2139_v18 = vld [vmem:[#allocation2 + $0x78] sm:$0xc] }
 0x2c6   : > { %7059 = vmatprep.mubr.bf16.mxu0 %v6348_v50  ;;  %7207 = vmatprep.mubr.bf16.mxu1 %v6454_v29  ;;  %v2138_v50 = vld [vmem:[#allocation2 + $0x74] sm:$0x3]  ;;  %v2248_v29 = vsel %vm9203_vm8, %v2246_v37, %v2247_v25  ;;  %v6442_v48 = vrot.slane %v3556_v49, 10  ;;  %v3676_v14 = vsel %vm9203_vm8, %v3674_v35, %v3675_v56  ;;  %v2245_v0 = vsel %vm9203_vm8, %v6336_v40, %v2244_v15  ;;  %v2142_v25 = vld [vmem:[#allocation2 + $0x8c] sm:$0x3] }
 0x2c7   : > { %7236 = vmatpush3.bf16.msra.mxu1 %v7933_v61  ;;  %7088 = vmatpush3.bf16.msra.mxu0 %v8011_v52  ;;  %v3652_v61 = vsel %vm9203_vm8, %v6439_v39, %v3651_v59  ;;  %v2251_v59 = vrot.slane %v9312_v60, 6  ;;  %v2254_v53 = vrot.slane %v2138_v50, 6  ;;  %v3666_v19 = vsel %vm9203_vm8, %v6441_v27, %v3665_v31  ;;  %v3561_v39 = vld [vmem:[#allocation2 + $0xb0] sm:$0x3]  ;;  %v2144_v50 = vld [vmem:[#allocation2 + $0x98] sm:$0x3] }
 0x2c8   : > { %7237 = vmatprep.subr.bf16.mxu1 %v7934_v21  ;;  %7089 = vmatprep.subr.bf16.mxu0 %v8014_v22  ;;  %v6455_v36 = vcombine.low %v3652_v61, %v3655_v11  ;;  %v6352_v11 = vcombine.low %v2245_v0, %v2248_v29  ;;  %v3673_v43 = vsel %vm9203_vm8, %v6442_v48, %v3672_v32  ;;  %v3681_v15 = vrot.slane %v3679_v2, 4  ;;  %v3558_v32 = vld [vmem:[#allocation2 + $0x9c] sm:$0xc]  ;;  %v3563_v35 = vld [vmem:[#allocation2 + $0xbc] sm:$0x3] }
 0x2c9   : > { %v2253_v52 = vrot.slane %v2251_v59, 4  ;;  %v6458_v5 = vcombine.low %v3673_v43, %v3676_v14  ;;  %v2260_v30 = vrot.slane %v2258_v4, 4  ;;  %v3689_v47 = vrot.slane %v3561_v39, 6  ;;  %v3565_v40 = vld [vmem:[#allocation2 + $0xc8] sm:$0x3] }
 0x2ca   : > { %v2265_v61 = vrot.slane %v8020_v23, 6  ;;  %v6338_v37 = vrot.slane %v2139_v18, 10  ;;  %v6443_v33 = vrot.slane %v3558_v32, 10  ;;  %v6444_v3 = vrot.slane %v3560_v26, 10  ;;  %v2143_v27 = vld [vmem:[#allocation2 + $0x90] sm:$0xc] }
 0x2cb   : > { %7238 = vmatpush3.bf16.msra.mxu1 %v7934_v21  ;;  %7090 = vmatpush3.bf16.msra.mxu0 %v8014_v22  ;;  %v2140_v21 = vld [vmem:[#allocation2 + $0x80] sm:$0x3]  ;;  %v6337_v22 = vrot.slane %v2137_v9, 10  ;;  %v2255_v31 = vsel %vm9203_vm8, %v2253_v52, %v2254_v53  ;;  %v3700_v56 = vrot.slane %v9167_v57, 6  ;;  %v2268_v7 = vrot.slane %v2142_v25, 6 }
 0x2cc   : > { %7091 = vmatprep.subr.bf16.mxu0 %v8016_v20  ;;  %7239 = vmatprep.subr.bf16.mxu1 %v7935_v46  ;;  %v2261_v55 = vrot.slane %v2140_v21, 6  ;;  %v2259_v58 = vsel %vm9203_vm8, %v6338_v37, %v2258_v4  ;;  %v2267_v49 = vrot.slane %v2265_v61, 4  ;;  %v2275_v9 = vrot.slane %v2144_v50, 6  ;;  %v2141_v57 = vld [vmem:[#allocation2 + $0x84] sm:$0xc] }
 0x2cd   : > { %7060 = vmatmul.mubr.bf16.gmra.mrb[40].mxu0 %v6349_v12  ;;  %7208 = vmatmul.mubr.bf16.gmra.mrb[28].mxu1 %v6455_v36  ;;  %v3559_v12 = vld [vmem:[#allocation2 + $0xa4] sm:$0x3]  ;;  %v2252_v10 = vsel %vm9203_vm8, %v6337_v22, %v2251_v59  ;;  %v8021_v36 = vld [vmem:[#allocation2 + $0x94] sm:$0xf]  ;;  %v3687_v52 = vsel %vm9203_vm8, %v6444_v3, %v3686_v1  ;;  %v3696_v63 = vrot.slane %v3563_v35, 6  ;;  %v3702_v4 = vrot.slane %v3700_v56, 4 }
 0x2ce   : > { %7063 = vmatprep.mubr.bf16.mxu0 %v6350_v24  ;;  %7211 = vmatprep.mubr.bf16.mxu1 %v6456_v45  ;;  %v3682_v13 = vrot.slane %v3559_v12, 6  ;;  %v3688_v24 = vrot.slane %v3686_v1, 4  ;;  %v2272_v42 = vrot.slane %v8021_v36, 6  ;;  %v6353_v45 = vcombine.low %v2252_v10, %v2255_v31  ;;  %v2146_v0 = vld [vmem:[#allocation2 + $0xa4] sm:$0x3] }
 0x2cf   : > { %7092 = vmatpush3.bf16.msra.mxu0 %v8016_v20  ;;  %7240 = vmatpush3.bf16.msra.mxu1 %v7935_v46  ;;  %v6457_v46 = vcombine.low %v3666_v19, %v3669_v44  ;;  %v3693_v20 = vrot.slane %v9165_v62, 6  ;;  %v2262_v60 = vsel %vm9203_vm8, %v2260_v30, %v2261_v55  ;;  %v3680_v62 = vsel %vm9203_vm8, %v6443_v33, %v3679_v2  ;;  %v3564_v2 = vld [vmem:[#allocation2 + $0xc0] sm:$0xc]  ;;  %v8024_v18 = vld [vmem:[#allocation2 + $0xac] sm:$0xf] }
 0x2d0   : > { %7093 = vmatprep.subr.bf16.mxu0 %v8017_v6  ;;  %7241 = vmatprep.subr.bf16.mxu1 %v7937_v8  ;;  %v3683_v38 = vsel %vm9203_vm8, %v3681_v15, %v3682_v13  ;;  %v3690_v59 = vsel %vm9203_vm8, %v3688_v24, %v3689_v47  ;;  %v2274_v29 = vrot.slane %v2272_v42, 4  ;;  %v6354_v21 = vcombine.low %v2259_v58, %v2262_v60  ;;  %v8023_v19 = vld [vmem:[#allocation2 + $0xa0] sm:$0xf]  ;;  %v3567_v13 = vld [vmem:[#allocation2 + $0xd4] sm:$0x3] }
 0x2d1   : > { %v6459_v53 = vcombine.low %v3680_v62, %v3683_v38  ;;  %v6460_v44 = vcombine.low %v3687_v52, %v3690_v59  ;;  %v3703_v48 = vrot.slane %v3565_v40, 6  ;;  %v6339_v14 = vrot.slane %v2141_v57, 10  ;;  %v2148_v30 = vld [vmem:[#allocation2 + $0xb0] sm:$0x3]  ;;  %v2147_v50 = vld [vmem:[#allocation2 + $0xa8] sm:$0xc] }
 0x2d2   : > { %v2269_v12 = vsel %vm9203_vm8, %v2267_v49, %v2268_v7  ;;  %v6340_v1 = vrot.slane %v2143_v27, 10  ;;  %v2279_v39 = vrot.slane %v8023_v19, 6  ;;  %v2286_v55 = vrot.slane %v8024_v18, 6  ;;  %v7938_v52 = vld [vmem:[#allocation2 + $0x30] sm:$0xff]  }
 0x2d3   : > { %7094 = vmatpush3.bf16.msra.mxu0 %v8017_v6  ;;  %7242 = vmatpush3.bf16.msra.mxu1 %v7937_v8  ;;  %v8022_v8 = vld [vmem:[#allocation8 + $0xf8] sm:$0xff]   ;;  %v3695_v6 = vrot.slane %v3693_v20, 4  ;;  %v2266_v43 = vsel %vm9203_vm8, %v6339_v14, %v2265_v61  ;;  %v3704_v15 = vsel %vm9203_vm8, %v3702_v4, %v3703_v48  ;;  %v2145_v61 = vld [vmem:[#allocation2 + $0x9c] sm:$0xc]  ;;  %v3710_v25 = vrot.slane %v3567_v13, 6  ;;  %v7958_v19 = vld [vmem:[#allocation8 + $0x1e0] sm:$0xff]  }
 0x2d4   : > { %7095 = vmatprep.subr.bf16.mxu0 %v8019_v34  ;;  %7275 = vmatprep.subr.bf16.mxu1 %v9328_v16  ;;  %v2273_v31 = vsel %vm9203_vm8, %v6340_v1, %v2272_v42  ;;  %v2281_v26 = vrot.slane %v2279_v39, 4  ;;  %v2288_v36 = vrot.slane %v2286_v55, 4  ;;  %v3566_v42 = vld [vmem:[#allocation2 + $0xcc] sm:$0xc]  ;;  %v6341_v33 = vrot.slane %v2145_v61, 10  ;;  %v7936_v4 = vld [vmem:[#allocation2 + $0x18] sm:$0xff]  }
 0x2d5   : > { %7064 = vmatmul.mubr.bf16.gmra.mrb[44].mxu0 %v6351_v54  ;;  %7212 = vmatmul.mubr.bf16.gmra.mrb[0].mxu1 %v6457_v46  ;;  %v2276_v54 = vsel %vm9203_vm8, %v2274_v29, %v2275_v9  ;;  %v3697_v22 = vsel %vm9203_vm8, %v3695_v6, %v3696_v63  ;;  %v3707_v46 = vrot.slane %v9181_v28, 6  ;;  %v2282_v28 = vrot.slane %v2146_v0, 6  ;;  %v7942_v63 = vld [vmem:[#allocation2 + $0x3c] sm:$0xff]   ;;  %v7943_v48 = vld [vmem:[#allocation2 + $0x48] sm:$0xff]   ;;  %v7940_v1 = vld [vmem:[#allocation2 + $0x30] sm:$0xff]  }
 0x2d6   : > { %7067 = vmatprep.mubr.bf16.mxu0 %v6352_v11  ;;  %7215 = vmatprep.mubr.bf16.mxu1 %v6458_v5  ;;  %v6445_v11 = vrot.slane %v3562_v17, 10  ;;  %v6446_v5 = vrot.slane %v3564_v2, 10  ;;  %v6356_v24 = vcombine.low %v2273_v31, %v2276_v54  ;;  %v6447_v60 = vrot.slane %v3566_v42, 10  ;;  %v7946_v17 = vld [vmem:[#allocation8 + $0x1c8] sm:$0xff]   ;;  %v7951_v2 = vld [vmem:[#allocation8 + $0x1d0] sm:$0xff]   ;;  %v7955_v0 = vld [vmem:[#allocation8 + $0x1d8] sm:$0xff]  }
 0x2d7   : > { %7096 = vmatpush3.bf16.msra.mxu0 %v8019_v34  ;;  %v6355_v34 = vcombine.low %v2266_v43, %v2269_v12  ;;  %v3709_v37 = vrot.slane %v3707_v46, 4  ;;  %v2283_v38 = vsel %vm9203_vm8, %v2281_v26, %v2282_v28  ;;  %v6342_v59 = vrot.slane %v2147_v50, 10  ;;  %v7939_v14 = vld [vmem:[#allocation2 + $0x24] sm:$0xff]   ;;  %v7947_v12 = vld [vmem:[#allocation2 + $0x54] sm:$0xff]   ;;  %v7954_v31 = vld [vmem:[#allocation2 + $0x6c] sm:$0xff]  }
 0x2d8   : > { %7097 = vmatprep.subr.bf16.mxu0 %v8022_v8  ;;  %v3694_v32 = vsel %vm9203_vm8, %v6445_v11, %v3693_v20  ;;  %v3701_v23 = vsel %vm9203_vm8, %v6446_v5, %v3700_v56  ;;  %v8025_v20 = vld [vmem:[#allocation2 + $0xb8] sm:$0xf]  ;;  %v2150_v56 = vld [vmem:[#allocation2 + $0xbc] sm:$0x3]  ;;  %v2280_v58 = vsel %vm9203_vm8, %v6341_v33, %v2279_v39  ;;  %v3708_v49 = vsel %vm9203_vm8, %v6447_v60, %v3707_v46  ;;  %v7948_v54 = vld [vmem:[#allocation2 + $0x60] sm:$0xff]  }
 0x2d9   : > { %v6461_v47 = vcombine.low %v3694_v32, %v3697_v22  ;;  %v6462_v10 = vcombine.low %v3701_v23, %v3704_v15  ;;  %v3711_v3 = vsel %vm9203_vm8, %v3709_v37, %v3710_v25  ;;  %v6357_v7 = vcombine.low %v2280_v58, %v2283_v38  ;;  %v7944_v39 = vld [vmem:[#allocation2 + $0x3c] sm:$0xff]   ;;  %v7952_v11 = vld [vmem:[#allocation2 + $0x6c] sm:$0xff]   ;;  %v7949_v18 = vld [vmem:[#allocation2 + $0x54] sm:$0xff]  }
 0x2da   : > { %v2287_v62 = vsel %vm9203_vm8, %v6342_v59, %v2286_v55  ;;  %v6463_v40 = vcombine.low %v3708_v49, %v3711_v3  ;;  %v7953_v22 = vld [vmem:[#allocation2 + $0x78] sm:$0xff]   ;;  %v7964_v43 = vld [vmem:[#allocation8 + $0x1f0] sm:$0xff]   ;;  %v7957_v15 = vld [vmem:[#allocation2 + $0x90] sm:$0xff]  }
 0x2db   : > { %7098 = vmatpush3.bf16.msra.mxu0 %v8022_v8  ;;  %v2293_v8 = vrot.slane %v8025_v20, 6  ;;  %v7961_v46 = vld [vmem:[#allocation8 + $0x1e8] sm:$0xff]   ;;  %v7956_v55 = vld [vmem:[#allocation2 + $0x84] sm:$0xff]   ;;  %v9410_v42 = vld [vmem:[#allocation2 + $0x4c] sm:$0xf] }
 0x2dc   : > { %v7950_v5 = vld [vmem:[#allocation2 + $0x60] sm:$0xff]   ;;  %v7967_v13 = vld [vmem:[#allocation8 + $0x1f8] sm:$0xff]   ;;  %v7966_v61 = vld [vmem:[#allocation2 + $0xd8] sm:$0xff]   ;;  %v4533_v60 = vrot.slane %v9410_v42, 5 }
 0x2dd   : > { %7068 = vmatmul.mubr.bf16.gmra.mrb[48].mxu0 %v6353_v45  ;;  %7216 = vmatmul.mubr.bf16.gmra.mrb[4].mxu1 %v6459_v53  ;;  %v2289_v45 = vrot.slane %v2148_v30, 6  ;;  %v2295_v9 = vrot.slane %v2293_v8, 4  ;;  %v2296_v53 = vrot.slane %v2150_v56, 6  ;;  %v7959_v30 = vld [vmem:[#allocation2 + $0x9c] sm:$0xff]   ;;  %v7960_v32 = vld [vmem:[#allocation2 + $0xa8] sm:$0xff]  }
 0x2de   : > { %7071 = vmatprep.mubr.bf16.mxu0 %v6354_v21  ;;  %7219 = vmatprep.mubr.bf16.mxu1 %v6460_v44  ;;  %v2149_v21 = vld [vmem:[#allocation2 + $0xb4] sm:$0xc]  ;;  %v7963_v28 = vld [vmem:[#allocation2 + $0xc0] sm:$0xff]   ;;  %v4423_v26 = vld [vmem:[#allocation2 + $0x38] sm:$0x1] }
 0x2df   : > { %v2290_v35 = vsel %vm9203_vm8, %v2288_v36, %v2289_v45  ;;  %v6343_v57 = vrot.slane %v2149_v21, 10  ;;  %v2297_v27 = vsel %vm9203_vm8, %v2295_v9, %v2296_v53  ;;  %v4522_v25 = vrot.slane %v4423_v26, 5  ;;  %v9408_v36 = vld [vmem:[#allocation2 + $0x40] sm:$0xf]  ;;  %v4421_v45 = vld [vmem:[#allocation2 + $0x30] sm:$0xe] }
 0x2e0   : > { %v6358_v29 = vcombine.low %v2287_v62, %v2290_v35  ;;  %v4526_v50 = vrot.slane %v9408_v36, 5  ;;  %v7968_v33 = vld [vmem:[#allocation2 + $0xe4] sm:$0xff]   ;;  %v6496_v38 = vrot.slane %v4421_v45, 9  ;;  %v4429_v3 = vld [vmem:[#allocation2 + $0x50] sm:$0x1] }
 0x2e1   : > { %v2294_v44 = vsel %vm9203_vm8, %v6343_v57, %v2293_v8  ;;  %v4426_v8 = vld [vmem:[#allocation2 + $0x44] sm:$0x1]  ;;  %v4424_v49 = vld [vmem:[#allocation2 + $0x3c] sm:$0xe]  ;;  %v4536_v62 = vrot.slane %v4429_v3, 5 }
 0x2e2   : > { %v6359_v6 = vcombine.low %v2294_v44, %v2297_v27  ;;  %v4528_v56 = vrot.slane %v4526_v50, 4  ;;  %v4529_v58 = vrot.slane %v4426_v8, 5  ;;  %v9420_v9 = vld [vmem:[#allocation2 + $0x64] sm:$0xf]  ;;  %v6497_v53 = vrot.slane %v4424_v49, 9 }
 0x2e3   : > { %v4432_v44 = vld [vmem:[#allocation2 + $0x5c] sm:$0x1]  ;;  %v4436_v26 = vld [vmem:[#allocation2 + $0x6c] sm:$0xe]  ;;  %v4439_v45 = vld [vmem:[#allocation2 + $0x78] sm:$0xe] }
 0x2e5   : > { %7072 = vmatmul.mubr.bf16.gmra.mrb[52].mxu0 %v6355_v34  ;;  %7220 = vmatmul.mubr.bf16.gmra.mrb[8].mxu1 %v6461_v47  ;;  %v9402_v34 = vld [vmem:[#allocation8 + $0x200] sm:$0xff]  }
 0x2e6   : > { %7075 = vmatprep.mubr.bf16.mxu0 %v6356_v24  ;;  %7223 = vmatprep.mubr.bf16.mxu1 %v6462_v10  ;;  %v7962_v24 = vld [vmem:[#allocation2 + $0xb4] sm:$0xff]   ;;  %v7965_v10 = vld [vmem:[#allocation2 + $0xcc] sm:$0xff]  }
 0x2e7   : > { %v9405_v47 = vld [vmem:[#allocation2 + $0x34] sm:$0xf] }
 0x2e8   : > { %v4519_v23 = vrot.slane %v9405_v47, 5 }
 0x2ea   : > { %v4521_v37 = vrot.slane %v4519_v23, 4  ;;  %v4520_v59 = vsel %vm8845_vm2, %v6496_v38, %v4519_v23  ;;  %v6501_v38 = vrot.slane %v4436_v26, 9  ;;  %v4456_v26 = vld [vmem:[#allocation2 + $0xbc] sm:$0x1] }
 0x2ec   : > { %v4523_v20 = vsel %vm8845_vm2, %v4521_v37, %v4522_v25  ;;  %v9447_v25 = vld [vmem:[#allocation2 + $0x88] sm:$0xf] }
 0x2ed   : > { %7076 = vmatmul.mubr.bf16.gmra.mrb[56].mxu0 %v6357_v7  ;;  %7224 = vmatmul.mubr.bf16.gmra.mrb[12].mxu1 %v6463_v40  ;;  %v6512_v35 = vcombine.low %v4520_v59, %v4523_v20  ;;  %v4535_v7 = vrot.slane %v4533_v60, 4  ;;  %v9418_v40 = vld [vmem:[#allocation2 + $0x58] sm:$0xf]  ;;  %v4568_v8 = vrot.slane %v9447_v25, 5  ;;  %v4444_v59 = vld [vmem:[#allocation2 + $0x8c] sm:$0x1] }
 0x2ee   : > { %7079 = vmatprep.mubr.bf16.mxu0 %v6358_v29  ;;  %7243 = vmatprep.mubr.bf16.mxu1 %v7938_v52  ;;  %v4427_v29 = vld [vmem:[#allocation2 + $0x48] sm:$0xe]  ;;  %v4530_v52 = vsel %vm8845_vm2, %v4528_v56, %v4529_v58  ;;  %v4540_v21 = vrot.slane %v9418_v40, 5  ;;  %v4447_v58 = vld [vmem:[#allocation2 + $0x98] sm:$0x1] }
 0x2ef   : > { %v6498_v57 = vrot.slane %v4427_v29, 9  ;;  %v4537_v27 = vsel %vm8845_vm2, %v4535_v7, %v4536_v62  ;;  %v7974_v62 = vld [vmem:[#allocation8 + $0x228] sm:$0xff]  }
 0x2f5   : > { %7080 = vmatmul.mubr.bf16.gmra.mrb[60].mxu0 %v6359_v6  ;;  %7244 = vmatmul.mubr.bf16.vlgmr.msra.gmra.mrb[16].mxu1 %v7942_v63  ;;  %v4547_v6 = vrot.slane %v9420_v9, 5  ;;  %v4527_v63 = vsel %vm8845_vm2, %v6497_v53, %v4526_v50  ;;  %v9449_v50 = vld [vmem:[#allocation2 + $0x94] sm:$0xf]  ;;  %v4570_v53 = vrot.slane %v4568_v8, 4 }
 0x2f6   : > { %7099 = vmatprep.mubr.bf16.mxu0 %v7936_v4  ;;  %7276 = vmatpush3.bf16.msra.mxu1 %v9328_v16  ;;  %v7945_v16 = vld [vmem:[#allocation2 + $0x48] sm:$0xff]   ;;  %v6513_v4 = vcombine.low %v4527_v63, %v4530_v52  ;;  %v4571_v52 = vrot.slane %v4444_v59, 5  ;;  %v9489_v59 = vld [vmem:[#allocation2 + $0xdc] sm:$0xf] }
 0x2f7   : > { %7247 = vmatprep.mubr.bf16.mxu1 %v7943_v48  ;;  %7277 = vmatprep.subr.bf16.mxu1 %v7946_v17  ;;  %v4534_v48 = vsel %vm8845_vm2, %v6498_v57, %v4533_v60  ;;  %v6502_v60 = vrot.slane %v4439_v45, 9  ;;  %v9463_v63 = vld [vmem:[#allocation2 + $0xac] sm:$0xf]  ;;  %v4459_v45 = vld [vmem:[#allocation2 + $0xc8] sm:$0x1] }
 0x2fa   : > { %7278 = vmatpush3.bf16.msra.mxu1 %v7946_v17  ;;  %v4435_v17 = vld [vmem:[#allocation2 + $0x68] sm:$0x1] }
 0x2fb   : > { %7279 = vmatprep.subr.bf16.mxu1 %v7951_v2 }
 0x2fd   : > { %7100 = vmatmul.mubr.bf16.vlgmr.msra.gmra.mrb[32].mxu0 %v7939_v14  ;;  %7248 = vmatmul.mubr.bf16.gmra.mrb[20].mxu1 %v7947_v12  ;;  %v6514_v14 = vcombine.low %v4534_v48, %v4537_v27  ;;  %v4542_v12 = vrot.slane %v4540_v21, 4  ;;  %v4578_v27 = vrot.slane %v4447_v58, 5  ;;  %v4572_v48 = vsel %vm8845_vm2, %v4570_v53, %v4571_v52 }
 0x2fe   : > { %7103 = vmatprep.mubr.bf16.mxu0 %v7940_v1  ;;  %7251 = vmatprep.mubr.bf16.mxu1 %v7948_v54  ;;  %v4543_v1 = vrot.slane %v4432_v44, 5  ;;  %v4430_v54 = vld [vmem:[#allocation2 + $0x54] sm:$0xe]  ;;  %v9461_v44 = vld [vmem:[#allocation2 + $0xa0] sm:$0xf]  ;;  %v4606_v58 = vrot.slane %v4459_v45, 5 }
 0x2ff   : > { %7280 = vmatpush3.bf16.msra.mxu1 %v7951_v2  ;;  %v7970_v2 = vld [vmem:[#allocation8 + $0x208] sm:$0xff]  }
 0x300   : > { %7281 = vmatprep.subr.bf16.mxu1 %v7955_v0 }
 0x303   : > { %7282 = vmatpush3.bf16.msra.mxu1 %v7955_v0  ;;  %v4549_v0 = vrot.slane %v4547_v6, 4 }
 0x304   : > { %7283 = vmatprep.subr.bf16.mxu1 %v7958_v19 }
 0x305   : > { %7104 = vmatmul.mubr.bf16.gmra.mrb[36].mxu0 %v7944_v39  ;;  %7252 = vmatmul.mubr.bf16.gmra.mrb[24].mxu1 %v7952_v11  ;;  %v9432_v39 = vld [vmem:[#allocation2 + $0x70] sm:$0xf]  ;;  %v4433_v11 = vld [vmem:[#allocation2 + $0x60] sm:$0xe] }
 0x306   : > { %7107 = vmatprep.mubr.bf16.mxu0 %v7945_v16  ;;  %7255 = vmatprep.mubr.bf16.mxu1 %v7953_v22  ;;  %v9435_v16 = vld [vmem:[#allocation2 + $0x7c] sm:$0xf]  ;;  %v7971_v22 = vld [vmem:[#allocation8 + $0x210] sm:$0xff]  }
 0x307   : > { %7284 = vmatpush3.bf16.msra.mxu1 %v7958_v19  ;;  %v4550_v19 = vrot.slane %v4435_v17, 5  ;;  %v7975_v17 = vld [vmem:[#allocation8 + $0x230] sm:$0xff]  }
 0x308   : > { %7285 = vmatprep.subr.bf16.mxu1 %v7961_v46 }
 0x30b   : > { %7286 = vmatpush3.bf16.msra.mxu1 %v7961_v46  ;;  %v6499_v46 = vrot.slane %v4430_v54, 9  ;;  %v4589_v54 = vrot.slane %v9463_v63, 5 }
 0x30c   : > { %7287 = vmatprep.subr.bf16.mxu1 %v7964_v43 }
 0x30d   : > { %7108 = vmatmul.mubr.bf16.gmra.mrb[40].mxu0 %v7949_v18  ;;  %7256 = vmatmul.mubr.bf16.gmra.mrb[28].mxu1 %v7956_v55  ;;  %v4554_v18 = vrot.slane %v9432_v39, 5  ;;  %v6500_v55 = vrot.slane %v4433_v11, 9 }
 0x30e   : > { %7111 = vmatprep.mubr.bf16.mxu0 %v7950_v5  ;;  %7259 = vmatprep.mubr.bf16.mxu1 %v7957_v15  ;;  %v4551_v5 = vsel %vm8845_vm2, %v4549_v0, %v4550_v19  ;;  %v4438_v15 = vld [vmem:[#allocation2 + $0x74] sm:$0x1]  ;;  %v4453_v19 = vld [vmem:[#allocation2 + $0xb0] sm:$0x1] }
 0x30f   : > { %7288 = vmatpush3.bf16.msra.mxu1 %v7964_v43  ;;  %v4544_v43 = vsel %vm8845_vm2, %v4542_v12, %v4543_v1  ;;  %v4556_v23 = vrot.slane %v4554_v18, 4  ;;  %v4555_v56 = vsel %vm8845_vm2, %v6501_v38, %v4554_v18  ;;  %v4450_v1 = vld [vmem:[#allocation2 + $0xa4] sm:$0x1] }
 0x310   : > { %7289 = vmatprep.subr.bf16.mxu1 %v7967_v13 }
 0x313   : > { %7290 = vmatpush3.bf16.msra.mxu1 %v7967_v13  ;;  %v4561_v13 = vrot.slane %v9435_v16, 5 }
 0x314   : > { %7323 = vmatprep.subr.bf16.mxu1 %v9402_v34 }
 0x315   : > { %7112 = vmatmul.mubr.bf16.gmra.mrb[44].mxu0 %v7954_v31  ;;  %7260 = vmatmul.mubr.bf16.gmra.mrb[0].mxu1 %v7959_v30  ;;  %v4441_v31 = vld [vmem:[#allocation2 + $0x80] sm:$0x1]  ;;  %v4562_v7 = vsel %vm8845_vm2, %v6502_v60, %v4561_v13 }
 0x316   : > { %7263 = vmatprep.mubr.bf16.mxu1 %v7960_v32  ;;  %v4548_v32 = vsel %vm8845_vm2, %v6500_v55, %v4547_v6  ;;  %v4564_v37 = vrot.slane %v4441_v31, 5  ;;  %v4445_v6 = vld [vmem:[#allocation2 + $0x90] sm:$0xe]  ;;  %v4585_v55 = vrot.slane %v4450_v1, 5  ;;  %v4451_v31 = vld [vmem:[#allocation2 + $0xa8] sm:$0xe] }
 0x317   : > { %v9503_v1 = vld [vmem:[#allocation2 + $0xe8] sm:$0xf] }
 0x31d   : > { %7264 = vmatmul.mubr.bf16.gmra.mrb[4].mxu1 %v7962_v24  ;;  %v7972_v24 = vld [vmem:[#allocation8 + $0x218] sm:$0xff]  }
 0x31e   : > { %7267 = vmatprep.mubr.bf16.mxu1 %v7963_v28  ;;  %v6516_v28 = vcombine.low %v4548_v32, %v4551_v5  ;;  %v4448_v5 = vld [vmem:[#allocation2 + $0x9c] sm:$0xe] }
 0x31f   : > { %v6505_v32 = vrot.slane %v4448_v5, 9  ;;  %v4468_v5 = vld [vmem:[#allocation2 + $0xec] sm:$0x1] }
 0x325   : > { %7268 = vmatmul.mubr.bf16.gmra.mrb[8].mxu1 %v7965_v10  ;;  %v4563_v10 = vrot.slane %v4561_v13, 4  ;;  %v4592_v13 = vrot.slane %v4453_v19, 5 }
 0x326   : > { %7271 = vmatprep.mubr.bf16.mxu1 %v7966_v61  ;;  %v4557_v61 = vrot.slane %v4438_v15, 5  ;;  %v4591_v15 = vrot.slane %v4589_v54, 4 }
 0x327   : > { %v4565_v3 = vsel %vm8845_vm2, %v4563_v10, %v4564_v37 }
 0x328   : > { %v4558_v20 = vsel %vm8845_vm2, %v4556_v23, %v4557_v61  ;;  %v6518_v29 = vcombine.low %v4562_v7, %v4565_v3  ;;  %v6506_v23 = vrot.slane %v4451_v31, 9  ;;  %v4593_v61 = vsel %vm8845_vm2, %v4591_v15, %v4592_v13 }
 0x329   : > { %v6517_v49 = vcombine.low %v4555_v56, %v4558_v20  ;;  %v4599_v3 = vrot.slane %v4456_v26, 5  ;;  %v5017_v31 = vrot.slane %v9405_v47, 6 }
 0x32a   : > { %v4590_v38 = vsel %vm8845_vm2, %v6506_v23, %v4589_v54  ;;  %v4627_v23 = vrot.slane %v4468_v5, 5  ;;  %v7981_v5 = vld [vmem:[#allocation9 + $0x20] sm:$0xff]  }
 0x32b   : > { %v6522_v20 = vcombine.low %v4590_v38, %v4593_v61  ;;  %v4952_v61 = vld [vmem:[#allocation2 + $0x38] sm:$0x3]  ;;  %v4951_v38 = vld [vmem:[#allocation2 + $0x30] sm:$0xc] }
 0x32d   : > { %7272 = vmatmul.mubr.bf16.gmra.mrb[12].mxu1 %v7968_v33  ;;  %v7973_v33 = vld [vmem:[#allocation8 + $0x220] sm:$0xff]  }
 0x32e   : > { %7291 = vmatprep.mubr.bf16.mxu1 %v6512_v35  ;;  %v4575_v35 = vrot.slane %v9449_v50, 5 }
 0x330   : > { %v4577_v57 = vrot.slane %v4575_v35, 4 }
 0x332   : > { %v4579_v12 = vsel %vm8845_vm2, %v4577_v57, %v4578_v27  ;;  %v4465_v57 = vld [vmem:[#allocation2 + $0xe0] sm:$0x1] }
 0x335   : > { %7292 = vmatmul.mubr.bf16.vlgmr.msra.gmra.mrb[16].mxu1 %v6513_v4 }
 0x336   : > { %7324 = vmatpush3.bf16.msra.mxu1 %v9402_v34  ;;  %7295 = vmatprep.mubr.bf16.mxu1 %v6514_v14  ;;  %v4541_v34 = vsel %vm8845_vm2, %v6499_v46, %v4540_v21  ;;  %v4442_v21 = vld [vmem:[#allocation2 + $0x84] sm:$0xe]  ;;  %v6504_v14 = vrot.slane %v4445_v6, 9  ;;  %v7976_v46 = vld [vmem:[#allocation8 + $0x238] sm:$0xff]   ;;  %v4462_v6 = vld [vmem:[#allocation2 + $0xd4] sm:$0x1] }
 0x337   : > { %7325 = vmatprep.subr.bf16.mxu1 %v7970_v2  ;;  %v6515_v30 = vcombine.low %v4541_v34, %v4544_v43  ;;  %v6503_v4 = vrot.slane %v4442_v21, 9  ;;  %v9475_v34 = vld [vmem:[#allocation2 + $0xb8] sm:$0xf] }
 0x338   : > { %v4463_v21 = vld [vmem:[#allocation2 + $0xd8] sm:$0xe] }
 0x339   : > { %v4569_v0 = vsel %vm8845_vm2, %v6503_v4, %v4568_v8  ;;  %v4454_v8 = vld [vmem:[#allocation2 + $0xb4] sm:$0xe] }
 0x33a   : > { %7326 = vmatpush3.bf16.msra.mxu1 %v7970_v2  ;;  %v4582_v2 = vrot.slane %v9461_v44, 5  ;;  %v6519_v11 = vcombine.low %v4569_v0, %v4572_v48  ;;  %v6507_v7 = vrot.slane %v4454_v8, 9  ;;  %v4460_v0 = vld [vmem:[#allocation2 + $0xcc] sm:$0xe]  ;;  %v6536_v8 = vrot.slane %v4951_v38, 10 }
 0x33b   : > { %7327 = vmatprep.subr.bf16.mxu1 %v7971_v22  ;;  %v4961_v38 = vld [vmem:[#allocation2 + $0x6c] sm:$0xc] }
 0x33c   : > { %v4584_v18 = vrot.slane %v4582_v2, 4  ;;  %v4583_v37 = vsel %vm8845_vm2, %v6505_v32, %v4582_v2  ;;  %v6510_v2 = vrot.slane %v4463_v21, 9 }
 0x33d   : > { %7296 = vmatmul.mubr.bf16.gmra.mrb[20].mxu1 %v6515_v30  ;;  %v9477_v30 = vld [vmem:[#allocation2 + $0xc4] sm:$0xf] }
 0x33e   : > { %7299 = vmatprep.mubr.bf16.mxu1 %v6516_v28  ;;  %7328 = vmatpush3.bf16.msra.mxu1 %v7971_v22  ;;  %v4576_v22 = vsel %vm8845_vm2, %v6504_v14, %v4575_v35  ;;  %v4596_v28 = vrot.slane %v9475_v34, 5  ;;  %v4603_v10 = vrot.slane %v9477_v30, 5  ;;  %v4457_v35 = vld [vmem:[#allocation2 + $0xc0] sm:$0xe] }
 0x33f   : > { %7329 = vmatprep.subr.bf16.mxu1 %v7972_v24  ;;  %v6520_v43 = vcombine.low %v4576_v22, %v4579_v12  ;;  %v6508_v53 = vrot.slane %v4457_v35, 9  ;;  %v4620_v12 = vrot.slane %v4465_v57, 5  ;;  %v4624_v22 = vrot.slane %v9503_v1, 5  ;;  %v4955_v57 = vld [vmem:[#allocation2 + $0x48] sm:$0xc] }
 0x340   : > { %v4598_v60 = vrot.slane %v4596_v28, 4  ;;  %v4605_v56 = vrot.slane %v4603_v10, 4  ;;  %v5031_v35 = vrot.slane %v9410_v42, 6 }
 0x341   : > { %v4604_v4 = vsel %vm8845_vm2, %v6508_v53, %v4603_v10  ;;  %v5019_v10 = vrot.slane %v5017_v31, 4 }
 0x342   : > { %7330 = vmatpush3.bf16.msra.mxu1 %v7972_v24  ;;  %v4586_v24 = vsel %vm8845_vm2, %v4584_v18, %v4585_v55  ;;  %v4607_v27 = vsel %vm8845_vm2, %v4605_v56, %v4606_v58  ;;  %v4466_v55 = vld [vmem:[#allocation2 + $0xe4] sm:$0xe]  ;;  %v4956_v56 = vld [vmem:[#allocation2 + $0x50] sm:$0x3]  ;;  %v5018_v58 = vsel %vm9203_vm8, %v6536_v8, %v5017_v31  ;;  %v5052_v31 = vrot.slane %v9432_v39, 6 }
 0x343   : > { %7331 = vmatprep.subr.bf16.mxu1 %v7973_v33  ;;  %v6524_v54 = vcombine.low %v4604_v4, %v4607_v27  ;;  %v5034_v21 = vrot.slane %v4956_v56, 6  ;;  %v7979_v27 = vld [vmem:[#allocation9 + $0x10] sm:$0xff]   ;;  %v6538_v4 = vrot.slane %v4955_v57, 10  ;;  %v4963_v8 = vld [vmem:[#allocation2 + $0x78] sm:$0xc] }
 0x345   : > { %7300 = vmatmul.mubr.bf16.gmra.mrb[24].mxu1 %v6517_v49  ;;  %v9491_v49 = vld [vmem:[#allocation2 + $0xd0] sm:$0xf] }
 0x346   : > { %7303 = vmatprep.mubr.bf16.mxu1 %v6518_v29  ;;  %7332 = vmatpush3.bf16.msra.mxu1 %v7973_v33  ;;  %v6521_v33 = vcombine.low %v4583_v37, %v4586_v24  ;;  %v4600_v29 = vsel %vm8845_vm2, %v4598_v60, %v4599_v3  ;;  %v4610_v52 = vrot.slane %v9491_v49, 5  ;;  %v6511_v24 = vrot.slane %v4466_v55, 9  ;;  %v4954_v3 = vld [vmem:[#allocation2 + $0x44] sm:$0x3] }
 0x347   : > { %7333 = vmatprep.subr.bf16.mxu1 %v7974_v62  ;;  %v5020_v37 = vrot.slane %v4952_v61, 6  ;;  %v5027_v53 = vrot.slane %v4954_v3, 6  ;;  %v5066_v3 = vrot.slane %v9447_v25, 6  ;;  %v4965_v25 = vld [vmem:[#allocation2 + $0x84] sm:$0xc] }
 0x348   : > { %v4612_v19 = vrot.slane %v4610_v52, 4  ;;  %v4625_v45 = vsel %vm8845_vm2, %v6511_v24, %v4624_v22 }
 0x349   : > { %v5021_v60 = vsel %vm9203_vm8, %v5019_v10, %v5020_v37 }
 0x34a   : > { %7334 = vmatpush3.bf16.msra.mxu1 %v7974_v62  ;;  %v4617_v62 = vrot.slane %v9489_v59, 5 }
 0x34b   : > { %7335 = vmatprep.subr.bf16.mxu1 %v7975_v17 }
 0x34c   : > { %v4619_v14 = vrot.slane %v4617_v62, 4 }
 0x34d   : > { %7304 = vmatmul.mubr.bf16.gmra.mrb[28].mxu1 %v6519_v11  ;;  %v4613_v11 = vrot.slane %v4462_v6, 5 }
 0x34e   : > { %7307 = vmatprep.mubr.bf16.mxu1 %v6520_v43  ;;  %7336 = vmatpush3.bf16.msra.mxu1 %v7975_v17  ;;  %v4597_v17 = vsel %vm8845_vm2, %v6507_v7, %v4596_v28  ;;  %v4618_v43 = vsel %vm8845_vm2, %v6510_v2, %v4617_v62  ;;  %v4621_v18 = vsel %vm8845_vm2, %v4619_v14, %v4620_v12  ;;  %v4626_v28 = vrot.slane %v4624_v22, 4  ;;  %v7977_v7 = vld [vmem:[#allocation9] sm:$0xff]   ;;  %v7978_v62 = vld [vmem:[#allocation9 + $0x8] sm:$0xff]  }
 0x34f   : > { %7337 = vmatprep.subr.bf16.mxu1 %v7976_v46  ;;  %v6523_v48 = vcombine.low %v4597_v17, %v4600_v29  ;;  %v4614_v15 = vsel %vm8845_vm2, %v4612_v19, %v4613_v11  ;;  %v6526_v32 = vcombine.low %v4618_v43, %v4621_v18  ;;  %v6552_v29 = vcombine.low %v5018_v58, %v5021_v60  ;;  %v4958_v2 = vld [vmem:[#allocation2 + $0x5c] sm:$0x3]  ;;  %v7980_v11 = vld [vmem:[#allocation9 + $0x18] sm:$0xff]   ;;  %v4957_v43 = vld [vmem:[#allocation2 + $0x54] sm:$0xc] }
 0x350   : > { %7371 = vmatprep.subr.bf16.mxu0 %v7977_v7  ;;  %v5038_v17 = vrot.slane %v9418_v40, 6  ;;  %v5045_v14 = vrot.slane %v9420_v9, 6  ;;  %v5032_v19 = vsel %vm9203_vm8, %v6538_v4, %v5031_v35  ;;  %v4959_v9 = vld [vmem:[#allocation2 + $0x60] sm:$0xc]  ;;  %v4966_v58 = vld [vmem:[#allocation2 + $0x8c] sm:$0x3] }
 0x351   : > { %7372 = vmatpush3.bf16.msra.mxu0 %v7977_v7  ;;  %v5073_v7 = vrot.slane %v9449_v50, 6 }
 0x352   : > { %7338 = vmatpush3.bf16.msra.mxu1 %v7976_v46  ;;  %v6509_v46 = vrot.slane %v4460_v0, 9  ;;  %7373 = vmatprep.subr.bf16.mxu0 %v7978_v62  ;;  %v5040_v40 = vrot.slane %v5038_v17, 4  ;;  %v5047_v18 = vrot.slane %v5045_v14, 4 }
 0x353   : > { %v5075_v57 = vrot.slane %v5073_v7, 4 }
 0x354   : > { %v4611_v13 = vsel %vm8845_vm2, %v6509_v46, %v4610_v52  ;;  %v4953_v52 = vld [vmem:[#allocation2 + $0x3c] sm:$0xc]  ;;  %v5041_v46 = vrot.slane %v4958_v2, 6  ;;  %v4970_v2 = vld [vmem:[#allocation2 + $0xa4] sm:$0x3] }
 0x355   : > { %7308 = vmatmul.mubr.bf16.gmra.mrb[0].mxu1 %v6521_v33  ;;  %v6525_v26 = vcombine.low %v4611_v13, %v4614_v15  ;;  %v4628_v33 = vsel %vm8845_vm2, %v4626_v28, %v4627_v23  ;;  %v6537_v42 = vrot.slane %v4953_v52, 10  ;;  %7374 = vmatpush3.bf16.msra.mxu0 %v7978_v62  ;;  %v6539_v15 = vrot.slane %v4957_v43, 10  ;;  %v4962_v28 = vld [vmem:[#allocation2 + $0x74] sm:$0x3] }
 0x356   : > { %7311 = vmatprep.mubr.bf16.mxu1 %v6522_v20  ;;  %v5024_v20 = vrot.slane %v9408_v36, 6  ;;  %v6527_v47 = vcombine.low %v4625_v45, %v4628_v33  ;;  %v5033_v36 = vrot.slane %v5031_v35, 4  ;;  %7375 = vmatprep.subr.bf16.mxu0 %v7979_v27  ;;  %v5042_v13 = vsel %vm9203_vm8, %v5040_v40, %v5041_v46 }
 0x357   : > { %v5059_v23 = vrot.slane %v9435_v16, 6  ;;  %v5039_v61 = vsel %vm9203_vm8, %v6539_v15, %v5038_v17  ;;  %v5054_v33 = vrot.slane %v5052_v31, 4  ;;  %v5055_v39 = vrot.slane %v4962_v28, 6 }
 0x358   : > { %v5026_v41 = vrot.slane %v5024_v20, 4  ;;  %v5025_v12 = vsel %vm9203_vm8, %v6537_v42, %v5024_v20  ;;  %v6555_v10 = vcombine.low %v5039_v61, %v5042_v13  ;;  %v6541_v16 = vrot.slane %v4961_v38, 10  ;;  %v4967_v42 = vld [vmem:[#allocation2 + $0x90] sm:$0xc]  ;;  %v4974_v13 = vld [vmem:[#allocation2 + $0xbc] sm:$0x3] }
 0x359   : > { %7376 = vmatpush3.bf16.msra.mxu0 %v7979_v27  ;;  %v5061_v20 = vrot.slane %v5059_v23, 4  ;;  %v5056_v60 = vsel %vm9203_vm8, %v5054_v33, %v5055_v39  ;;  %v6542_v35 = vrot.slane %v4963_v8, 10  ;;  %v5080_v17 = vrot.slane %v9461_v44, 6  ;;  %v4969_v44 = vld [vmem:[#allocation2 + $0x9c] sm:$0xc] }
 0x35a   : > { %v5028_v6 = vsel %vm9203_vm8, %v5026_v41, %v5027_v53  ;;  %7377 = vmatprep.subr.bf16.mxu0 %v7980_v11  ;;  %v5053_v62 = vsel %vm9203_vm8, %v6541_v16, %v5052_v31  ;;  %v6544_v4 = vrot.slane %v4967_v42, 10  ;;  %v5083_v40 = vrot.slane %v4970_v2, 6  ;;  %v4979_v8 = vld [vmem:[#allocation2 + $0xd8] sm:$0xc]  ;;  %v4980_v16 = vld [vmem:[#allocation2 + $0xe0] sm:$0x3] }
 0x35b   : > { %v6553_v0 = vcombine.low %v5025_v12, %v5028_v6  ;;  %v6557_v41 = vcombine.low %v5053_v62, %v5056_v60  ;;  %v5060_v53 = vsel %vm9203_vm8, %v6542_v35, %v5059_v23  ;;  %v6543_v6 = vrot.slane %v4965_v25, 10 }
 0x35c   : > { %v5101_v31 = vrot.slane %v9477_v30, 6  ;;  %v5115_v30 = vrot.slane %v9489_v59, 6  ;;  %v6550_v59 = vrot.slane %v4979_v8, 10  ;;  %v5118_v62 = vrot.slane %v4980_v16, 6 }
 0x35d   : > { %7312 = vmatmul.mubr.bf16.gmra.mrb[4].mxu1 %v6523_v48  ;;  %v5035_v48 = vsel %vm9203_vm8, %v5033_v36, %v5034_v21  ;;  %7378 = vmatpush3.bf16.msra.mxu0 %v7980_v11  ;;  %v5068_v36 = vrot.slane %v5066_v3, 4  ;;  %v5069_v21 = vrot.slane %v4966_v58, 6  ;;  %v5067_v12 = vsel %vm9203_vm8, %v6543_v6, %v5066_v3  ;;  %v4978_v3 = vld [vmem:[#allocation2 + $0xd4] sm:$0x3] }
 0x35e   : > { %7315 = vmatprep.mubr.bf16.mxu1 %v6524_v54  ;;  %v4960_v54 = vld [vmem:[#allocation2 + $0x68] sm:$0x3]  ;;  %v6554_v22 = vcombine.low %v5032_v19, %v5035_v48  ;;  %7379 = vmatprep.subr.bf16.mxu0 %v7981_v5  ;;  %v5074_v19 = vsel %vm9203_vm8, %v6544_v4, %v5073_v7  ;;  %v5117_v7 = vrot.slane %v5115_v30, 4 }
 0x35f   : > { %v5048_v55 = vrot.slane %v4960_v54, 6  ;;  %v5070_v50 = vsel %vm9203_vm8, %v5068_v36, %v5069_v21  ;;  %v4972_v54 = vld [vmem:[#allocation2 + $0xb0] sm:$0x3]  ;;  %v5116_v21 = vsel %vm9203_vm8, %v6550_v59, %v5115_v30 }
 0x360   : > { %v5090_v43 = vrot.slane %v4972_v54, 6  ;;  %v5119_v25 = vsel %vm9203_vm8, %v5117_v7, %v5118_v62 }
 0x361   : > { %v5049_v24 = vsel %vm9203_vm8, %v5047_v18, %v5048_v55  ;;  %7380 = vmatpush3.bf16.msra.mxu0 %v7981_v5  ;;  %v4971_v18 = vld [vmem:[#allocation2 + $0xa8] sm:$0xc]  ;;  %v6545_v55 = vrot.slane %v4969_v44, 10 }
 0x362   : > { %v6546_v5 = vrot.slane %v4971_v18, 10 }
 0x365   : > { %7316 = vmatmul.mubr.bf16.gmra.mrb[8].mxu1 %v6525_v26  ;;  %v4964_v26 = vld [vmem:[#allocation2 + $0x80] sm:$0x3] }
 0x366   : > { %7319 = vmatprep.mubr.bf16.mxu1 %v6526_v32  ;;  %v6540_v32 = vrot.slane %v4959_v9, 10  ;;  %v5094_v9 = vrot.slane %v9475_v34, 6  ;;  %v4975_v34 = vld [vmem:[#allocation2 + $0xc0] sm:$0xc] }
 0x368   : > { %v5046_v37 = vsel %vm9203_vm8, %v6540_v32, %v5045_v14  ;;  %v5087_v14 = vrot.slane %v9463_v63, 6  ;;  %v5081_v32 = vsel %vm9203_vm8, %v6545_v55, %v5080_v17 }
 0x369   : > { %v6556_v45 = vcombine.low %v5046_v37, %v5049_v24  ;;  %v4976_v24 = vld [vmem:[#allocation2 + $0xc8] sm:$0x3]  ;;  %v5097_v37 = vrot.slane %v4974_v13, 6 }
 0x36a   : > { %v5089_v46 = vrot.slane %v5087_v14, 4  ;;  %v5088_v23 = vsel %vm9203_vm8, %v6546_v5, %v5087_v14  ;;  %v5104_v33 = vrot.slane %v4976_v24, 6 }
 0x36c   : > { %v5091_v15 = vsel %vm9203_vm8, %v5089_v46, %v5090_v43 }
 0x36d   : > { %7320 = vmatmul.mubr.bf16.gmra.mrb[12].mxu1 %v6527_v47  ;;  %v5062_v47 = vrot.slane %v4964_v26, 6  ;;  %v6562_v61 = vcombine.low %v5088_v23, %v5091_v15  ;;  %v4973_v26 = vld [vmem:[#allocation2 + $0xb4] sm:$0xc]  ;;  %v7983_v23 = vld [vmem:[#allocation9 + $0x30] sm:$0xff]  }
 0x36e   : > { %7339 = vmatprep.mubr.bf16.mxu1 %v6552_v29  ;;  %v4968_v29 = vld [vmem:[#allocation2 + $0x98] sm:$0x3]  ;;  %v6547_v39 = vrot.slane %v4973_v26, 10 }
 0x36f   : > { %v5063_v56 = vsel %vm9203_vm8, %v5061_v20, %v5062_v47  ;;  %v5076_v27 = vrot.slane %v4968_v29, 6  ;;  %v6548_v20 = vrot.slane %v4975_v34, 10  ;;  %v5108_v47 = vrot.slane %v9491_v49, 6 }
 0x370   : > { %v6558_v52 = vcombine.low %v5060_v53, %v5063_v56  ;;  %v5095_v35 = vsel %vm9203_vm8, %v6547_v39, %v5094_v9  ;;  %v5111_v49 = vrot.slane %v4978_v3, 6 }
 0x371   : > { %v5077_v48 = vsel %vm9203_vm8, %v5075_v57, %v5076_v27  ;;  %v5102_v56 = vsel %vm9203_vm8, %v6548_v20, %v5101_v31  ;;  %v5110_v53 = vrot.slane %v5108_v47, 4  ;;  %v4981_v57 = vld [vmem:[#allocation2 + $0xe4] sm:$0xc]  ;;  %v4982_v27 = vld [vmem:[#allocation2 + $0xec] sm:$0x3] }
 0x372   : > { %v6560_v11 = vcombine.low %v5074_v19, %v5077_v48  ;;  %v5125_v48 = vrot.slane %v4982_v27, 6 }
 0x373   : > { %v5112_v42 = vsel %vm9203_vm8, %v5110_v53, %v5111_v49 }
 0x375   : > { %7340 = vmatmul.mubr.bf16.vlgmr.msra.gmra.mrb[16].mxu1 %v6553_v0  ;;  %v6559_v0 = vcombine.low %v5067_v12, %v5070_v50  ;;  %v6566_v50 = vcombine.low %v5116_v21, %v5119_v25 }
 0x376   : > { %7343 = vmatprep.mubr.bf16.mxu1 %v6554_v22  ;;  %v5082_v22 = vrot.slane %v5080_v17, 4  ;;  %v6551_v17 = vrot.slane %v4981_v57, 10 }
 0x378   : > { %v5084_v63 = vsel %vm9203_vm8, %v5082_v22, %v5083_v40 }
 0x379   : > { %v6561_v28 = vcombine.low %v5081_v32, %v5084_v63 }
 0x37d   : > { %7344 = vmatmul.mubr.bf16.gmra.mrb[20].mxu1 %v6555_v10  ;;  %v5096_v10 = vrot.slane %v5094_v9, 4 }
 0x37e   : > { %7347 = vmatprep.mubr.bf16.mxu1 %v6556_v45  ;;  %v5103_v45 = vrot.slane %v5101_v31, 4 }
 0x37f   : > { %v5098_v38 = vsel %vm9203_vm8, %v5096_v10, %v5097_v37  ;;  %v7984_v10 = vld [vmem:[#allocation9 + $0x38] sm:$0xff]  }
 0x380   : > { %v5105_v60 = vsel %vm9203_vm8, %v5103_v45, %v5104_v33  ;;  %v6563_v58 = vcombine.low %v5095_v35, %v5098_v38 }
 0x381   : > { %v6564_v29 = vcombine.low %v5102_v56, %v5105_v60  ;;  %v9638_v60 = vld [vmem:[#allocation14] ss:$0 sm:$0xff]  ;;  %v9640_v56 = vld [vmem:[#allocation15] ss:$0 sm:$0xff] }
 0x385   : > { %7348 = vmatmul.mubr.bf16.gmra.mrb[24].mxu1 %v6557_v41  ;;  %v4977_v41 = vld [vmem:[#allocation2 + $0xcc] sm:$0xc] }
 0x386   : > { %7351 = vmatprep.mubr.bf16.mxu1 %v6558_v52  ;;  %v5122_v52 = vrot.slane %v9503_v1, 6  ;;  %v6549_v36 = vrot.slane %v4977_v41, 10 }
 0x388   : > { %v5109_v6 = vsel %vm9203_vm8, %v6549_v36, %v5108_v47  ;;  %v5124_v4 = vrot.slane %v5122_v52, 4  ;;  %v5123_v2 = vsel %vm9203_vm8, %v6551_v17, %v5122_v52 }
 0x389   : > { %v6565_v1 = vcombine.low %v5109_v6, %v5112_v42 }
 0x38a   : > { %v5126_v14 = vsel %vm9203_vm8, %v5124_v4, %v5125_v48 }
 0x38b   : > { %v6567_v12 = vcombine.low %v5123_v2, %v5126_v14 }
 0x38d   : > { %7352 = vmatmul.mubr.bf16.gmra.mrb[28].mxu1 %v6559_v0 }
 0x38e   : > { %7355 = vmatprep.mubr.bf16.mxu1 %v6560_v11 }
 0x395   : > { %7356 = vmatmul.mubr.bf16.gmra.mrb[0].mxu1 %v6561_v28  ;;  %v7982_v28 = vld [vmem:[#allocation9 + $0x28] sm:$0xff]  }
 0x396   : > { %7359 = vmatprep.mubr.bf16.mxu1 %v6562_v61  ;;  %7381 = vmatprep.subr.bf16.mxu0 %v7982_v28 }
 0x397   : > { %7382 = vmatpush3.bf16.msra.mxu0 %v7982_v28 }
 0x398   : > { %7383 = vmatprep.subr.bf16.mxu0 %v7983_v23 }
 0x39b   : > { %7384 = vmatpush3.bf16.msra.mxu0 %v7983_v23 }
 0x39c   : > { %7385 = vmatprep.subr.bf16.mxu0 %v7984_v10 }
 0x39d   : > { %7360 = vmatmul.mubr.bf16.gmra.mrb[4].mxu1 %v6563_v58 }
 0x39e   : > { %7363 = vmatprep.mubr.bf16.mxu1 %v6564_v29 }
 0x39f   : > { %7386 = vmatpush3.bf16.msra.mxu0 %v7984_v10 }
 0x3a5   : > { %7364 = vmatmul.mubr.bf16.gmra.mrb[8].mxu1 %v6565_v1 }
 0x3a6   : > { %7367 = vmatprep.mubr.bf16.mxu1 %v6566_v50 }
 0x3ad   : > { %7368 = vmatmul.mubr.bf16.gmra.mrb[12].mxu1 %v6567_v12 }
 0x3b0   : > { %v9598_v54 = vpop.f32.mrb[48].mxu0 }
 0x3b1   : > { %v9600_v0 = vpop.f32.mrb[49].mxu0 }
 0x3b2   : > { %v9602_v19 = vpop.f32.mrb[50].mxu0 }
 0x3b3   : > { %v9604_v11 = vpop.f32.mrb[51].mxu0 }
 0x3b8   : > { %v9606_v22 = vpop.f32.mrb[52].mxu0 }
 0x3b9   : > { %v9608_v40 = vpop.f32.mrb[53].mxu0 }
 0x3ba   : > { %v9610_v44 = vpop.f32.mrb[54].mxu0 }
 0x3bb   : > { %v9612_v46 = vpop.f32.mrb[55].mxu0 }
 0x3c0   : > { %v9614_v51 = vpop.f32.mrb[56].mxu0 }
 0x3c1   : > { %v9616_v43 = vpop.f32.mrb[57].mxu0 }
 0x3c2   : > { %v9618_v18 = vpop.f32.mrb[58].mxu0 }
 0x3c3   : > { %v9620_v55 = vpop.f32.mrb[59].mxu0 }
 0x3c8   : > { %v9622_v63 = vpop.f32.mrb[60].mxu0 }
 0x3c9   : > { %v9624_v9 = vpop.f32.mrb[61].mxu0 }
 0x3ca   : > { %v9626_v5 = vpop.f32.mrb[62].mxu0 }
 0x3cb   : > { %v9628_v15 = vpop.f32.mrb[63].mxu0 }
 0x3d0   : > { %v7101_v13 = vpop.f32.mrb[32].mxu0 }
 0x3d1   : > { %v2847_v31 = vpop.f32.mrb[33].mxu0 }
 0x3d2   : > { %v7102_v32 = vpop.f32.mrb[34].mxu0 }
 0x3d3   : > { %v2850_v24 = vpop.f32.mrb[35].mxu0 }
 0x3d8   : > { %v7105_v61 = vpop.f32.mrb[36].mxu0 }
 0x3d9   : > { %v2863_v26 = vpop.f32.mrb[37].mxu0 }
 0x3da   : > { %v7106_v37 = vpop.f32.mrb[38].mxu0 }
 0x3db   : > { %v2866_v34 = vpop.f32.mrb[39].mxu0 }
 0x3e0   : > { %v7109_v45 = vpop.f32.mrb[40].mxu0 }
 0x3e1   : > { %v2879_v33 = vpop.f32.mrb[41].mxu0 }
 0x3e2   : > { %v7110_v39 = vpop.f32.mrb[42].mxu0 }
 0x3e3   : > { %v2882_v30 = vpop.f32.mrb[43].mxu0 }
 0x3e8   : > { %v9630_v38 = vpop.f32.mrb[44].mxu0 }
 0x3e9   : > { %v9632_v20 = vpop.f32.mrb[45].mxu0 }
 0x3ea   : > { %v9634_v47 = vpop.f32.mrb[46].mxu0 }
 0x3eb   : > { %v9636_v8 = vpop.f32.mrb[47].mxu0 }
 0x448   : > { %v7341_v16 = vpop.f32.mrb[16].mxu1 }
 0x449   : > { %v7435_v3 = vadd.f32 %v7341_v16, %v7101_v13  ;;  %v5290_v35 = vpop.f32.mrb[17].mxu1 }
 0x44a   : > { %v7436_v58 = vadd.f32 %v5290_v35, %v2847_v31  ;;  %v7342_v59 = vpop.f32.mrb[18].mxu1 }
 0x44b   : > { %v5458_v7 = vmul.f32 %v7435_v3, %v9638_v60  ;;  %v7437_v62 = vadd.f32 %v7342_v59, %v7102_v32  ;;  %v5293_v29 = vpop.f32.mrb[19].mxu1 }
 0x44c   : > { %v5456_v41 = vmul.f32 %v7436_v58, %v9638_v60  ;;  %v7438_v53 = vadd.f32 %v5293_v29, %v2850_v24 }
 0x44d   : > { %v5497_v49 = vadd.f32 %v9640_v56, %v5458_v7  ;;  %v5459_v52 = vmul.f32 %v7437_v62, %v9638_v60 }
 0x44e   : > { %v5495_v36 = vadd.f32 %v9640_v56, %v5456_v41  ;;  %v5457_v21 = vmul.f32 %v7438_v53, %v9638_v60 }
 0x44f   : > { %v5498_v25 = vadd.f32 %v9640_v56, %v5459_v52  ;;  %v5529_v42 = vmax.f32 %v5497_v49, 0.0 }
 0x450   : > { %v5496_v57 = vadd.f32 %v9640_v56, %v5457_v21  ;;  %v7345_v27 = vpop.f32.mrb[20].mxu1  ;;  %v5527_v4 = vmax.f32 %v5495_v36, 0.0 }
 0x451   : > { %v5530_v6 = vmax.f32 %v5498_v25, 0.0  ;;  %v7439_v50 = vadd.f32 %v7345_v27, %v7105_v61  ;;  %v5306_v17 = vpop.f32.mrb[21].mxu1 }
 0x452   : > { %v5528_v48 = vmax.f32 %v5496_v57, 0.0  ;;  %v7440_v1 = vadd.f32 %v5306_v17, %v2863_v26  ;;  %v7346_v2 = vpop.f32.mrb[22].mxu1 }
 0x453   : > { %v5560_v14 = vpack.c.bf16 %v5530_v6, %v5529_v42  ;;  %v5462_v12 = vmul.f32 %v7439_v50, %v9638_v60  ;;  %v7441_v13 = vadd.f32 %v7346_v2, %v7106_v37  ;;  %v5309_v31 = vpop.f32.mrb[23].mxu1 }
 0x454   : > { %v5460_v32 = vmul.f32 %v7440_v1, %v9638_v60  ;;  %v7442_v24 = vadd.f32 %v5309_v31, %v2866_v34  ;;  %v5559_v28 = vpack.c.bf16 %v5528_v48, %v5527_v4 }
 0x455   : > { %v5501_v23 = vadd.f32 %v9640_v56, %v5462_v12  ;;  %v5463_v10 = vmul.f32 %v7441_v13, %v9638_v60 }
 0x456   : > { %v5499_v61 = vadd.f32 %v9640_v56, %v5460_v32  ;;  %v5461_v16 = vmul.f32 %v7442_v24, %v9638_v60  ;;  %7387 = vmatprep.mubr.bf16.mxu0 %v5559_v28 }
 0x457   : > { %v5502_v26 = vadd.f32 %v9640_v56, %v5463_v10  ;;  %7388 = vmatmul.mubr.bf16.vlgmr.msra.gmra.mrb[64].mxu0 %v5560_v14  ;;  %v5533_v35 = vmax.f32 %v5501_v23, 0.0 }
 0x458   : > { %v5500_v3 = vadd.f32 %v9640_v56, %v5461_v16  ;;  %v7349_v37 = vpop.f32.mrb[24].mxu1  ;;  %v5531_v7 = vmax.f32 %v5499_v61, 0.0 }
 0x459   : > { %v5534_v58 = vmax.f32 %v5502_v26, 0.0  ;;  %v7443_v59 = vadd.f32 %v7349_v37, %v7109_v45  ;;  %v5322_v34 = vpop.f32.mrb[25].mxu1 }
 0x45a   : > { %v5532_v62 = vmax.f32 %v5500_v3, 0.0  ;;  %v7444_v29 = vadd.f32 %v5322_v34, %v2879_v33  ;;  %v7350_v41 = vpop.f32.mrb[26].mxu1 }
 0x45b   : > { %v5466_v53 = vmul.f32 %v7443_v59, %v9638_v60  ;;  %v7445_v49 = vadd.f32 %v7350_v41, %v7110_v39  ;;  %v5325_v52 = vpop.f32.mrb[27].mxu1  ;;  %v5562_v36 = vpack.c.bf16 %v5534_v58, %v5533_v35 }
 0x45c   : > { %v5464_v21 = vmul.f32 %v7444_v29, %v9638_v60  ;;  %v7446_v25 = vadd.f32 %v5325_v52, %v2882_v30  ;;  %v5561_v57 = vpack.c.bf16 %v5532_v62, %v5531_v7 }
 0x45d   : > { %v5505_v27 = vadd.f32 %v9640_v56, %v5466_v53  ;;  %v5467_v42 = vmul.f32 %v7445_v49, %v9638_v60 }
 0x45e   : > { %v5503_v45 = vadd.f32 %v9640_v56, %v5464_v21  ;;  %v5465_v6 = vmul.f32 %v7446_v25, %v9638_v60  ;;  %7391 = vmatprep.mubr.bf16.mxu0 %v5561_v57 }
 0x45f   : > { %v5506_v33 = vadd.f32 %v9640_v56, %v5467_v42  ;;  %7392 = vmatmul.mubr.bf16.gmra.mrb[68].mxu0 %v5562_v36  ;;  %v5537_v17 = vmax.f32 %v5505_v27, 0.0 }
 0x460   : > { %v5504_v39 = vadd.f32 %v9640_v56, %v5465_v6  ;;  %v7353_v50 = vpop.f32.mrb[28].mxu1  ;;  %v5535_v1 = vmax.f32 %v5503_v45, 0.0 }
 0x461   : > { %v5538_v4 = vmax.f32 %v5506_v33, 0.0  ;;  %v7447_v30 = vadd.f32 %v7353_v50, %v9630_v38  ;;  %v5338_v48 = vpop.f32.mrb[29].mxu1 }
 0x462   : > { %v5536_v2 = vmax.f32 %v5504_v39, 0.0  ;;  %v7448_v14 = vadd.f32 %v5338_v48, %v9632_v20  ;;  %v7354_v12 = vpop.f32.mrb[30].mxu1 }
 0x463   : > { %v5470_v13 = vmul.f32 %v7447_v30, %v9638_v60  ;;  %v7449_v31 = vadd.f32 %v7354_v12, %v9634_v47  ;;  %v5341_v32 = vpop.f32.mrb[31].mxu1  ;;  %v5564_v24 = vpack.c.bf16 %v5538_v4, %v5537_v17 }
 0x464   : > { %v5468_v28 = vmul.f32 %v7448_v14, %v9638_v60  ;;  %v7450_v23 = vadd.f32 %v5341_v32, %v9636_v8  ;;  %v5563_v10 = vpack.c.bf16 %v5536_v2, %v5535_v1 }
 0x465   : > { %v5509_v61 = vadd.f32 %v9640_v56, %v5470_v13  ;;  %v5471_v38 = vmul.f32 %v7449_v31, %v9638_v60 }
 0x466   : > { %v5507_v16 = vadd.f32 %v9640_v56, %v5468_v28  ;;  %v5469_v20 = vmul.f32 %v7450_v23, %v9638_v60  ;;  %7395 = vmatprep.mubr.bf16.mxu0 %v5563_v10 }
 0x467   : > { %v5510_v26 = vadd.f32 %v9640_v56, %v5471_v38  ;;  %7396 = vmatmul.mubr.bf16.gmra.mrb[72].mxu0 %v5564_v24  ;;  %v5541_v37 = vmax.f32 %v5509_v61, 0.0 }
 0x468   : > { %v5508_v47 = vadd.f32 %v9640_v56, %v5469_v20  ;;  %v7357_v3 = vpop.f32.mrb[0].mxu1  ;;  %v5539_v59 = vmax.f32 %v5507_v16, 0.0 }
 0x469   : > { %v5542_v35 = vmax.f32 %v5510_v26, 0.0  ;;  %v7451_v8 = vadd.f32 %v7357_v3, %v9598_v54  ;;  %v5354_v58 = vpop.f32.mrb[1].mxu1 }
 0x46a   : > { %v5540_v34 = vmax.f32 %v5508_v47, 0.0  ;;  %v7452_v7 = vadd.f32 %v5354_v58, %v9600_v0  ;;  %v7358_v62 = vpop.f32.mrb[2].mxu1 }
 0x46b   : > { %v5474_v29 = vmul.f32 %v7451_v8, %v9638_v60  ;;  %v7453_v41 = vadd.f32 %v7358_v62, %v9602_v19  ;;  %v5357_v53 = vpop.f32.mrb[3].mxu1  ;;  %v5566_v49 = vpack.c.bf16 %v5542_v35, %v5541_v37 }
 0x46c   : > { %v5472_v52 = vmul.f32 %v7452_v7, %v9638_v60  ;;  %v7454_v36 = vadd.f32 %v5357_v53, %v9604_v11  ;;  %v5565_v21 = vpack.c.bf16 %v5540_v34, %v5539_v59 }
 0x46d   : > { %v5513_v25 = vadd.f32 %v9640_v56, %v5474_v29  ;;  %v5475_v54 = vmul.f32 %v7453_v41, %v9638_v60 }
 0x46e   : > { %v5511_v57 = vadd.f32 %v9640_v56, %v5472_v52  ;;  %v5473_v0 = vmul.f32 %v7454_v36, %v9638_v60  ;;  %7399 = vmatprep.mubr.bf16.mxu0 %v5565_v21 }
 0x46f   : > { %v5514_v27 = vadd.f32 %v9640_v56, %v5475_v54  ;;  %7400 = vmatmul.mubr.bf16.gmra.mrb[76].mxu0 %v5566_v49  ;;  %v5545_v45 = vmax.f32 %v5513_v25, 0.0 }
 0x470   : > { %v5512_v19 = vadd.f32 %v9640_v56, %v5473_v0  ;;  %v7361_v42 = vpop.f32.mrb[4].mxu1  ;;  %v5543_v39 = vmax.f32 %v5511_v57, 0.0 }
 0x471   : > { %v5546_v6 = vmax.f32 %v5514_v27, 0.0  ;;  %v7455_v11 = vadd.f32 %v7361_v42, %v9606_v22  ;;  %v5370_v33 = vpop.f32.mrb[5].mxu1 }
 0x472   : > { %v5544_v50 = vmax.f32 %v5512_v19, 0.0  ;;  %v7456_v17 = vadd.f32 %v5370_v33, %v9608_v40  ;;  %v7362_v4 = vpop.f32.mrb[6].mxu1 }
 0x473   : > { %v5478_v30 = vmul.f32 %v7455_v11, %v9638_v60  ;;  %v7457_v48 = vadd.f32 %v7362_v4, %v9610_v44  ;;  %v5373_v1 = vpop.f32.mrb[7].mxu1  ;;  %v5568_v2 = vpack.c.bf16 %v5546_v6, %v5545_v45 }
 0x474   : > { %v5476_v14 = vmul.f32 %v7456_v17, %v9638_v60  ;;  %v7458_v12 = vadd.f32 %v5373_v1, %v9612_v46  ;;  %v5567_v13 = vpack.c.bf16 %v5544_v50, %v5543_v39  ;;  %v9728_v1 = vld [vmem:[#allocation18] ss:$0 sm:$0xff] }
 0x475   : > { %v5517_v31 = vadd.f32 %v9640_v56, %v5478_v30  ;;  %v5479_v22 = vmul.f32 %v7457_v48, %v9638_v60  ;;  %v9726_v48 = vld [vmem:[#allocation17] ss:$0 sm:$0xff] }
 0x476   : > { %v5515_v32 = vadd.f32 %v9640_v56, %v5476_v14  ;;  %v5477_v40 = vmul.f32 %v7458_v12, %v9638_v60  ;;  %7403 = vmatprep.mubr.bf16.mxu0 %v5567_v13  ;;  %v8027_v13 = vld [vmem:[%s8803_s27] sm:$0xff]  }
 0x477   : > { %v5518_v24 = vadd.f32 %v9640_v56, %v5479_v22  ;;  %7404 = vmatmul.mubr.bf16.gmra.mrb[80].mxu0 %v5568_v2  ;;  %v5549_v23 = vmax.f32 %v5517_v31, 0.0  ;;  %v8026_v2 = vld [vmem:[%s8803_s27 + $0x8] sm:$0xff]   ;;  %v5878_v31 = vunpack.c.l.bf16 %v8027_v13 }
 0x478   : > { %v5516_v44 = vadd.f32 %v9640_v56, %v5477_v40  ;;  %v7365_v28 = vpop.f32.mrb[8].mxu1  ;;  %v5547_v38 = vmax.f32 %v5515_v32, 0.0  ;;  %v5880_v14 = vunpack.c.l.bf16 %v8026_v2  ;;  %v5881_v40 = vunpack.c.h.bf16 %v8026_v2 }
 0x479   : > { %v5550_v10 = vmax.f32 %v5518_v24, 0.0  ;;  %v7459_v46 = vadd.f32 %v7365_v28, %v9614_v51  ;;  %v5386_v61 = vpop.f32.mrb[9].mxu1 }
 0x47a   : > { %v5548_v16 = vmax.f32 %v5516_v44, 0.0  ;;  %v7460_v20 = vadd.f32 %v5386_v61, %v9616_v43  ;;  %v7366_v26 = vpop.f32.mrb[10].mxu1 }
 0x47b   : > { %v5482_v47 = vmul.f32 %v7459_v46, %v9638_v60  ;;  %v7461_v3 = vadd.f32 %v7366_v26, %v9618_v18  ;;  %v5389_v37 = vpop.f32.mrb[11].mxu1  ;;  %v5570_v35 = vpack.c.bf16 %v5550_v10, %v5549_v23  ;;  %v5879_v23 = vunpack.c.h.bf16 %v8027_v13 }
 0x47c   : > { %v5480_v8 = vmul.f32 %v7460_v20, %v9638_v60  ;;  %v7462_v58 = vadd.f32 %v5389_v37, %v9620_v55  ;;  %v5569_v59 = vpack.c.bf16 %v5548_v16, %v5547_v38 }
 0x47d   : > { %v5521_v34 = vadd.f32 %v9640_v56, %v5482_v47  ;;  %v5483_v51 = vmul.f32 %v7461_v3, %v9638_v60 }
 0x47e   : > { %v5519_v7 = vadd.f32 %v9640_v56, %v5480_v8  ;;  %v5481_v43 = vmul.f32 %v7462_v58, %v9638_v60  ;;  %7407 = vmatprep.mubr.bf16.mxu0 %v5569_v59  ;;  %v8028_v8 = vld [vmem:[%s8803_s27 + $0x18] sm:$0xff]  }
 0x47f   : > { %v5522_v62 = vadd.f32 %v9640_v56, %v5483_v51  ;;  %7408 = vmatmul.mubr.bf16.gmra.mrb[84].mxu0 %v5570_v35  ;;  %v5553_v41 = vmax.f32 %v5521_v34, 0.0  ;;  %v5884_v58 = vunpack.c.l.bf16 %v8028_v8 }
 0x480   : > { %v5520_v18 = vadd.f32 %v9640_v56, %v5481_v43  ;;  %v7369_v29 = vpop.f32.mrb[12].mxu1  ;;  %v5551_v52 = vmax.f32 %v5519_v7, 0.0  ;;  %v8029_v7 = vld [vmem:[%s8803_s27 + $0x10] sm:$0xff]  }
 0x481   : > { %v5554_v53 = vmax.f32 %v5522_v62, 0.0  ;;  %v7463_v55 = vadd.f32 %v7369_v29, %v9622_v63  ;;  %v5402_v49 = vpop.f32.mrb[13].mxu1  ;;  %v5882_v43 = vunpack.c.l.bf16 %v8029_v7 }
 0x482   : > { %v5552_v36 = vmax.f32 %v5520_v18, 0.0  ;;  %v7464_v21 = vadd.f32 %v5402_v49, %v9624_v9  ;;  %v7370_v25 = vpop.f32.mrb[14].mxu1 }
 0x483   : > { %v5486_v54 = vmul.f32 %v7463_v55, %v9638_v60  ;;  %v7465_v57 = vadd.f32 %v7370_v25, %v9626_v5  ;;  %v5405_v0 = vpop.f32.mrb[15].mxu1  ;;  %v5572_v27 = vpack.c.bf16 %v5554_v53, %v5553_v41  ;;  %v5885_v41 = vunpack.c.h.bf16 %v8028_v8 }
 0x484   : > { %v5484_v19 = vmul.f32 %v7464_v21, %v9638_v60  ;;  %v7466_v42 = vadd.f32 %v5405_v0, %v9628_v15  ;;  %v5571_v45 = vpack.c.bf16 %v5552_v36, %v5551_v52  ;;  %v5883_v52 = vunpack.c.h.bf16 %v8029_v7 }
 0x485   : > { %v5525_v6 = vadd.f32 %v9640_v56, %v5486_v54  ;;  %v5487_v63 = vmul.f32 %v7465_v57, %v9638_v60 }
 0x486   : > { %v5523_v11 = vadd.f32 %v9640_v56, %v5484_v19  ;;  %v5485_v9 = vmul.f32 %v7466_v42, %v9638_v60  ;;  %7411 = vmatprep.mubr.bf16.mxu0 %v5571_v45 }
 0x487   : > { %v5526_v33 = vadd.f32 %v9640_v56, %v5487_v63  ;;  %7412 = vmatmul.mubr.bf16.gmra.mrb[88].mxu0 %v5572_v27  ;;  %v5557_v39 = vmax.f32 %v5525_v6, 0.0  ;;  %v8030_v63 = vld [vmem:[%s8803_s27 + $0x28] sm:$0xff]  }
 0x488   : > { %v5524_v5 = vadd.f32 %v9640_v56, %v5485_v9  ;;  %v5555_v15 = vmax.f32 %v5523_v11, 0.0  ;;  %v5888_v11 = vunpack.c.l.bf16 %v8030_v63 }
 0x489   : > { %v5558_v50 = vmax.f32 %v5526_v33, 0.0 }
 0x48a   : > { %v5556_v17 = vmax.f32 %v5524_v5, 0.0 }
 0x48b   : > { %v5574_v4 = vpack.c.bf16 %v5558_v50, %v5557_v39  ;;  %v8031_v39 = vld [vmem:[%s8803_s27 + $0x20] sm:$0xff]  }
 0x48c   : > { %v5573_v30 = vpack.c.bf16 %v5556_v17, %v5555_v15  ;;  %v5886_v50 = vunpack.c.l.bf16 %v8031_v39 }
 0x48e   : > { %7415 = vmatprep.mubr.bf16.mxu0 %v5573_v30  ;;  %v5889_v30 = vunpack.c.h.bf16 %v8030_v63 }
 0x48f   : > { %7416 = vmatmul.mubr.bf16.gmra.mrb[92].mxu0 %v5574_v4 }
 0x52a   : > { %v7389_v60 = vpop.f32.mrb[64].mxu0 }
 0x52b   : > { %v5809_v12 = vmul.f32 %v7389_v60, %v9726_v48  ;;  %v5673_v56 = vpop.f32.mrb[65].mxu0 }
 0x52c   : > { %v5807_v22 = vmul.f32 %v9726_v48, %v5673_v56  ;;  %v7390_v32 = vpop.f32.mrb[66].mxu0 }
 0x52d   : > { %v5848_v24 = vadd.f32 %v9728_v1, %v5809_v12  ;;  %v5810_v44 = vmul.f32 %v7390_v32, %v9726_v48  ;;  %v5676_v28 = vpop.f32.mrb[67].mxu0  ;;  %v5887_v12 = vunpack.c.h.bf16 %v8031_v39 }
 0x52e   : > { %v5846_v10 = vadd.f32 %v9728_v1, %v5807_v22  ;;  %v5808_v46 = vmul.f32 %v9726_v48, %v5676_v28 }
 0x52f   : > { %v5912_v61 = vadd.f32 %v5880_v14, %v5848_v24  ;;  %v5849_v38 = vadd.f32 %v9728_v1, %v5810_v44 }
 0x530   : > { %v5910_v16 = vadd.f32 %v5878_v31, %v5846_v10  ;;  %v5847_v20 = vadd.f32 %v9728_v1, %v5808_v46  ;;  %v8032_v46 = vld [vmem:[%s8803_s27 + $0x38] sm:$0xff]  }
 0x531   : > { %v5944_v26 = vmax.f32 %v5912_v61, 0.0  ;;  %v5913_v47 = vadd.f32 %v5881_v40, %v5849_v38  ;;  %v5892_v61 = vunpack.c.l.bf16 %v8032_v46  ;;  %v5893_v8 = vunpack.c.h.bf16 %v8032_v46 }
 0x532   : > { %v5942_v3 = vmax.f32 %v5910_v16, 0.0  ;;  %v5911_v37 = vadd.f32 %v5879_v23, %v5847_v20  ;;  %v7393_v35 = vpop.f32.mrb[68].mxu0 }
 0x533   : > { %5976 = vst [vmem:[%s9742_s25 + $0x10] sm:$0xff] %v5944_v26  ;;  %v5945_v59 = vmax.f32 %v5913_v47, 0.0  ;;  %v5813_v34 = vmul.f32 %v7393_v35, %v9726_v48  ;;  %v5689_v51 = vpop.f32.mrb[69].mxu0  ;;  %v8033_v26 = vld [vmem:[%s8803_s27 + $0x30] sm:$0xff]  }
 0x534   : > { %5974 = vst [vmem:[%s9742_s25] sm:$0xff] %v5942_v3  ;;  %v5943_v62 = vmax.f32 %v5911_v37, 0.0  ;;  %v5811_v18 = vmul.f32 %v9726_v48, %v5689_v51  ;;  %v7394_v29 = vpop.f32.mrb[70].mxu0  ;;  %v5890_v47 = vunpack.c.l.bf16 %v8033_v26  ;;  %v5891_v51 = vunpack.c.h.bf16 %v8033_v26 }
 0x535   : > { %5977 = vst [vmem:[%s9742_s25 + $0x18] sm:$0xff] %v5945_v59  ;;  %v5852_v53 = vadd.f32 %v9728_v1, %v5813_v34  ;;  %v5814_v55 = vmul.f32 %v7394_v29, %v9726_v48  ;;  %v5692_v49 = vpop.f32.mrb[71].mxu0 }
 0x536   : > { %5975 = vst [vmem:[%s9742_s25 + $0x8] sm:$0xff] %v5943_v62  ;;  %v5850_v36 = vadd.f32 %v9728_v1, %v5811_v18  ;;  %v5812_v21 = vmul.f32 %v9726_v48, %v5692_v49 }
 0x537   : > { %v5916_v25 = vadd.f32 %v5884_v58, %v5852_v53  ;;  %v5853_v54 = vadd.f32 %v9728_v1, %v5814_v55 }
 0x538   : > { %v5914_v57 = vadd.f32 %v5882_v43, %v5850_v36  ;;  %v5851_v0 = vadd.f32 %v9728_v1, %v5812_v21  ;;  %v8034_v21 = vld [vmem:[%s8803_s27 + $0x48] sm:$0xff]  }
 0x539   : > { %v5948_v27 = vmax.f32 %v5916_v25, 0.0  ;;  %v5917_v19 = vadd.f32 %v5885_v41, %v5853_v54  ;;  %v5896_v25 = vunpack.c.l.bf16 %v8034_v21  ;;  %v5897_v63 = vunpack.c.h.bf16 %v8034_v21 }
 0x53a   : > { %v5946_v42 = vmax.f32 %v5914_v57, 0.0  ;;  %v5915_v45 = vadd.f32 %v5883_v52, %v5851_v0  ;;  %v7397_v6 = vpop.f32.mrb[72].mxu0 }
 0x53b   : > { %5980 = vst [vmem:[%s9742_s25 + $0x30] sm:$0xff] %v5948_v27  ;;  %v5949_v9 = vmax.f32 %v5917_v19, 0.0  ;;  %v5817_v33 = vmul.f32 %v7397_v6, %v9726_v48  ;;  %v5705_v5 = vpop.f32.mrb[73].mxu0  ;;  %v8035_v27 = vld [vmem:[%s8803_s27 + $0x40] sm:$0xff]  }
 0x53c   : > { %5978 = vst [vmem:[%s9742_s25 + $0x20] sm:$0xff] %v5946_v42  ;;  %v5947_v15 = vmax.f32 %v5915_v45, 0.0  ;;  %v5815_v17 = vmul.f32 %v9726_v48, %v5705_v5  ;;  %v7398_v4 = vpop.f32.mrb[74].mxu0  ;;  %v5894_v19 = vunpack.c.l.bf16 %v8035_v27  ;;  %v5895_v5 = vunpack.c.h.bf16 %v8035_v27 }
 0x53d   : > { %5981 = vst [vmem:[%s9742_s25 + $0x38] sm:$0xff] %v5949_v9  ;;  %v5856_v60 = vadd.f32 %v9728_v1, %v5817_v33  ;;  %v5818_v2 = vmul.f32 %v7398_v4, %v9726_v48  ;;  %v5708_v14 = vpop.f32.mrb[75].mxu0 }
 0x53e   : > { %5979 = vst [vmem:[%s9742_s25 + $0x28] sm:$0xff] %v5947_v15  ;;  %v5854_v56 = vadd.f32 %v9728_v1, %v5815_v17  ;;  %v5816_v13 = vmul.f32 %v9726_v48, %v5708_v14 }
 0x53f   : > { %v5920_v31 = vadd.f32 %v5888_v11, %v5856_v60  ;;  %v5857_v22 = vadd.f32 %v9728_v1, %v5818_v2 }
 0x540   : > { %v5918_v32 = vadd.f32 %v5886_v50, %v5854_v56  ;;  %v5855_v40 = vadd.f32 %v9728_v1, %v5816_v13  ;;  %v8036_v13 = vld [vmem:[%s8803_s27 + $0x58] sm:$0xff]  }
 0x541   : > { %v5952_v24 = vmax.f32 %v5920_v31, 0.0  ;;  %v5921_v44 = vadd.f32 %v5889_v30, %v5857_v22  ;;  %v5900_v31 = vunpack.c.l.bf16 %v8036_v13  ;;  %v5901_v46 = vunpack.c.h.bf16 %v8036_v13 }
 0x542   : > { %v5950_v28 = vmax.f32 %v5918_v32, 0.0  ;;  %v5919_v23 = vadd.f32 %v5887_v12, %v5855_v40  ;;  %v7401_v10 = vpop.f32.mrb[76].mxu0 }
 0x543   : > { %5984 = vst [vmem:[%s9742_s25 + $0x50] sm:$0xff] %v5952_v24  ;;  %v5953_v38 = vmax.f32 %v5921_v44, 0.0  ;;  %v5821_v16 = vmul.f32 %v7401_v10, %v9726_v48  ;;  %v5721_v20 = vpop.f32.mrb[77].mxu0  ;;  %v8037_v24 = vld [vmem:[%s8803_s27 + $0x50] sm:$0xff]  }
 0x544   : > { %5982 = vst [vmem:[%s9742_s25 + $0x40] sm:$0xff] %v5950_v28  ;;  %v5951_v3 = vmax.f32 %v5919_v23, 0.0  ;;  %v5819_v37 = vmul.f32 %v9726_v48, %v5721_v20  ;;  %v7402_v35 = vpop.f32.mrb[78].mxu0  ;;  %v5898_v44 = vunpack.c.l.bf16 %v8037_v24  ;;  %v5899_v20 = vunpack.c.h.bf16 %v8037_v24 }
 0x545   : > { %5985 = vst [vmem:[%s9742_s25 + $0x58] sm:$0xff] %v5953_v38  ;;  %v5860_v58 = vadd.f32 %v9728_v1, %v5821_v16  ;;  %v5822_v59 = vmul.f32 %v7402_v35, %v9726_v48  ;;  %v5724_v34 = vpop.f32.mrb[79].mxu0 }
 0x546   : > { %5983 = vst [vmem:[%s9742_s25 + $0x48] sm:$0xff] %v5951_v3  ;;  %v5858_v7 = vadd.f32 %v9728_v1, %v5819_v37  ;;  %v5820_v43 = vmul.f32 %v9726_v48, %v5724_v34 }
 0x547   : > { %v5924_v62 = vadd.f32 %v5892_v61, %v5860_v58  ;;  %v5861_v18 = vadd.f32 %v9728_v1, %v5822_v59 }
 0x548   : > { %v5922_v29 = vadd.f32 %v5890_v47, %v5858_v7  ;;  %v5859_v41 = vadd.f32 %v9728_v1, %v5820_v43  ;;  %v8038_v43 = vld [vmem:[%s8803_s27 + $0x68] sm:$0xff]  }
 0x549   : > { %v5956_v53 = vmax.f32 %v5924_v62, 0.0  ;;  %v5925_v55 = vadd.f32 %v5893_v8, %v5861_v18  ;;  %v5904_v62 = vunpack.c.l.bf16 %v8038_v43  ;;  %v5905_v21 = vunpack.c.h.bf16 %v8038_v43 }
 0x54a   : > { %v5954_v49 = vmax.f32 %v5922_v29, 0.0  ;;  %v5923_v52 = vadd.f32 %v5891_v51, %v5859_v41  ;;  %v7405_v36 = vpop.f32.mrb[80].mxu0 }
 0x54b   : > { %5988 = vst [vmem:[%s9742_s25 + $0x70] sm:$0xff] %v5956_v53  ;;  %v5957_v54 = vmax.f32 %v5925_v55, 0.0  ;;  %v5825_v57 = vmul.f32 %v7405_v36, %v9726_v48  ;;  %v5737_v0 = vpop.f32.mrb[81].mxu0  ;;  %v8039_v53 = vld [vmem:[%s8803_s27 + $0x60] sm:$0xff]  }
 0x54c   : > { %5986 = vst [vmem:[%s9742_s25 + $0x60] sm:$0xff] %v5954_v49  ;;  %v5955_v42 = vmax.f32 %v5923_v52, 0.0  ;;  %v5823_v45 = vmul.f32 %v9726_v48, %v5737_v0  ;;  %v7406_v6 = vpop.f32.mrb[82].mxu0  ;;  %v5902_v55 = vunpack.c.l.bf16 %v8039_v53  ;;  %v5903_v0 = vunpack.c.h.bf16 %v8039_v53 }
 0x54d   : > { %5989 = vst [vmem:[%s9742_s25 + $0x78] sm:$0xff] %v5957_v54  ;;  %v5864_v11 = vadd.f32 %v9728_v1, %v5825_v57  ;;  %v5826_v9 = vmul.f32 %v7406_v6, %v9726_v48  ;;  %v5740_v33 = vpop.f32.mrb[83].mxu0 }
 0x54e   : > { %5987 = vst [vmem:[%s9742_s25 + $0x68] sm:$0xff] %v5955_v42  ;;  %v5862_v39 = vadd.f32 %v9728_v1, %v5823_v45  ;;  %v5824_v50 = vmul.f32 %v9726_v48, %v5740_v33 }
 0x54f   : > { %v5928_v15 = vadd.f32 %v5896_v25, %v5864_v11  ;;  %v5865_v17 = vadd.f32 %v9728_v1, %v5826_v9 }
 0x550   : > { %v5926_v4 = vadd.f32 %v5894_v19, %v5862_v39  ;;  %v5863_v30 = vadd.f32 %v9728_v1, %v5824_v50  ;;  %v8040_v50 = vld [vmem:[%s8803_s27 + $0x78] sm:$0xff]  }
 0x551   : > { %v5960_v60 = vmax.f32 %v5928_v15, 0.0  ;;  %v5929_v2 = vadd.f32 %v5897_v63, %v5865_v17  ;;  %v5908_v15 = vunpack.c.l.bf16 %v8040_v50  ;;  %v5909_v13 = vunpack.c.h.bf16 %v8040_v50 }
 0x552   : > { %v5958_v14 = vmax.f32 %v5926_v4, 0.0  ;;  %v5927_v12 = vadd.f32 %v5895_v5, %v5863_v30  ;;  %v7409_v56 = vpop.f32.mrb[84].mxu0 }
 0x553   : > { %5992 = vst [vmem:[%s9742_s25 + $0x90] sm:$0xff] %v5960_v60  ;;  %v5961_v22 = vmax.f32 %v5929_v2, 0.0  ;;  %v5829_v32 = vmul.f32 %v7409_v56, %v9726_v48  ;;  %v5753_v40 = vpop.f32.mrb[85].mxu0  ;;  %v8041_v60 = vld [vmem:[%s8803_s27 + $0x70] sm:$0xff]   ;;  %s8330_s27 = scalar_lea.vmem %s8329_s24, 8192 }
 0x554   : > { %5990 = vst [vmem:[%s9742_s25 + $0x80] sm:$0xff] %v5958_v14  ;;  %v5959_v28 = vmax.f32 %v5927_v12, 0.0  ;;  %v5827_v23 = vmul.f32 %v9726_v48, %v5753_v40  ;;  %v7410_v10 = vpop.f32.mrb[86].mxu0  ;;  %v5906_v2 = vunpack.c.l.bf16 %v8041_v60  ;;  %v5907_v40 = vunpack.c.h.bf16 %v8041_v60  ;;  %p8332_p10 = scmp.lt.s32.totalorder %s8330_s27, %s8324_s17 }
 0x555   : > { %5993 = vst [vmem:[%s9742_s25 + $0x98] sm:$0xff] %v5961_v22  ;;  %v5868_v61 = vadd.f32 %v9728_v1, %v5829_v32  ;;  %v5830_v38 = vmul.f32 %v7410_v10, %v9726_v48  ;;  %v5756_v16 = vpop.f32.mrb[87].mxu0 }
 0x556   : > { %5991 = vst [vmem:[%s9742_s25 + $0x88] sm:$0xff] %v5959_v28  ;;  %v5866_v26 = vadd.f32 %v9728_v1, %v5827_v23  ;;  %v5828_v47 = vmul.f32 %v9726_v48, %v5756_v16  ;;  %p8333_p11 = por %p8332_p10, %p8331_p6 }
 0x557   : > { %v5932_v3 = vadd.f32 %v5900_v31, %v5868_v61  ;;  %v5869_v37 = vadd.f32 %v9728_v1, %v5830_v38 }
 0x558   : > { %v5930_v35 = vadd.f32 %v5898_v44, %v5866_v26  ;;  %v5867_v8 = vadd.f32 %v9728_v1, %v5828_v47  ;;  %p8334_p0 = pnand %p8333_p11, %p8327_p8 }
 0x559   : > { %v5964_v58 = vmax.f32 %v5932_v3, 0.0  ;;  %v5933_v59 = vadd.f32 %v5901_v46, %v5869_v37 }
 0x55a   : > { %v5962_v34 = vmax.f32 %v5930_v35, 0.0  ;;  %v5931_v51 = vadd.f32 %v5899_v20, %v5867_v8  ;;  %v7413_v7 = vpop.f32.mrb[88].mxu0 }
 0x55b   : > { %5996 = vst [vmem:[%s9742_s25 + $0xb0] sm:$0xff] %v5964_v58  ;;  %v5965_v18 = vmax.f32 %v5933_v59, 0.0  ;;  %v5833_v29 = vmul.f32 %v7413_v7, %v9726_v48  ;;  %v5769_v41 = vpop.f32.mrb[89].mxu0 }
 0x55c   : > { %5994 = vst [vmem:[%s9742_s25 + $0xa0] sm:$0xff] %v5962_v34  ;;  %v5963_v49 = vmax.f32 %v5931_v51, 0.0  ;;  %v5831_v52 = vmul.f32 %v9726_v48, %v5769_v41  ;;  %v7414_v36 = vpop.f32.mrb[90].mxu0 }
 0x55d   : > { %5997 = vst [vmem:[%s9742_s25 + $0xb8] sm:$0xff] %v5965_v18  ;;  %v5872_v25 = vadd.f32 %v9728_v1, %v5833_v29  ;;  %v5834_v54 = vmul.f32 %v7414_v36, %v9726_v48  ;;  %v5772_v57 = vpop.f32.mrb[91].mxu0 }
 0x55e   : > { %5995 = vst [vmem:[%s9742_s25 + $0xa8] sm:$0xff] %v5963_v49  ;;  %v5870_v27 = vadd.f32 %v9728_v1, %v5831_v52  ;;  %v5832_v19 = vmul.f32 %v9726_v48, %v5772_v57 }
 0x55f   : > { %v5936_v42 = vadd.f32 %v5904_v62, %v5872_v25  ;;  %v5873_v45 = vadd.f32 %v9728_v1, %v5834_v54 }
 0x560   : > { %v5934_v6 = vadd.f32 %v5902_v55, %v5870_v27  ;;  %v5871_v63 = vadd.f32 %v9728_v1, %v5832_v19 }
 0x561   : > { %v5968_v11 = vmax.f32 %v5936_v42, 0.0  ;;  %v5937_v9 = vadd.f32 %v5905_v21, %v5873_v45 }
 0x562   : > { %v5966_v33 = vmax.f32 %v5934_v6, 0.0  ;;  %v5935_v5 = vadd.f32 %v5903_v0, %v5871_v63  ;;  %v7417_v39 = vpop.f32.mrb[92].mxu0 }
 0x563   : > { %6000 = vst [vmem:[%s9742_s25 + $0xd0] sm:$0xff] %v5968_v11  ;;  %v5969_v17 = vmax.f32 %v5937_v9, 0.0  ;;  %v5837_v4 = vmul.f32 %v7417_v39, %v9726_v48  ;;  %v5785_v30 = vpop.f32.mrb[93].mxu0 }
 0x564   : > { %5998 = vst [vmem:[%s9742_s25 + $0xc0] sm:$0xff] %v5966_v33  ;;  %v5967_v14 = vmax.f32 %v5935_v5, 0.0  ;;  %v5835_v12 = vmul.f32 %v9726_v48, %v5785_v30  ;;  %v7418_v56 = vpop.f32.mrb[94].mxu0 }
 0x565   : > { %6001 = vst [vmem:[%s9742_s25 + $0xd8] sm:$0xff] %v5969_v17  ;;  %v5876_v31 = vadd.f32 %v9728_v1, %v5837_v4  ;;  %v5838_v22 = vmul.f32 %v7418_v56, %v9726_v48  ;;  %v5788_v32 = vpop.f32.mrb[95].mxu0 }
 0x566   : > { %5999 = vst [vmem:[%s9742_s25 + $0xc8] sm:$0xff] %v5967_v14  ;;  %v5874_v24 = vadd.f32 %v9728_v1, %v5835_v12  ;;  %v5836_v44 = vmul.f32 %v9726_v48, %v5788_v32 }
 0x567   : > { %v5940_v28 = vadd.f32 %v5908_v15, %v5876_v31  ;;  %v5877_v23 = vadd.f32 %v9728_v1, %v5838_v22 }
 0x568   : > { %v5938_v10 = vadd.f32 %v5906_v2, %v5874_v24  ;;  %v5875_v46 = vadd.f32 %v9728_v1, %v5836_v44 }
 0x569   : > { %v5972_v61 = vmax.f32 %v5940_v28, 0.0  ;;  %v5941_v38 = vadd.f32 %v5909_v13, %v5877_v23 }
 0x56a   : > { %v5970_v16 = vmax.f32 %v5938_v10, 0.0  ;;  %v5939_v20 = vadd.f32 %v5907_v40, %v5875_v46 }
 0x56b   : > { %6004 = vst [vmem:[%s9742_s25 + $0xf0] sm:$0xff] %v5972_v61  ;;  %v5973_v26 = vmax.f32 %v5941_v38, 0.0 }
 0x56c   : > { %6002 = vst [vmem:[%s9742_s25 + $0xe0] sm:$0xff] %v5970_v16  ;;  %v5971_v48 = vmax.f32 %v5939_v20, 0.0 }
 0x56d   : > { %6005 = vst [vmem:[%s9742_s25 + $0xf8] sm:$0xff] %v5973_v26 }
 0x56e   : > { %6003 = vst [vmem:[%s9742_s25 + $0xe8] sm:$0xff] %v5971_v48 }
 0x56f   : > { %8337 = shalt.err (!%p8334_p0)
}
 0x570   : > { %s8338_s28 = scalar_lea.hbm %s9847_s26, 4096  ;;  %s8342_s11 = scalar_lea.hbm %s9947_s1, 8192 }
 0x571   : > { %p8339_p5 = scmp.ne.s32.totalorder %s9847_s26, %s8338_s28  ;;  %p8343_p4 = scmp.lt.u32.totalorder %s9847_s26, %s9947_s1 }
 0x572   : > { %p8344_p12 = scmp.lt.u32.totalorder %s8342_s11, %s8338_s28  ;;  %p8346_p1 = scmp.lt.u32.totalorder %s8338_s28, %s9847_s26 }
 0x573   : > { %p8340_p9 = pnand %p8339_p5, %p9948_p3 }
 0x574   : > { %p8345_p13 = por %p8344_p12, %p8343_p4 }
 0x575   : > { %p8341_p7 = pneg %p8340_p9 }
 0x576   : > { %p8347_p2 = por %p8346_p1, %p8345_p13 }
 0x578   : > { %p8348_p8 = pnand %p8347_p2, %p8341_p7 }
 0x57a   : > { %8351 = shalt.err (!%p8348_p8)
}
 0x57b   : > { %s8426_s17 = smov 128   ;;  %s8427_s24 = smov 8  }
 0x57c   : > { %7729 = dma.vmem_to_hbm [thread:$0]  (%p9948_p3), %s9849_s21, 4096, %s9847_s26, %s6007_s19, %s8426_s17, %s8426_s17, %s8427_s24  }
 0x57d PF: > { %s6035_s27 = sand.u32 1, %s8398_s13   ;;  %p9949_p6 = scmp.ne.s32.totalorder %s9926_s30, 0 }
 0x57e   : > { %p9950_p10 = scmp.ge.s32.totalorder %s8410_s16, 2  ;;  %s6036_s28 = scalar_lea.sflag [#allocation5], %s6035_s27 }
 0x580   : > { %p7764_p11 = pnand %p9950_p10, %p9949_p6 }
 0x582   : > { %8393 = dma.done.wait (!%p7764_p11), %s6036_s28, 4096  }
 0x583   : > { %8395 = vsyncadd (!%p7764_p11), %s6036_s28, 4294963200  ;;  %p28_p0 = scmp.ge.s32.totalorder %s8723_s23, 4   ;;  %s9951_s13 = smov %s8402_s14 }
 0x584   : > { %s9952_s14 = smov %s8406_s15  ;;  %s9953_s15 = smov %s8735_s10 }
 0x585   : > { %s9954_s16 = smov %s8723_s23  ;;  %30 = sbr.rel (!%p28_p0) target bundleno = 13 (0xd), region = 151 }
 0x58c   :  { %6041 = vsyncpa [#allocation4], 1 }
 0x58d   :  { %6043 = vsyncpa [#allocation4 + $0x1], 1 }
 0x58e   :  { %6044 = vsyncpa [#allocation7], 1 }
 0x58f   :  { %6045 = vsyncpa [#allocation10], 1 }
 0x590   :  { %6046 = vsyncpa [#allocation13], 1 }
 0x591   :  { %6047 = vsyncpa [#allocation16], 1 }
 0x592   :  { %6048 = vsyncpa [#allocation19], 1 }
 0x593   :  { %6049 = vsyncpa [#allocation5], 1 }
 0x594   :  { %6051 = vsyncpa [#allocation5 + $0x1], 1 }

</bundles_post_ra>
